<compile_context>
chip_gen: v7x
topology: tpu7x:2x2x1
jax: 0.10.0
libtpu: 0.0.40
codegen_flags: <defaults>
</compile_context>

<pallas_src>
import numpy as np
import jax
import jax.numpy as jnp
from jax.experimental import pallas as pl
from jax.experimental.pallas import tpu as pltpu

NUM_CLASSES = 7
TILE_NP = 512                     # pooled-pixel tile per conv grid step
K_CHUNK = 5504                    # fc1 reduction chunk (= 43*128); 43808 -> pad to 8 chunks
VMEM_LIMIT = 32 * 1024 * 1024     # safe on v5e/v6e/v7x


# ----------------------------------------------------------------------------
# Pallas kernels
# ----------------------------------------------------------------------------
def _conv_relu_pool_kernel(xp_ref, w_ref, b_ref, o_ref):
    # xp_ref: (1, 4, 9*Cin, TILE_NP) bf16  -- im2col cols for the 4 pool phases
    # w_ref : (Cout, 9*Cin)          bf16
    # b_ref : (Cout, 1)              f32
    # o_ref : (1, Cout, TILE_NP)     bf16  (lane-dense: TILE_NP is minor)
    w = w_ref[...]
    m = jnp.dot(w, xp_ref[0, 0], preferred_element_type=jnp.float32)
    for ph in range(1, 4):                       # max over the 2x2 pool window
        m = jnp.maximum(m, jnp.dot(w, xp_ref[0, ph],
                                   preferred_element_type=jnp.float32))
    o_ref[0] = jnp.maximum(m + b_ref[...], 0.0).astype(o_ref.dtype)


def conv_relu_pool(patches, w2d, b2, tile_np):
    """patches: (B,4,9*Cin,Np_pad) bf16; w2d: (Cout,9*Cin) bf16; b2: (Cout,1) f32."""
    B, _, k9, np_pad = patches.shape
    cout = w2d.shape[0]
    n_tiles = np_pad // tile_np
    return pl.pallas_call(
        _conv_relu_pool_kernel,
        out_shape=jax.ShapeDtypeStruct((B, cout, np_pad), jnp.bfloat16),
        grid=(B, n_tiles),
        in_specs=[
            pl.BlockSpec((1, 4, k9, tile_np), lambda b, t: (b, 0, 0, t)),
            pl.BlockSpec((cout, k9), lambda b, t: (0, 0)),
            pl.BlockSpec((cout, 1), lambda b, t: (0, 0)),
        ],
        out_specs=pl.BlockSpec((1, cout, tile_np), lambda b, t: (b, 0, t)),
        compiler_params=pltpu.CompilerParams(
            dimension_semantics=("parallel", "parallel"),
            vmem_limit_bytes=VMEM_LIMIT),
    )(patches, w2d, b2)


def _fc_head_kernel(x_ref, w1_ref, b1_ref, w2_ref, b2_ref, o_ref, acc_ref):
    # x_ref : (B, K_CHUNK)  bf16   flattened features (torch NCHW flatten order)
    # w1_ref: (K_CHUNK, 64) bf16   streamed fc1 weight chunk
    # b1_ref: (1, 64) f32, w2_ref: (64, C) f32, b2_ref: (1, C) f32
    # o_ref : (B, C) f32           softmax probabilities
    # acc_ref: (B, 64) f32 VMEM scratch, persists across the K grid
    k = pl.program_id(0)

    @pl.when(k == 0)
    def _():
        acc_ref[...] = jnp.zeros_like(acc_ref)

    acc_ref[...] += jnp.dot(x_ref[...], w1_ref[...],
                            preferred_element_type=jnp.float32)

    @pl.when(k == pl.num_programs(0) - 1)
    def _():
        h = jnp.maximum(acc_ref[...] + b1_ref[...], 0.0)
        logits = jnp.dot(h, w2_ref[...],
                         preferred_element_type=jnp.float32) + b2_ref[...]
        m = jnp.max(logits, axis=-1, keepdims=True)
        e = jnp.exp(logits - m)
        o_ref[...] = (e / jnp.sum(e, axis=-1, keepdims=True)).astype(o_ref.dtype)


def fc_head(feat, w1, b1, w2, b2, k_chunk):
    """feat: (B,K_pad) bf16; w1: (K_pad,64) bf16; b1,w2,b2: f32."""
    B, k_pad = feat.shape
    d1 = w1.shape[-1]
    c = w2.shape[-1]
    n_k = k_pad // k_chunk
    return pl.pallas_call(
        _fc_head_kernel,
        out_shape=jax.ShapeDtypeStruct((B, c), jnp.float32),
        grid=(n_k,),
        in_specs=[
            pl.BlockSpec((B, k_chunk), lambda k: (0, k)),
            pl.BlockSpec((k_chunk, d1), lambda k: (k, 0)),
            pl.BlockSpec((1, d1), lambda k: (0, 0)),
            pl.BlockSpec((d1, c), lambda k: (0, 0)),
            pl.BlockSpec((1, c), lambda k: (0, 0)),
        ],
        out_specs=pl.BlockSpec((B, c), lambda k: (0, 0)),
        scratch_shapes=[pltpu.VMEM((B, d1), jnp.float32)],
        compiler_params=pltpu.CompilerParams(
            dimension_semantics=("arbitrary",),
            vmem_limit_bytes=VMEM_LIMIT),
    )(feat, w1, b1, w2, b2)


# ----------------------------------------------------------------------------
# Glue (plain JAX): per-pool-phase im2col in NCHW, K along sublanes / Np along lanes
# ----------------------------------------------------------------------------
def build_im2col_phases(x_nchw, tile_np):
    """(B,C,H,W) (H,W even) -> ((B, 4, 9*C, Np_pad), Np).

    out[b, 2*p+q, (dy*3+dx)*C + c, i*Wo+j] = pad1(x)[b, c, 2*i+p+dy, 2*j+q+dx],
    i.e. the SAME-padded 3x3 conv receptive field of output pixel (2i+p, 2j+q).
    """
    B, C, H, W = x_nchw.shape
    Ho, Wo = H // 2, W // 2
    Np = Ho * Wo
    xp = jnp.pad(x_nchw, ((0, 0), (0, 0), (1, 1), (1, 1)))
    phases = []
    for p in range(2):
        for q in range(2):
            taps = []
            for dy in range(3):
                for dx in range(3):
                    sl = xp[:, :, p + dy:p + dy + 2 * Ho:2,
                            q + dx:q + dx + 2 * Wo:2]          # (B, C, Ho, Wo)
                    taps.append(sl.reshape(B, C, Np))
            phases.append(jnp.concatenate(taps, axis=1))        # (B, 9C, Np)
    out = jnp.stack(phases, axis=1)                              # (B, 4, 9C, Np)
    pad = -Np % tile_np
    if pad:
        out = jnp.pad(out, ((0, 0), (0, 0), (0, 0), (0, pad)))
    return out, Np


def somi_cnn_forward(x_nchw, P):
    x = x_nchw.astype(jnp.bfloat16)                                # NCHW bf16
    B, _, H, W = x.shape
    H1, W1 = H // 2, W // 2
    H2, W2 = H // 4, W // 4

    # conv1 + relu + pool   (output is (B, 16, Np1) == NCHW)
    p1, np1 = build_im2col_phases(x, TILE_NP)
    w1k = P["conv1_w"].reshape(9 * 3, 16).T.astype(jnp.bfloat16)   # (16, 27)
    y1 = conv_relu_pool(p1, w1k, P["conv1_b"].reshape(16, 1), TILE_NP)[:, :, :np1]
    y1 = y1.reshape(B, 16, H1, W1)

    # conv2 + relu + pool   (output is (B, 32, Np2) == NCHW)
    p2, np2 = build_im2col_phases(y1, TILE_NP)
    w2k = P["conv2_w"].reshape(9 * 16, 32).T.astype(jnp.bfloat16)  # (32, 144)
    y2 = conv_relu_pool(p2, w2k, P["conv2_b"].reshape(32, 1), TILE_NP)[:, :, :np2]

    # torch.flatten(x, 1) on NCHW == direct reshape of (B, 32, H2*W2)
    feat = y2.reshape(B, 32 * H2 * W2)
    K = feat.shape[1]
    k_pad = -K % K_CHUNK
    feat = jnp.pad(feat, ((0, 0), (0, k_pad)))                     # bf16
    w1_fc = jnp.pad(P["fc1_w"], ((0, k_pad), (0, 0))).astype(jnp.bfloat16)

    return fc_head(feat, w1_fc, P["fc1_b"].reshape(1, -1),
                   P["fc2_w"], P["fc2_b"].reshape(1, -1), K_CHUNK)


# ----------------------------------------------------------------------------
# Deterministic parameter init (PyTorch shapes, converted to canonical layout)
# ----------------------------------------------------------------------------
def init_params(key):
    ks = jax.random.split(key, 8)

    def uinit(k, shape, fan_in):
        bound = 1.0 / np.sqrt(fan_in)
        return jax.random.uniform(k, shape, jnp.float32, -bound, bound)

    Kfc = 32 * 37 * 37
    conv1_w = uinit(ks[0], (16, 3, 3, 3), 3 * 9)       # torch (Cout,Cin,kh,kw)
    conv1_b = uinit(ks[1], (16,), 3 * 9)
    conv2_w = uinit(ks[2], (32, 16, 3, 3), 16 * 9)
    conv2_b = uinit(ks[3], (32,), 16 * 9)
    fc1_w = uinit(ks[4], (64, Kfc), Kfc)               # torch (out, in)
    fc1_b = uinit(ks[5], (64,), Kfc)
    fc2_w = uinit(ks[6], (NUM_CLASSES, 64), 64)
    fc2_b = uinit(ks[7], (NUM_CLASSES,), 64)

    return dict(
        conv1_w=jnp.transpose(conv1_w, (2, 3, 1, 0)),  # (kh,kw,Cin,Cout) HWIO
        conv1_b=conv1_b,
        conv2_w=jnp.transpose(conv2_w, (2, 3, 1, 0)),
        conv2_b=conv2_b,
        fc1_w=fc1_w.T,                                 # (Kfc, 64)
        fc1_b=fc1_b,
        fc2_w=fc2_w.T,                                 # (64, num_classes)
        fc2_b=fc2_b,
    )


# ----------------------------------------------------------------------------
# Pure-JAX reference for a correctness check
# ----------------------------------------------------------------------------
def ref_forward(x_nchw, P):
    hp = jax.lax.Precision.HIGHEST
    x = jnp.transpose(x_nchw, (0, 2, 3, 1)).astype(jnp.float32)

    def conv(z, w, b):
        y = jax.lax.conv_general_dilated(
            z, w, window_strides=(1, 1), padding="SAME",
            dimension_numbers=("NHWC", "HWIO", "NHWC"), precision=hp)
        return y + b.reshape(1, 1, 1, -1)

    def pool(z):
        return jax.lax.reduce_window(z, -jnp.inf, jax.lax.max,
                                     (1, 2, 2, 1), (1, 2, 2, 1), "VALID")

    y = pool(jax.nn.relu(conv(x, P["conv1_w"], P["conv1_b"])))
    y = pool(jax.nn.relu(conv(y, P["conv2_w"], P["conv2_b"])))
    B = y.shape[0]
    feat = jnp.transpose(y, (0, 3, 1, 2)).reshape(B, -1)
    h = jax.nn.relu(jnp.dot(feat, P["fc1_w"], precision=hp) + P["fc1_b"])
    logits = jnp.dot(h, P["fc2_w"], precision=hp) + P["fc2_b"]
    return jax.nn.softmax(logits, axis=1)


if __name__ == "__main__":
    key = jax.random.PRNGKey(0)
    pkey, xkey = jax.random.split(key)
    params = init_params(pkey)

    # Input spatial size 148 is dictated by fc1's 32*37*37 expectation.
    x = jax.random.normal(xkey, (2, 3, 148, 148), dtype=jnp.float32)

    fwd = jax.jit(somi_cnn_forward)
    probs = jax.block_until_ready(fwd(x, params))

    ref = jax.block_until_ready(ref_forward(x, params))
    assert probs.shape == (2, NUM_CLASSES)
    np.testing.assert_allclose(np.asarray(probs), np.asarray(ref),
                               rtol=1e-2, atol=2e-3)
    np.testing.assert_allclose(np.asarray(probs).sum(axis=1),
                               np.ones(2), rtol=1e-5, atol=1e-5)
    print("KERNEL_OK")
</pallas_src>

<mosaic_0001>
module attributes {stable_mosaic.version = 11 : i64} {
  func.func @_conv_relu_pool_kernel(%arg0: i32, %arg1: i32, %arg2: memref<1x4x27x512xbf16, #tpu.memory_space<vmem>>, %arg3: memref<16x27xbf16, #tpu.memory_space<vmem>>, %arg4: memref<16x1xf32, #tpu.memory_space<vmem>>, %arg5: memref<1x16x512xbf16, #tpu.memory_space<vmem>>) attributes {dimension_semantics = [#tpu.dimension_semantics<parallel>, #tpu.dimension_semantics<parallel>], iteration_bounds = array<i64: 2, 11>, scalar_prefetch = 0 : i64, scratch_operands = 0 : i64, tpu.core_type = #tpu.core_type<tc>, window_params = [{transform_indices = @transform_0, window_bounds = array<i64: 1, 4, 27, 512>}, {pipeline_mode = #tpu.pipeline_mode<synchronous>, transform_indices = @transform_1, window_bounds = array<i64: 16, 27>}, {pipeline_mode = #tpu.pipeline_mode<synchronous>, transform_indices = @transform_2, window_bounds = array<i64: 16, 1>}, {transform_indices = @transform_3, window_bounds = array<i64: 1, 16, 512>}]} {
    %c0 = arith.constant 0 : index
    %c0_0 = arith.constant 0 : index
    %0 = vector.load %arg3[%c0, %c0_0] : memref<16x27xbf16, #tpu.memory_space<vmem>>, vector<16x27xbf16>
    %c0_1 = arith.constant 0 : index
    %c0_2 = arith.constant 0 : index
    %c0_3 = arith.constant 0 : index
    %c0_4 = arith.constant 0 : index
    %1 = vector.load %arg2[%c0_1, %c0_2, %c0_3, %c0_4] : memref<1x4x27x512xbf16, #tpu.memory_space<vmem>>, vector<1x1x27x512xbf16>
    %2 = vector.shape_cast %1 : vector<1x1x27x512xbf16> to vector<27x512xbf16>
    %cst = arith.constant dense<0.000000e+00> : vector<16x512xf32>
    %3 = tpu.matmul %0, %2, %cst {dimension_numbers = #tpu.dot_dimension_numbers<[1], [0], [0], [1], [0, 0, 1, 1], [], []>} : vector<16x27xbf16>, vector<27x512xbf16>, vector<16x512xf32> -> vector<16x512xf32>
    %c0_5 = arith.constant 0 : index
    %c1 = arith.constant 1 : index
    %c0_6 = arith.constant 0 : index
    %c0_7 = arith.constant 0 : index
    %4 = vector.load %arg2[%c0_5, %c1, %c0_6, %c0_7] : memref<1x4x27x512xbf16, #tpu.memory_space<vmem>>, vector<1x1x27x512xbf16>
    %5 = vector.shape_cast %4 : vector<1x1x27x512xbf16> to vector<27x512xbf16>
    %cst_8 = arith.constant dense<0.000000e+00> : vector<16x512xf32>
    %6 = tpu.matmul %0, %5, %cst_8 {dimension_numbers = #tpu.dot_dimension_numbers<[1], [0], [0], [1], [0, 0, 1, 1], [], []>} : vector<16x27xbf16>, vector<27x512xbf16>, vector<16x512xf32> -> vector<16x512xf32>
    %7 = arith.maximumf %3, %6 : vector<16x512xf32>
    %c0_9 = arith.constant 0 : index
    %c2 = arith.constant 2 : index
    %c0_10 = arith.constant 0 : index
    %c0_11 = arith.constant 0 : index
    %8 = vector.load %arg2[%c0_9, %c2, %c0_10, %c0_11] : memref<1x4x27x512xbf16, #tpu.memory_space<vmem>>, vector<1x1x27x512xbf16>
    %9 = vector.shape_cast %8 : vector<1x1x27x512xbf16> to vector<27x512xbf16>
    %cst_12 = arith.constant dense<0.000000e+00> : vector<16x512xf32>
    %10 = tpu.matmul %0, %9, %cst_12 {dimension_numbers = #tpu.dot_dimension_numbers<[1], [0], [0], [1], [0, 0, 1, 1], [], []>} : vector<16x27xbf16>, vector<27x512xbf16>, vector<16x512xf32> -> vector<16x512xf32>
    %11 = arith.maximumf %7, %10 : vector<16x512xf32>
    %c0_13 = arith.constant 0 : index
    %c3 = arith.constant 3 : index
    %c0_14 = arith.constant 0 : index
    %c0_15 = arith.constant 0 : index
    %12 = vector.load %arg2[%c0_13, %c3, %c0_14, %c0_15] : memref<1x4x27x512xbf16, #tpu.memory_space<vmem>>, vector<1x1x27x512xbf16>
    %13 = vector.shape_cast %12 : vector<1x1x27x512xbf16> to vector<27x512xbf16>
    %cst_16 = arith.constant dense<0.000000e+00> : vector<16x512xf32>
    %14 = tpu.matmul %0, %13, %cst_16 {dimension_numbers = #tpu.dot_dimension_numbers<[1], [0], [0], [1], [0, 0, 1, 1], [], []>} : vector<16x27xbf16>, vector<27x512xbf16>, vector<16x512xf32> -> vector<16x512xf32>
    %15 = arith.maximumf %11, %14 : vector<16x512xf32>
    %c0_17 = arith.constant 0 : index
    %c0_18 = arith.constant 0 : index
    %16 = vector.load %arg4[%c0_17, %c0_18] : memref<16x1xf32, #tpu.memory_space<vmem>>, vector<16x1xf32>
    %17 = vector.broadcast %16 : vector<16x1xf32> to vector<16x512xf32>
    %18 = arith.addf %15, %17 : vector<16x512xf32>
    %cst_19 = arith.constant 0.000000e+00 : f32
    %19 = vector.broadcast %cst_19 : f32 to vector<16x512xf32>
    %20 = arith.maximumf %18, %19 : vector<16x512xf32>
    %21 = arith.truncf %20 : vector<16x512xf32> to vector<16x512xbf16>
    %c0_20 = arith.constant 0 : index
    %c0_21 = arith.constant 0 : index
    %c0_22 = arith.constant 0 : index
    %22 = vector.load %arg5[%c0_20, %c0_21, %c0_22] : memref<1x16x512xbf16, #tpu.memory_space<vmem>>, vector<1x16x512xbf16>
    %23 = vector.shape_cast %22 : vector<1x16x512xbf16> to vector<16x512xbf16>
    %24 = vector.shape_cast %21 : vector<16x512xbf16> to vector<1x16x512xbf16>
    tpu.vector_store %arg5[%c0_20, %c0_21, %c0_22], %24 {strides = array<i32>} : memref<1x16x512xbf16, #tpu.memory_space<vmem>>, vector<1x16x512xbf16>,
    return
  }
  func.func @transform_0(%arg0: i32, %arg1: i32) -> (i32, i32, i32, i32) {
    %c0_i32 = arith.constant 0 : i32
    %c0_i32_0 = arith.constant 0 : i32
    %c0_i32_1 = arith.constant 0 : i32
    return %arg0, %c0_i32, %c0_i32_0, %arg1 : i32, i32, i32, i32
  }
  func.func @transform_1(%arg0: i32, %arg1: i32) -> (i32, i32) {
    %c0_i32 = arith.constant 0 : i32
    %c0_i32_0 = arith.constant 0 : i32
    %c0_i32_1 = arith.constant 0 : i32
    return %c0_i32, %c0_i32_0 : i32, i32
  }
  func.func @transform_2(%arg0: i32, %arg1: i32) -> (i32, i32) {
    %c0_i32 = arith.constant 0 : i32
    %c0_i32_0 = arith.constant 0 : i32
    %c0_i32_1 = arith.constant 0 : i32
    return %c0_i32, %c0_i32_0 : i32, i32
  }
  func.func @transform_3(%arg0: i32, %arg1: i32) -> (i32, i32, i32) {
    %c0_i32 = arith.constant 0 : i32
    %c0_i32_0 = arith.constant 0 : i32
    return %arg0, %c0_i32, %arg1 : i32, i32, i32
  }
}

module attributes {stable_mosaic.version = 11 : i64} {
  func.func @_conv_relu_pool_kernel(%arg0: i32, %arg1: i32, %arg2: memref<1x4x144x512xbf16, #tpu.memory_space<vmem>>, %arg3: memref<32x144xbf16, #tpu.memory_space<vmem>>, %arg4: memref<32x1xf32, #tpu.memory_space<vmem>>, %arg5: memref<1x32x512xbf16, #tpu.memory_space<vmem>>) attributes {dimension_semantics = [#tpu.dimension_semantics<parallel>, #tpu.dimension_semantics<parallel>], iteration_bounds = array<i64: 2, 3>, scalar_prefetch = 0 : i64, scratch_operands = 0 : i64, tpu.core_type = #tpu.core_type<tc>, window_params = [{transform_indices = @transform_0, window_bounds = array<i64: 1, 4, 144, 512>}, {pipeline_mode = #tpu.pipeline_mode<synchronous>, transform_indices = @transform_1, window_bounds = array<i64: 32, 144>}, {pipeline_mode = #tpu.pipeline_mode<synchronous>, transform_indices = @transform_2, window_bounds = array<i64: 32, 1>}, {transform_indices = @transform_3, window_bounds = array<i64: 1, 32, 512>}]} {
    %c0 = arith.constant 0 : index
    %c0_0 = arith.constant 0 : index
    %0 = vector.load %arg3[%c0, %c0_0] : memref<32x144xbf16, #tpu.memory_space<vmem>>, vector<32x144xbf16>
    %c0_1 = arith.constant 0 : index
    %c0_2 = arith.constant 0 : index
    %c0_3 = arith.constant 0 : index
    %c0_4 = arith.constant 0 : index
    %1 = vector.load %arg2[%c0_1, %c0_2, %c0_3, %c0_4] : memref<1x4x144x512xbf16, #tpu.memory_space<vmem>>, vector<1x1x144x512xbf16>
    %2 = vector.shape_cast %1 : vector<1x1x144x512xbf16> to vector<144x512xbf16>
    %cst = arith.constant dense<0.000000e+00> : vector<32x512xf32>
    %3 = tpu.matmul %0, %2, %cst {dimension_numbers = #tpu.dot_dimension_numbers<[1], [0], [0], [1], [0, 0, 1, 1], [], []>} : vector<32x144xbf16>, vector<144x512xbf16>, vector<32x512xf32> -> vector<32x512xf32>
    %c0_5 = arith.constant 0 : index
    %c1 = arith.constant 1 : index
    %c0_6 = arith.constant 0 : index
    %c0_7 = arith.constant 0 : index
    %4 = vector.load %arg2[%c0_5, %c1, %c0_6, %c0_7] : memref<1x4x144x512xbf16, #tpu.memory_space<vmem>>, vector<1x1x144x512xbf16>
    %5 = vector.shape_cast %4 : vector<1x1x144x512xbf16> to vector<144x512xbf16>
    %cst_8 = arith.constant dense<0.000000e+00> : vector<32x512xf32>
    %6 = tpu.matmul %0, %5, %cst_8 {dimension_numbers = #tpu.dot_dimension_numbers<[1], [0], [0], [1], [0, 0, 1, 1], [], []>} : vector<32x144xbf16>, vector<144x512xbf16>, vector<32x512xf32> -> vector<32x512xf32>
    %7 = arith.maximumf %3, %6 : vector<32x512xf32>
    %c0_9 = arith.constant 0 : index
    %c2 = arith.constant 2 : index
    %c0_10 = arith.constant 0 : index
    %c0_11 = arith.constant 0 : index
    %8 = vector.load %arg2[%c0_9, %c2, %c0_10, %c0_11] : memref<1x4x144x512xbf16, #tpu.memory_space<vmem>>, vector<1x1x144x512xbf16>
    %9 = vector.shape_cast %8 : vector<1x1x144x512xbf16> to vector<144x512xbf16>
    %cst_12 = arith.constant dense<0.000000e+00> : vector<32x512xf32>
    %10 = tpu.matmul %0, %9, %cst_12 {dimension_numbers = #tpu.dot_dimension_numbers<[1], [0], [0], [1], [0, 0, 1, 1], [], []>} : vector<32x144xbf16>, vector<144x512xbf16>, vector<32x512xf32> -> vector<32x512xf32>
    %11 = arith.maximumf %7, %10 : vector<32x512xf32>
    %c0_13 = arith.constant 0 : index
    %c3 = arith.constant 3 : index
    %c0_14 = arith.constant 0 : index
    %c0_15 = arith.constant 0 : index
    %12 = vector.load %arg2[%c0_13, %c3, %c0_14, %c0_15] : memref<1x4x144x512xbf16, #tpu.memory_space<vmem>>, vector<1x1x144x512xbf16>
    %13 = vector.shape_cast %12 : vector<1x1x144x512xbf16> to vector<144x512xbf16>
    %cst_16 = arith.constant dense<0.000000e+00> : vector<32x512xf32>
    %14 = tpu.matmul %0, %13, %cst_16 {dimension_numbers = #tpu.dot_dimension_numbers<[1], [0], [0], [1], [0, 0, 1, 1], [], []>} : vector<32x144xbf16>, vector<144x512xbf16>, vector<32x512xf32> -> vector<32x512xf32>
    %15 = arith.maximumf %11, %14 : vector<32x512xf32>
    %c0_17 = arith.constant 0 : index
    %c0_18 = arith.constant 0 : index
    %16 = vector.load %arg4[%c0_17, %c0_18] : memref<32x1xf32, #tpu.memory_space<vmem>>, vector<32x1xf32>
    %17 = vector.broadcast %16 : vector<32x1xf32> to vector<32x512xf32>
    %18 = arith.addf %15, %17 : vector<32x512xf32>
    %cst_19 = arith.constant 0.000000e+00 : f32
    %19 = vector.broadcast %cst_19 : f32 to vector<32x512xf32>
    %20 = arith.maximumf %18, %19 : vector<32x512xf32>
    %21 = arith.truncf %20 : vector<32x512xf32> to vector<32x512xbf16>
    %c0_20 = arith.constant 0 : index
    %c0_21 = arith.constant 0 : index
    %c0_22 = arith.constant 0 : index
    %22 = vector.load %arg5[%c0_20, %c0_21, %c0_22] : memref<1x32x512xbf16, #tpu.memory_space<vmem>>, vector<1x32x512xbf16>
    %23 = vector.shape_cast %22 : vector<1x32x512xbf16> to vector<32x512xbf16>
    %24 = vector.shape_cast %21 : vector<32x512xbf16> to vector<1x32x512xbf16>
    tpu.vector_store %arg5[%c0_20, %c0_21, %c0_22], %24 {strides = array<i32>} : memref<1x32x512xbf16, #tpu.memory_space<vmem>>, vector<1x32x512xbf16>,
    return
  }
  func.func @transform_0(%arg0: i32, %arg1: i32) -> (i32, i32, i32, i32) {
    %c0_i32 = arith.constant 0 : i32
    %c0_i32_0 = arith.constant 0 : i32
    %c0_i32_1 = arith.constant 0 : i32
    return %arg0, %c0_i32, %c0_i32_0, %arg1 : i32, i32, i32, i32
  }
  func.func @transform_1(%arg0: i32, %arg1: i32) -> (i32, i32) {
    %c0_i32 = arith.constant 0 : i32
    %c0_i32_0 = arith.constant 0 : i32
    %c0_i32_1 = arith.constant 0 : i32
    return %c0_i32, %c0_i32_0 : i32, i32
  }
  func.func @transform_2(%arg0: i32, %arg1: i32) -> (i32, i32) {
    %c0_i32 = arith.constant 0 : i32
    %c0_i32_0 = arith.constant 0 : i32
    %c0_i32_1 = arith.constant 0 : i32
    return %c0_i32, %c0_i32_0 : i32, i32
  }
  func.func @transform_3(%arg0: i32, %arg1: i32) -> (i32, i32, i32) {
    %c0_i32 = arith.constant 0 : i32
    %c0_i32_0 = arith.constant 0 : i32
    return %arg0, %c0_i32, %arg1 : i32, i32, i32
  }
}

module attributes {stable_mosaic.version = 11 : i64} {
  func.func @_fc_head_kernel(%arg0: i32, %arg1: memref<2x5504xbf16, #tpu.memory_space<vmem>>, %arg2: memref<5504x64xbf16, #tpu.memory_space<vmem>>, %arg3: memref<1x64xf32, #tpu.memory_space<vmem>>, %arg4: memref<64x7xf32, #tpu.memory_space<vmem>>, %arg5: memref<1x7xf32, #tpu.memory_space<vmem>>, %arg6: memref<2x7xf32, #tpu.memory_space<vmem>>, %arg7: memref<2x64xf32, #tpu.memory_space<vmem>>) attributes {dimension_semantics = [#tpu.dimension_semantics<arbitrary>], iteration_bounds = array<i64: 8>, scalar_prefetch = 0 : i64, scratch_operands = 1 : i64, tpu.core_type = #tpu.core_type<tc>, window_params = [{transform_indices = @transform_0, window_bounds = array<i64: 2, 5504>}, {transform_indices = @transform_1, window_bounds = array<i64: 5504, 64>}, {pipeline_mode = #tpu.pipeline_mode<synchronous>, transform_indices = @transform_2, window_bounds = array<i64: 1, 64>}, {pipeline_mode = #tpu.pipeline_mode<synchronous>, transform_indices = @transform_3, window_bounds = array<i64: 64, 7>}, {pipeline_mode = #tpu.pipeline_mode<synchronous>, transform_indices = @transform_4, window_bounds = array<i64: 1, 7>}, {pipeline_mode = #tpu.pipeline_mode<synchronous>, transform_indices = @transform_5, window_bounds = array<i64: 2, 7>}]} {
    %c0_i32 = arith.constant 0 : i32
    %0 = arith.cmpi eq, %arg0, %c0_i32 : i32
    %1 = arith.extui %0 : i1 to i32
    %c0_i32_0 = arith.constant 0 : i32
    %2 = arith.cmpi ne, %1, %c0_i32_0 : i32
    scf.if %2 {
      %cst_9 = arith.constant 0.000000e+00 : f32
      %12 = vector.broadcast %cst_9 : f32 to vector<2x64xf32>
      %c0_10 = arith.constant 0 : index
      %c0_11 = arith.constant 0 : index
      %13 = vector.load %arg7[%c0_10, %c0_11] : memref<2x64xf32, #tpu.memory_space<vmem>>, vector<2x64xf32>
      tpu.vector_store %arg7[%c0_10, %c0_11], %12 {strides = array<i32>} : memref<2x64xf32, #tpu.memory_space<vmem>>, vector<2x64xf32>,
    } else {
    }
    %c0 = arith.constant 0 : index
    %c0_1 = arith.constant 0 : index
    %3 = vector.load %arg7[%c0, %c0_1] : memref<2x64xf32, #tpu.memory_space<vmem>>, vector<2x64xf32>
    %c0_2 = arith.constant 0 : index
    %c0_3 = arith.constant 0 : index
    %4 = vector.load %arg1[%c0_2, %c0_3] : memref<2x5504xbf16, #tpu.memory_space<vmem>>, vector<2x5504xbf16>
    %c0_4 = arith.constant 0 : index
    %c0_5 = arith.constant 0 : index
    %5 = vector.load %arg2[%c0_4, %c0_5] : memref<5504x64xbf16, #tpu.memory_space<vmem>>, vector<5504x64xbf16>
    %cst = arith.constant dense<0.000000e+00> : vector<2x64xf32>
    %6 = tpu.matmul %4, %5, %cst {dimension_numbers = #tpu.dot_dimension_numbers<[1], [0], [0], [1], [0, 0, 1, 1], [], []>} : vector<2x5504xbf16>, vector<5504x64xbf16>, vector<2x64xf32> -> vector<2x64xf32>
    %7 = arith.addf %3, %6 : vector<2x64xf32>
    %c0_6 = arith.constant 0 : index
    %c0_7 = arith.constant 0 : index
    %8 = vector.load %arg7[%c0_6, %c0_7] : memref<2x64xf32, #tpu.memory_space<vmem>>, vector<2x64xf32>
    tpu.vector_store %arg7[%c0_6, %c0_7], %7 {strides = array<i32>} : memref<2x64xf32, #tpu.memory_space<vmem>>, vector<2x64xf32>,
    %c7_i32 = arith.constant 7 : i32
    %9 = arith.cmpi eq, %arg0, %c7_i32 : i32
    %10 = arith.extui %9 : i1 to i32
    %c0_i32_8 = arith.constant 0 : i32
    %11 = arith.cmpi ne, %10, %c0_i32_8 : i32
    scf.if %11 {
      %c0_9 = arith.constant 0 : index
      %c0_10 = arith.constant 0 : index
      %12 = vector.load %arg7[%c0_9, %c0_10] : memref<2x64xf32, #tpu.memory_space<vmem>>, vector<2x64xf32>
      %c0_11 = arith.constant 0 : index
      %c0_12 = arith.constant 0 : index
      %13 = vector.load %arg3[%c0_11, %c0_12] : memref<1x64xf32, #tpu.memory_space<vmem>>, vector<1x64xf32>
      %14 = vector.broadcast %13 : vector<1x64xf32> to vector<2x64xf32>
      %15 = arith.addf %12, %14 : vector<2x64xf32>
      %cst_13 = arith.constant 0.000000e+00 : f32
      %16 = vector.broadcast %cst_13 : f32 to vector<2x64xf32>
      %17 = arith.maximumf %15, %16 : vector<2x64xf32>
      %c0_14 = arith.constant 0 : index
      %c0_15 = arith.constant 0 : index
      %18 = vector.load %arg4[%c0_14, %c0_15] : memref<64x7xf32, #tpu.memory_space<vmem>>, vector<64x7xf32>
      %cst_16 = arith.constant dense<0.000000e+00> : vector<2x7xf32>
      %19 = tpu.matmul %17, %18, %cst_16 {dimension_numbers = #tpu.dot_dimension_numbers<[1], [0], [0], [1], [0, 0, 1, 1], [], []>} : vector<2x64xf32>, vector<64x7xf32>, vector<2x7xf32> -> vector<2x7xf32>
      %c0_17 = arith.constant 0 : index
      %c0_18 = arith.constant 0 : index
      %20 = vector.load %arg5[%c0_17, %c0_18] : memref<1x7xf32, #tpu.memory_space<vmem>>, vector<1x7xf32>
      %21 = vector.broadcast %20 : vector<1x7xf32> to vector<2x7xf32>
      %22 = arith.addf %19, %21 : vector<2x7xf32>
      %cst_19 = arith.constant dense<0xFF800000> : vector<2xf32>
      %23 = vector.multi_reduction <maximumf>, %22, %cst_19 [1] : vector<2x7xf32> to vector<2xf32>
      %24 = vector.shape_cast %23 : vector<2xf32> to vector<2x1xf32>
      %25 = vector.broadcast %24 : vector<2x1xf32> to vector<2x7xf32>
      %26 = arith.subf %22, %25 : vector<2x7xf32>
      %27 = math.exp %26 : vector<2x7xf32>
      %cst_20 = arith.constant dense<0.000000e+00> : vector<2xf32>
      %28 = vector.multi_reduction <add>, %27, %cst_20 [1] : vector<2x7xf32> to vector<2xf32>
      %29 = vector.shape_cast %28 : vector<2xf32> to vector<2x1xf32>
      %30 = vector.broadcast %29 : vector<2x1xf32> to vector<2x7xf32>
      %31 = arith.divf %27, %30 : vector<2x7xf32>
      %c0_21 = arith.constant 0 : index
      %c0_22 = arith.constant 0 : index
      %32 = vector.load %arg6[%c0_21, %c0_22] : memref<2x7xf32, #tpu.memory_space<vmem>>, vector<2x7xf32>
      tpu.vector_store %arg6[%c0_21, %c0_22], %31 {strides = array<i32>} : memref<2x7xf32, #tpu.memory_space<vmem>>, vector<2x7xf32>,
    } else {
    }
    return
  }
  func.func @transform_0(%arg0: i32) -> (i32, i32) {
    %c0_i32 = arith.constant 0 : i32
    %c0_i32_0 = arith.constant 0 : i32
    return %c0_i32, %arg0 : i32, i32
  }
  func.func @transform_1(%arg0: i32) -> (i32, i32) {
    %c0_i32 = arith.constant 0 : i32
    %c0_i32_0 = arith.constant 0 : i32
    return %arg0, %c0_i32 : i32, i32
  }
  func.func @transform_2(%arg0: i32) -> (i32, i32) {
    %c0_i32 = arith.constant 0 : i32
    %c0_i32_0 = arith.constant 0 : i32
    %c0_i32_1 = arith.constant 0 : i32
    return %c0_i32, %c0_i32_0 : i32, i32
  }
  func.func @transform_3(%arg0: i32) -> (i32, i32) {
    %c0_i32 = arith.constant 0 : i32
    %c0_i32_0 = arith.constant 0 : i32
    %c0_i32_1 = arith.constant 0 : i32
    return %c0_i32, %c0_i32_0 : i32, i32
  }
  func.func @transform_4(%arg0: i32) -> (i32, i32) {
    %c0_i32 = arith.constant 0 : i32
    %c0_i32_0 = arith.constant 0 : i32
    %c0_i32_1 = arith.constant 0 : i32
    return %c0_i32, %c0_i32_0 : i32, i32
  }
  func.func @transform_5(%arg0: i32) -> (i32, i32) {
    %c0_i32 = arith.constant 0 : i32
    %c0_i32_0 = arith.constant 0 : i32
    %c0_i32_1 = arith.constant 0 : i32
    return %c0_i32, %c0_i32_0 : i32, i32
  }
}

</mosaic_0001>

<bundles_post_ra>
// kernel: somi_cnn_forward.3
= control target key start
LH: loop header
LB: loop body
LE: loop exit
PB: predicated region body
PF: predicated region fallthrough
CT: control target
= control target key end

     0   :  { %s1319_s12 = smov 0   ;;  %s1321_s13 = smov 0   ;;  %s1575_s0 = inlined_call_operand.vmem [shape: bf16[2,4,27,5632], index: 0, kind: input, shape index: {}]   ;;  %s1576_s1 = inlined_call_operand.vmem [shape: bf16[16,27], index: 1, kind: input, shape index: {}]   ;;  %s1577_s2 = inlined_call_operand.vmem [shape: f32[16,1], index: 2, kind: input, shape index: {}]   ;;  %s1578_s3 = inlined_call_operand.vmem [shape: bf16[2,16,5632], index: 3, kind: output, shape index: {}]  }
   0x1   :  { %s1323_s14 = smov 0   ;;  %s1325_s15 = smov 0  }
   0x2   :  { %s1327_s16 = smov 0   ;;  %s1329_s17 = smov 0  }
   0x3   :  { %s1331_s18 = smov 0  }
   0x4 LB: > { %s22_s19 = sadd.s32 1, %s1287_s16  ;;  %s25_s20 = sadd.s32 1, %s1291_s17  ;;  %s1295_s18 = sphi %s1331_s18, %s13_s18   ;;  %s1291_s17 = sphi %s1329_s17, %s1585_s17   ;;  %s1287_s16 = sphi %s1327_s16, %s1584_s16   ;;  %s1283_s15 = sphi %s1325_s15, %s1583_s15   ;;  %s1279_s14 = sphi %s1323_s14, %s1582_s14   ;;  %s1275_s13 = sphi %s1321_s13, %s1581_s13   ;;  %s1271_s12 = sphi %s1319_s12, %s1580_s12  }
   0x5   : > { %p23_p0 = scmp.ge.s32.totalorder %s22_s19, 11  ;;  %s1043_s21 = sadd.s32 4294967295, %s1295_s18  }
   0x6   : > { %p41_p1 = scmp.ne.s32.totalorder %s1275_s13, %s1271_s12  ;;  %p42_p2 = scmp.eq.s32.totalorder %s1295_s18, 0 }
   0x7   : > { %s1587_s19 = smov (%p23_p0, %s22_s19), 0  ;;  %s1589_s20 = smov (!%p23_p0, %s25_s20), %s1291_s17 }
   0x8   : > { %p27_p3 = scmp.ge.s32.totalorder %s1589_s20, 2  ;;  %p115_p4 = scmp.eq.s32.totalorder %s1043_s21, 21 }
   0x9   : > { %s30_s22 = ssub.s32 %s1287_s16, %s1587_s19  ;;  %p43_p5 = por %p42_p2, %p41_p1 }
   0xa   : > { %s1591_s20 = smov (%p27_p3, %s1589_s20), 0  ;;  %p1367_p6 = por %p115_p4, %p41_p1 }
   0xb   : > { %s29_s24 = ssub.s32 %s1291_s17, %s1591_s20  ;;  %s34_s26 = sadd.s32 1, %s1275_s13 }
   0xc   : > { %s31_s25 = sor.u32 %s30_s22, %s29_s24  ;;  %p1046_p8 = scmp.ge.s32.totalorder %s1295_s18, 22 }
   0xd   : > { %p32_p7 = scmp.eq.s32.totalorder %s31_s25, 0 }
   0xe   : > { %143 = sbr.rel (%p1046_p8) target bundleno = 45 (0x2d), region = 24 }
   0xf   : > { %s1375_s27 = scalar_select %p32_p7, %s1275_s13, %s34_s26  }
  0x15   : > { %146 = sbr.rel (!%p43_p5) target bundleno = 45 (0x2d), region = 28  ;;  %s148_s28 = sand.u32 (%p43_p5), 1, %s1275_s13  }
  0x16   : > { %s1048_s29 = sshll.u32 (%p43_p5), %s1287_s16, 2  ;;  %s1047_s30 = sshll.u32 (%p43_p5), %s148_s28, 8 }
  0x17   : > { %s1131_s4 = smul.u32 (%p43_p5), 704, %s1291_s17  ;;  %s1389_s10 = scalar_lea.vmem (%p43_p5), [#allocation2], %s1047_s30 }
  0x19   : > { %s153_s5 = sadd.s32 (%p43_p5), %s1131_s4, %s1048_s29 }
  0x1a   : > { %s1049_s6 = sshll.u32 (%p43_p5), %s153_s5, 2 }
  0x1b   : > { %s1384_s9 = scalar_lea.vmem (%p43_p5), %s1575_s0, %s1049_s6 }
  0x1c   : > { %v168_v0 = vld [vmem:[%s1384_s9] sm:$0xff]  ;;  %v170_v1 = vld [vmem:[%s1384_s9 + $0x8] sm:$0xff]  ;;  %v172_v2 = vld [vmem:[%s1384_s9 + $0xb0] sm:$0xff] }
  0x1d   : > { %169 = vst [vmem:[%s1389_s10] sm:$0xff] %v168_v0  ;;  %171 = vst [vmem:[%s1389_s10 + $0x8] sm:$0xff] %v170_v1  ;;  %v174_v3 = vld [vmem:[%s1384_s9 + $0xb8] sm:$0xff]  ;;  %v176_v4 = vld [vmem:[%s1384_s9 + $0x160] sm:$0xff] }
  0x1e   : > { %173 = vst [vmem:[%s1389_s10 + $0x10] sm:$0xff] %v172_v2  ;;  %v178_v5 = vld [vmem:[%s1384_s9 + $0x168] sm:$0xff]  ;;  %175 = vst [vmem:[%s1389_s10 + $0x18] sm:$0xff] %v174_v3  ;;  %v180_v6 = vld [vmem:[%s1384_s9 + $0x210] sm:$0xff] }
  0x1f   : > { %177 = vst [vmem:[%s1389_s10 + $0x20] sm:$0xff] %v176_v4  ;;  %179 = vst [vmem:[%s1389_s10 + $0x28] sm:$0xff] %v178_v5  ;;  %v182_v7 = vld [vmem:[%s1384_s9 + $0x218] sm:$0xff]  ;;  %v184_v8 = vld [vmem:[%s1384_s9 + $0x2c0] sm:$0xff] }
  0x20   : > { %181 = vst [vmem:[%s1389_s10 + $0x30] sm:$0xff] %v180_v6  ;;  %183 = vst [vmem:[%s1389_s10 + $0x38] sm:$0xff] %v182_v7  ;;  %v186_v9 = vld [vmem:[%s1384_s9 + $0x2c8] sm:$0xff]  ;;  %v188_v10 = vld [vmem:[%s1384_s9 + $0x370] sm:$0xff] }
  0x21   : > { %185 = vst [vmem:[%s1389_s10 + $0x40] sm:$0xff] %v184_v8  ;;  %v190_v11 = vld [vmem:[%s1384_s9 + $0x378] sm:$0xff]  ;;  %187 = vst [vmem:[%s1389_s10 + $0x48] sm:$0xff] %v186_v9  ;;  %v192_v12 = vld [vmem:[%s1384_s9 + $0x420] sm:$0xff] }
  0x22   : > { %189 = vst [vmem:[%s1389_s10 + $0x50] sm:$0xff] %v188_v10  ;;  %191 = vst [vmem:[%s1389_s10 + $0x58] sm:$0xff] %v190_v11  ;;  %v194_v13 = vld [vmem:[%s1384_s9 + $0x428] sm:$0xff]  ;;  %v196_v14 = vld [vmem:[%s1384_s9 + $0x4d0] sm:$0xff] }
  0x23   : > { %193 = vst [vmem:[%s1389_s10 + $0x60] sm:$0xff] %v192_v12  ;;  %195 = vst [vmem:[%s1389_s10 + $0x68] sm:$0xff] %v194_v13  ;;  %v198_v15 = vld [vmem:[%s1384_s9 + $0x4d8] sm:$0xff]  ;;  %v200_v16 = vld [vmem:[%s1384_s9 + $0x580] sm:$0xff] }
  0x24   : > { %197 = vst [vmem:[%s1389_s10 + $0x70] sm:$0xff] %v196_v14  ;;  %v202_v17 = vld [vmem:[%s1384_s9 + $0x588] sm:$0xff]  ;;  %199 = vst [vmem:[%s1389_s10 + $0x78] sm:$0xff] %v198_v15  ;;  %v204_v18 = vld [vmem:[%s1384_s9 + $0x630] sm:$0xff] }
  0x25   : > { %201 = vst [vmem:[%s1389_s10 + $0x80] sm:$0xff] %v200_v16  ;;  %203 = vst [vmem:[%s1389_s10 + $0x88] sm:$0xff] %v202_v17  ;;  %v206_v19 = vld [vmem:[%s1384_s9 + $0x638] sm:$0xff]  ;;  %v208_v20 = vld [vmem:[%s1384_s9 + $0x6e0] sm:$0xff] }
  0x26   : > { %205 = vst [vmem:[%s1389_s10 + $0x90] sm:$0xff] %v204_v18  ;;  %207 = vst [vmem:[%s1389_s10 + $0x98] sm:$0xff] %v206_v19  ;;  %v210_v21 = vld [vmem:[%s1384_s9 + $0x6e8] sm:$0xff]  ;;  %v212_v22 = vld [vmem:[%s1384_s9 + $0x790] sm:$0xff] }
  0x27   : > { %209 = vst [vmem:[%s1389_s10 + $0xa0] sm:$0xff] %v208_v20  ;;  %v214_v23 = vld [vmem:[%s1384_s9 + $0x798] sm:$0xff]  ;;  %211 = vst [vmem:[%s1389_s10 + $0xa8] sm:$0xff] %v210_v21  ;;  %v216_v24 = vld [vmem:[%s1384_s9 + $0x840] sm:$0xff] }
  0x28   : > { %213 = vst [vmem:[%s1389_s10 + $0xb0] sm:$0xff] %v212_v22  ;;  %215 = vst [vmem:[%s1389_s10 + $0xb8] sm:$0xff] %v214_v23  ;;  %v218_v25 = vld [vmem:[%s1384_s9 + $0x848] sm:$0xff]  ;;  %v220_v26 = vld [vmem:[%s1384_s9 + $0x8f0] sm:$0xff] }
  0x29   : > { %217 = vst [vmem:[%s1389_s10 + $0xc0] sm:$0xff] %v216_v24  ;;  %219 = vst [vmem:[%s1389_s10 + $0xc8] sm:$0xff] %v218_v25  ;;  %v222_v27 = vld [vmem:[%s1384_s9 + $0x8f8] sm:$0xff]  ;;  %v224_v28 = vld [vmem:[%s1384_s9 + $0x9a0] sm:$0xff] }
  0x2a   : > { %221 = vst [vmem:[%s1389_s10 + $0xd0] sm:$0xff] %v220_v26  ;;  %v226_v29 = vld [vmem:[%s1384_s9 + $0x9a8] sm:$0xff]  ;;  %223 = vst [vmem:[%s1389_s10 + $0xd8] sm:$0xff] %v222_v27  ;;  %v228_v30 = vld [vmem:[%s1384_s9 + $0xa50] sm:$0xff] }
  0x2b   : > { %225 = vst [vmem:[%s1389_s10 + $0xe0] sm:$0xff] %v224_v28  ;;  %227 = vst [vmem:[%s1389_s10 + $0xe8] sm:$0xff] %v226_v29  ;;  %v230_v31 = vld [vmem:[%s1384_s9 + $0xa58] sm:$0xff] }
  0x2c   : > { %229 = vst [vmem:[%s1389_s10 + $0xf0] sm:$0xff] %v228_v30  ;;  %231 = vst [vmem:[%s1389_s10 + $0xf8] sm:$0xff] %v230_v31 }
  0x2d PF: > { %p1050_p9 = scmp.ge.s32.totalorder %s1295_s18, 1  ;;  %p236_p10 = scmp.lt.s32.totalorder %s1295_s18, 23 }
  0x2f   : > { %p237_p11 = pnand %p1050_p9, %p236_p10 }
  0x30   : > { %s243_s11 = sand.u32 (!%p237_p11), 1, %s1271_s12   ;;  %vm323_vm0 = vcmask (!%p237_p11), 1044480   ;;  %v1297_v32 = vmov (!%p237_p11), 0   ;;  %vm324_vm1 = vcmask (!%p237_p11), 1045504   ;;  %v1298_v33 = vmov (!%p237_p11), 65535   ;;  %v878_v35 = vld [vmem:[%s1577_s2] sm:$0xff] (!%p237_p11) }
  0x31   : > { %240 = sbr.rel (%p237_p11) target bundleno = 316 (0x13c), region = 51  ;;  %s1051_s21 = sshll.u32 (!%p237_p11), %s243_s11, 8  ;;  %371 = vmatprep.mubr.bf16.mxu0 (!%p237_p11), %v1297_v32  ;;  %414 = vmatprep.mubr.bf16.mxu1 (!%p237_p11), %v1297_v32  ;;  %v325_v34 = vsel (!%p237_p11), %vm323_vm0, 4294967295, %v1298_v33  ;;  %v879_v37 = vld [vmem:[%s1577_s2 + $0x8] sm:$0xff] (!%p237_p11)  ;;  %v1483_v48 = vld [vmem:[%s1576_s1] sm:$0xff] (!%p237_p11)   ;;  %vm319_vm2 = vcmask (!%p237_p11), 220160  }
  0x32   : > { %1191 = vset.pattern.permute.xlu0 (!%p237_p11), %v1297_v32  ;;  %s1463_s25 = scalar_lea.vmem (!%p237_p11), [#allocation2], %s1051_s21  ;;  %v1472_v41 = vsel (!%p237_p11), %vm324_vm1, %v325_v34, 0  ;;  %s1052_s4 = sshll.u32 (!%p237_p11), %s243_s11, 5 }
  0x33   : > { %v1192_v36 = vld [vmem:[%s1463_s25 + $0x4] ss:$16 sps:$4 sm:$0xff] (!%p237_p11)   ;;  %882 = vperm.xlu0 (!%p237_p11), %1191, %v878_v35   ;;  %v1194_v38 = vld [vmem:[%s1463_s25 + $0xc] ss:$16 sps:$4 sm:$0xff] (!%p237_p11)   ;;  %v1196_v39 = vld [vmem:[%s1463_s25] ss:$16 sps:$4 sm:$0xff] (!%p237_p11)  }
  0x34   : > { %339 = vmatprep.subr.bf16.mxu0 (!%p237_p11), %v1192_v36  ;;  %v1197_v40 = vld [vmem:[%s1463_s25 + $0x8] ss:$16 sps:$4 sm:$0xff] (!%p237_p11)   ;;  %382 = vmatprep.subr.bf16.mxu1 (!%p237_p11), %v1194_v38  ;;  %v1198_v42 = vld [vmem:[%s1463_s25 + $0x24] ss:$16 sps:$4 sm:$0x3f] (!%p237_p11)   ;;  %s264_s12 = scalar_lea.vmem (!%p237_p11), [#allocation3], %s1052_s4 }
  0x35   : > { %340 = vmatpush1.bf16.msra.mxu0 (!%p237_p11), %v1196_v39  ;;  %383 = vmatpush1.bf16.msra.mxu1 (!%p237_p11), %v1197_v40  ;;  %v1200_v43 = vld [vmem:[%s1463_s25 + $0x2c] ss:$16 sps:$4 sm:$0x3f] (!%p237_p11)   ;;  %v331_v44 = vand.u32 (!%p237_p11), %v1198_v42, %v1472_v41  ;;  %v1202_v45 = vld [vmem:[%s1463_s25 + $0x20] ss:$16 sps:$4 sm:$0x3f] (!%p237_p11)  }
  0x36   : > { %v1203_v46 = vld [vmem:[%s1463_s25 + $0x28] ss:$16 sps:$4 sm:$0x3f] (!%p237_p11)   ;;  %v337_v47 = vand.u32 (!%p237_p11), %v1200_v43, %v1472_v41  ;;  %v1207_v49 = vld [vmem:[%s1463_s25 + $0x44] ss:$16 sps:$4 sm:$0xff] (!%p237_p11)   ;;  %v328_v50 = vand.u32 (!%p237_p11), %v1202_v45, %v1472_v41 }
  0x37   : > { %887 = vperm.xlu0 (!%p237_p11), %1191, %v879_v37   ;;  %341 = vmatprep.subr.bf16.mxu0 (!%p237_p11), %v331_v44  ;;  %v334_v51 = vand.u32 (!%p237_p11), %v1203_v46, %v1472_v41  ;;  %v1205_v52 = vld [vmem:[%s1463_s25 + $0x40] ss:$16 sps:$4 sm:$0xff] (!%p237_p11)   ;;  %v1208_v53 = vld [vmem:[%s1463_s25 + $0x48] ss:$16 sps:$4 sm:$0xff] (!%p237_p11)   ;;  %v1210_v54 = vld [vmem:[%s1463_s25 + $0x4c] ss:$16 sps:$4 sm:$0xff] (!%p237_p11)  }
  0x38   : > { %384 = vmatprep.subr.bf16.mxu1 %v337_v47  ;;  %v1211_v55 = vld [vmem:[%s1463_s25 + $0x60] ss:$16 sps:$4 sm:$0x3f]   ;;  %v1213_v56 = vld [vmem:[%s1463_s25 + $0x64] ss:$16 sps:$4 sm:$0x3f]  }
  0x39   : > { %342 = vmatpush1.bf16.msra.mxu0 %v328_v50  ;;  %385 = vmatpush1.bf16.msra.mxu1 %v334_v51  ;;  %v1214_v57 = vld [vmem:[%s1463_s25 + $0x68] ss:$16 sps:$4 sm:$0x3f]   ;;  %v474_v58 = vand.u32 %v1213_v56, %v1472_v41  ;;  %v1216_v59 = vld [vmem:[%s1463_s25 + $0x6c] ss:$16 sps:$4 sm:$0x3f]   ;;  %v471_v61 = vand.u32 %v1211_v55, %v1472_v41 }
  0x3a   : > { %482 = vmatprep.subr.bf16.mxu0 %v1207_v49  ;;  %525 = vmatprep.subr.bf16.mxu1 %v1210_v54  ;;  %v480_v60 = vand.u32 %v1216_v59, %v1472_v41  ;;  %v477_v62 = vand.u32 %v1214_v57, %v1472_v41  ;;  %v1219_v63 = vld [vmem:[%s1463_s25 + $0x84] ss:$16 sps:$4 sm:$0xff]   ;;  %v1222_v0 = vld [vmem:[%s1463_s25 + $0x8c] ss:$16 sps:$4 sm:$0xff]   ;;  %v1217_v1 = vld [vmem:[%s1463_s25 + $0x80] ss:$16 sps:$4 sm:$0xff]  }
  0x3b   : > { %v1220_v2 = vld [vmem:[%s1463_s25 + $0x88] ss:$16 sps:$4 sm:$0xff]   ;;  %v1225_v3 = vld [vmem:[%s1463_s25 + $0xa4] ss:$16 sps:$4 sm:$0x3f]   ;;  %s1123_s5 = sshll.u32 (%p1367_p6), %s1279_s14, 2 }
  0x3c   : > { %1062 = vmatmul.mubr.msk.bf16.vlgmr.msra.gmra.mrb[0].mxu0 %vm319_vm2, %v1483_v48  ;;  %1063 = vmatmul.mubr.msk.bf16.vlgmr.msra.gmra.mrb[0].mxu1 %vm319_vm2, %v1483_v48  ;;  %v1223_v4 = vld [vmem:[%s1463_s25 + $0xa0] ss:$16 sps:$4 sm:$0x3f]   ;;  %v1228_v5 = vld [vmem:[%s1463_s25 + $0xac] ss:$16 sps:$4 sm:$0x3f]   ;;  %v625_v7 = vand.u32 %v1225_v3, %v1472_v41 }
  0x3d   : > { %483 = vmatpush1.bf16.msra.mxu0 %v1205_v52  ;;  %526 = vmatpush1.bf16.msra.mxu1 %v1208_v53  ;;  %v1226_v6 = vld [vmem:[%s1463_s25 + $0xa8] ss:$16 sps:$4 sm:$0x3f]   ;;  %v631_v8 = vand.u32 %v1228_v5, %v1472_v41  ;;  %v622_v9 = vand.u32 %v1223_v4, %v1472_v41  ;;  %v1231_v11 = vld [vmem:[%s1463_s25 + $0xc4] ss:$16 sps:$4 sm:$0xff]   ;;  %s1132_s6 = smul.u32 (%p1367_p6), 88, %s1283_s15 }
  0x3e   : > { %484 = vmatprep.subr.bf16.mxu0 %v474_v58  ;;  %514 = vmatprep.mubr.bf16.mxu0 %v1297_v32  ;;  %v628_v10 = vand.u32 %v1226_v6, %v1472_v41  ;;  %v1234_v12 = vld [vmem:[%s1463_s25 + $0xcc] ss:$16 sps:$4 sm:$0xff]   ;;  %v1237_v13 = vld [vmem:[%s1463_s25 + $0xe4] ss:$16 sps:$4 sm:$0x3f]  }
  0x3f   : > { %527 = vmatprep.subr.bf16.mxu1 %v480_v60  ;;  %557 = vmatprep.mubr.bf16.mxu1 %v1297_v32  ;;  %v1240_v14 = vld [vmem:[%s1463_s25 + $0xec] ss:$16 sps:$4 sm:$0x3f]   ;;  %v1229_v15 = vld [vmem:[%s1463_s25 + $0xc0] ss:$16 sps:$4 sm:$0xff]   ;;  %v776_v19 = vand.u32 %v1237_v13, %v1472_v41  ;;  %s943_s7 = sadd.s32 (%p1367_p6), %s1132_s6, %s1123_s5 }
  0x40   : > { %v1232_v16 = vld [vmem:[%s1463_s25 + $0xc8] ss:$16 sps:$4 sm:$0xff]   ;;  %v1235_v17 = vld [vmem:[%s1463_s25 + $0xe0] ss:$16 sps:$4 sm:$0x3f]   ;;  %v782_v20 = vand.u32 %v1240_v14, %v1472_v41  ;;  %s1124_s8 = sshll.u32 (%p1367_p6), %s943_s7, 2 }
  0x41   : > { %485 = vmatpush1.bf16.msra.mxu0 %v471_v61  ;;  %528 = vmatpush1.bf16.msra.mxu1 %v477_v62  ;;  %v1238_v18 = vld [vmem:[%s1463_s25 + $0xe8] ss:$16 sps:$4 sm:$0x3f]   ;;  %v773_v21 = vand.u32 %v1235_v17, %v1472_v41  ;;  %s945_s11 = scalar_lea.vmem (%p1367_p6), %s1578_s3, %s1124_s8 }
  0x42   : > { %633 = vmatprep.subr.bf16.mxu0 %v1219_v63  ;;  %676 = vmatprep.subr.bf16.mxu1 %v1222_v0  ;;  %v779_v22 = vand.u32 %v1238_v18, %v1472_v41 }
  0x44   : > { %1080 = vmatmul.mubr.msk.bf16.vlgmr.msra.gmra.mrb[4].mxu0 %vm319_vm2, %v1483_v48  ;;  %1081 = vmatmul.mubr.msk.bf16.vlgmr.msra.gmra.mrb[4].mxu1 %vm319_vm2, %v1483_v48 }
  0x45   : > { %634 = vmatpush1.bf16.msra.mxu0 %v1217_v1  ;;  %677 = vmatpush1.bf16.msra.mxu1 %v1220_v2 }
  0x46   : > { %635 = vmatprep.subr.bf16.mxu0 %v625_v7  ;;  %678 = vmatprep.subr.bf16.mxu1 %v631_v8 }
  0x47   : > { %665 = vmatprep.mubr.bf16.mxu0 %v1297_v32  ;;  %708 = vmatprep.mubr.bf16.mxu1 %v1297_v32 }
  0x49   : > { %636 = vmatpush1.bf16.msra.mxu0 %v622_v9  ;;  %679 = vmatpush1.bf16.msra.mxu1 %v628_v10 }
  0x4a   : > { %784 = vmatprep.subr.bf16.mxu0 %v1231_v11  ;;  %827 = vmatprep.subr.bf16.mxu1 %v1234_v12 }
  0x4c   : > { %1098 = vmatmul.mubr.msk.bf16.vlgmr.msra.gmra.mrb[8].mxu0 %vm319_vm2, %v1483_v48  ;;  %1099 = vmatmul.mubr.msk.bf16.vlgmr.msra.gmra.mrb[8].mxu1 %vm319_vm2, %v1483_v48 }
  0x4d   : > { %785 = vmatpush1.bf16.msra.mxu0 %v1229_v15  ;;  %828 = vmatpush1.bf16.msra.mxu1 %v1232_v16 }
  0x4e   : > { %786 = vmatprep.subr.bf16.mxu0 %v776_v19  ;;  %829 = vmatprep.subr.bf16.mxu1 %v782_v20 }
  0x4f   : > { %816 = vmatprep.mubr.bf16.mxu0 %v1297_v32  ;;  %859 = vmatprep.mubr.bf16.mxu1 %v1297_v32 }
  0x51   : > { %787 = vmatpush1.bf16.msra.mxu0 %v773_v21  ;;  %830 = vmatpush1.bf16.msra.mxu1 %v779_v22 }
  0x54   : > { %1116 = vmatmul.mubr.msk.bf16.vlgmr.msra.gmra.mrb[12].mxu0 %vm319_vm2, %v1483_v48  ;;  %1117 = vmatmul.mubr.msk.bf16.vlgmr.msra.gmra.mrb[12].mxu1 %vm319_vm2, %v1483_v48 }
  0xb2   : > { %v883_v63 = vpop.permute.xlu0 %882 }
  0xb6   : > { %v888_v18 = vpop.permute.xlu0 %887 }
 0x10f   : > { %v373_v23 = vpop.f32.mrb[0].mxu0  ;;  %v416_v24 = vpop.f32.mrb[0].mxu1 }
 0x110   : > { %v375_v25 = vpop.f32.mrb[1].mxu0  ;;  %v418_v26 = vpop.f32.mrb[1].mxu1 }
 0x111   : > { %v377_v27 = vpop.f32.mrb[2].mxu0  ;;  %v420_v28 = vpop.f32.mrb[2].mxu1 }
 0x112   : > { %v379_v29 = vpop.f32.mrb[3].mxu0  ;;  %v422_v30 = vpop.f32.mrb[3].mxu1 }
 0x117   : > { %v516_v31 = vpop.f32.mrb[4].mxu0  ;;  %v559_v33 = vpop.f32.mrb[4].mxu1 }
 0x118   : > { %v568_v34 = vmax.f32 %v373_v23, %v516_v31  ;;  %v570_v32 = vmax.f32 %v416_v24, %v559_v33  ;;  %v518_v35 = vpop.f32.mrb[5].mxu0  ;;  %v561_v36 = vpop.f32.mrb[5].mxu1 }
 0x119   : > { %v569_v37 = vmax.f32 %v375_v25, %v518_v35  ;;  %v571_v38 = vmax.f32 %v418_v26, %v561_v36  ;;  %v520_v39 = vpop.f32.mrb[6].mxu0  ;;  %v563_v40 = vpop.f32.mrb[6].mxu1 }
 0x11a   : > { %v572_v41 = vmax.f32 %v377_v27, %v520_v39  ;;  %v574_v42 = vmax.f32 %v420_v28, %v563_v40  ;;  %v522_v43 = vpop.f32.mrb[7].mxu0  ;;  %v565_v44 = vpop.f32.mrb[7].mxu1 }
 0x11b   : > { %v573_v45 = vmax.f32 %v379_v29, %v522_v43  ;;  %v575_v46 = vmax.f32 %v422_v30, %v565_v44 }
 0x11f   : > { %v667_v47 = vpop.f32.mrb[8].mxu0  ;;  %v710_v48 = vpop.f32.mrb[8].mxu1 }
 0x120   : > { %v719_v49 = vmax.f32 %v568_v34, %v667_v47  ;;  %v721_v50 = vmax.f32 %v570_v32, %v710_v48  ;;  %v669_v51 = vpop.f32.mrb[9].mxu0  ;;  %v712_v52 = vpop.f32.mrb[9].mxu1 }
 0x121   : > { %v720_v53 = vmax.f32 %v569_v37, %v669_v51  ;;  %v722_v54 = vmax.f32 %v571_v38, %v712_v52  ;;  %v671_v55 = vpop.f32.mrb[10].mxu0  ;;  %v714_v56 = vpop.f32.mrb[10].mxu1 }
 0x122   : > { %v723_v57 = vmax.f32 %v572_v41, %v671_v55  ;;  %v725_v58 = vmax.f32 %v574_v42, %v714_v56  ;;  %v673_v59 = vpop.f32.mrb[11].mxu0  ;;  %v716_v60 = vpop.f32.mrb[11].mxu1 }
 0x123   : > { %v724_v61 = vmax.f32 %v573_v45, %v673_v59  ;;  %v726_v62 = vmax.f32 %v575_v46, %v716_v60 }
 0x127   : > { %v818_v0 = vpop.f32.mrb[12].mxu0  ;;  %v861_v1 = vpop.f32.mrb[12].mxu1 }
 0x128   : > { %v870_v2 = vmax.f32 %v719_v49, %v818_v0  ;;  %v872_v3 = vmax.f32 %v721_v50, %v861_v1  ;;  %v820_v4 = vpop.f32.mrb[13].mxu0  ;;  %v863_v5 = vpop.f32.mrb[13].mxu1 }
 0x129   : > { %v871_v6 = vmax.f32 %v720_v53, %v820_v4  ;;  %v873_v7 = vmax.f32 %v722_v54, %v863_v5  ;;  %v822_v8 = vpop.f32.mrb[14].mxu0  ;;  %v865_v9 = vpop.f32.mrb[14].mxu1 }
 0x12a   : > { %v890_v10 = vadd.f32 %v883_v63, %v870_v2  ;;  %v892_v11 = vadd.f32 %v883_v63, %v872_v3  ;;  %v874_v12 = vmax.f32 %v723_v57, %v822_v8  ;;  %v876_v13 = vmax.f32 %v725_v58, %v865_v9  ;;  %v824_v14 = vpop.f32.mrb[15].mxu0  ;;  %v867_v15 = vpop.f32.mrb[15].mxu1 }
 0x12b   : > { %v891_v16 = vadd.f32 %v883_v63, %v871_v6  ;;  %v893_v17 = vadd.f32 %v883_v63, %v873_v7  ;;  %v875_v19 = vmax.f32 %v724_v61, %v824_v14  ;;  %v877_v20 = vmax.f32 %v726_v62, %v867_v15 }
 0x12c   : > { %v898_v21 = vmax.f32 %v890_v10, 0.0  ;;  %v900_v22 = vmax.f32 %v892_v11, 0.0  ;;  %v894_v23 = vadd.f32 %v888_v18, %v874_v12  ;;  %v896_v24 = vadd.f32 %v888_v18, %v876_v13 }
 0x12d   : > { %v899_v25 = vmax.f32 %v891_v16, 0.0  ;;  %v901_v26 = vmax.f32 %v893_v17, 0.0  ;;  %v895_v27 = vadd.f32 %v888_v18, %v875_v19  ;;  %v897_v28 = vadd.f32 %v888_v18, %v877_v20  ;;  %940 = sbr.rel (!%p1367_p6) target bundleno = 316 (0x13c), region = 59 }
 0x12e   : > { %v902_v29 = vmax.f32 %v894_v23, 0.0  ;;  %v904_v30 = vmax.f32 %v896_v24, 0.0 }
 0x12f   : > { %v1127_v31 = vpack.c.bf16 %v899_v25, %v898_v21  ;;  %v1128_v33 = vpack.c.bf16 %v901_v26, %v900_v22  ;;  %v903_v34 = vmax.f32 %v895_v27, 0.0  ;;  %v905_v32 = vmax.f32 %v897_v28, 0.0 }
 0x131   : > { %930 = vst [vmem:[%s264_s12] sm:$0xff] %v1127_v31  ;;  %931 = vst [vmem:[%s264_s12 + $0x8] sm:$0xff] %v1128_v33  ;;  %v1129_v35 = vpack.c.bf16 %v903_v34, %v902_v29  ;;  %v1130_v36 = vpack.c.bf16 %v905_v32, %v904_v30 }
 0x133   : > { %932 = vst [vmem:[%s264_s12 + $0x10] sm:$0xff] %v1129_v35  ;;  %933 = vst [vmem:[%s264_s12 + $0x18] sm:$0xff] %v1130_v36 }
 0x138   : > { %v958_v37 = vld [vmem:[%s264_s12] sm:$0xff]  ;;  %v960_v38 = vld [vmem:[%s264_s12 + $0x8] sm:$0xff] }
 0x139   : > { %959 = vst [vmem:[%s945_s11] sm:$0xff] %v958_v37  ;;  %961 = vst [vmem:[%s945_s11 + $0x8] sm:$0xff] %v960_v38 }
 0x13a   : > { %v962_v39 = vld [vmem:[%s264_s12 + $0x10] sm:$0xff]  ;;  %v964_v40 = vld [vmem:[%s264_s12 + $0x18] sm:$0xff] }
 0x13b   : > { %963 = vst [vmem:[%s945_s11 + $0xb0] sm:$0xff] %v962_v39  ;;  %965 = vst [vmem:[%s945_s11 + $0xb8] sm:$0xff] %v964_v40 }
 0x13c PF: > { %s13_s18 = sadd.s32 1, %s1295_s18   ;;  %s1580_s12 = smov %s1275_s13 }
 0x13d   : > { %p10_p12 = scmp.ge.s32.totalorder %s13_s18, 24   ;;  %s1581_s13 = smov %s1375_s27 }
 0x13e   : > { %s1582_s14 = smov %s1287_s16  ;;  %s1583_s15 = smov %s1291_s17 }
 0x13f   : > { %s1584_s16 = smov %s1587_s19  ;;  %s1585_s17 = smov %s1591_s20 }
 0x140   :  { %12 = sbr.rel (!%p10_p12) target bundleno = 4 (0x4), region = 116 }

// kernel: somi_cnn_forward.4
= control target key start
LH: loop header
LB: loop body
LE: loop exit
PB: predicated region body
PF: predicated region fallthrough
CT: control target
= control target key end

     0   :  { %s2752_s12 = smov 0   ;;  %s2754_s13 = smov 0   ;;  %s3424_s0 = inlined_call_operand.vmem [shape: bf16[2,4,144,1536], index: 0, kind: input, shape index: {}]   ;;  %s3425_s1 = inlined_call_operand.vmem [shape: bf16[32,144], index: 1, kind: input, shape index: {}]   ;;  %s3426_s2 = inlined_call_operand.vmem [shape: f32[32,1], index: 2, kind: input, shape index: {}]   ;;  %s3427_s3 = inlined_call_operand.vmem [shape: bf16[2,32,1536], index: 3, kind: output, shape index: {}]  }
   0x1   :  { %s2756_s14 = smov 0   ;;  %s2758_s15 = smov 0  }
   0x2   :  { %s2760_s16 = smov 0   ;;  %s2762_s17 = smov 0  }
   0x3   :  { %s2764_s18 = smov 0  }
   0x4 LB: > { %s22_s19 = sadd.s32 1, %s2721_s16  ;;  %s25_s20 = sadd.s32 1, %s2725_s17  ;;  %s2729_s18 = sphi %s2764_s18, %s13_s18   ;;  %s2725_s17 = sphi %s2762_s17, %s3434_s17   ;;  %s2721_s16 = sphi %s2760_s16, %s3433_s16   ;;  %s2717_s15 = sphi %s2758_s15, %s3432_s15   ;;  %s2713_s14 = sphi %s2756_s14, %s3431_s14   ;;  %s2709_s13 = sphi %s2754_s13, %s3430_s13   ;;  %s2705_s12 = sphi %s2752_s12, %s3429_s12  }
   0x5   : > { %p23_p0 = scmp.ge.s32.totalorder %s22_s19, 3  ;;  %s2089_s21 = sadd.s32 4294967295, %s2729_s18  }
   0x6   : > { %p41_p1 = scmp.ne.s32.totalorder %s2709_s13, %s2705_s12  ;;  %p42_p2 = scmp.eq.s32.totalorder %s2729_s18, 0 }
   0x7   : > { %s3436_s19 = smov (%p23_p0, %s22_s19), 0  ;;  %s3438_s20 = smov (!%p23_p0, %s25_s20), %s2725_s17 }
   0x8   : > { %p27_p3 = scmp.ge.s32.totalorder %s3438_s20, 2  ;;  %p115_p4 = scmp.eq.s32.totalorder %s2089_s21, 5 }
   0x9   : > { %s30_s22 = ssub.s32 %s2721_s16, %s3436_s19  ;;  %p43_p5 = por %p42_p2, %p41_p1 }
   0xa   : > { %s3440_s20 = smov (%p27_p3, %s3438_s20), 0  ;;  %p2800_p6 = por %p115_p4, %p41_p1 }
   0xb   : > { %s29_s24 = ssub.s32 %s2725_s17, %s3440_s20  ;;  %s34_s26 = sadd.s32 1, %s2709_s13 }
   0xc   : > { %s31_s25 = sor.u32 %s30_s22, %s29_s24  ;;  %p2092_p8 = scmp.ge.s32.totalorder %s2729_s18, 6 }
   0xd   : > { %p32_p7 = scmp.eq.s32.totalorder %s31_s25, 0 }
   0xe   : > { %143 = sbr.rel (%p2092_p8) target bundleno = 101 (0x65), region = 24 }
   0xf   : > { %s2808_s27 = scalar_select %p32_p7, %s2709_s13, %s34_s26  }
  0x15   : > { %146 = sbr.rel (!%p43_p5) target bundleno = 101 (0x65), region = 28  ;;  %s148_s28 = sand.u32 (%p43_p5), 1, %s2709_s13  }
  0x16   : > { %s2390_s29 = smul.u32 (%p43_p5), 1152, %s148_s28  ;;  %s2093_s30 = sshll.u32 (%p43_p5), %s2721_s16, 2 }
  0x17   : > { %s2391_s4 = smul.u32 (%p43_p5), 864, %s2725_s17 }
  0x18   : > { %s2822_s10 = scalar_lea.vmem (%p43_p5), [#allocation2], %s2390_s29 }
  0x19   : > { %s153_s5 = sadd.s32 (%p43_p5), %s2391_s4, %s2093_s30 }
  0x1a   : > { %s2094_s6 = sshll.u32 (%p43_p5), %s153_s5, 2 }
  0x1b   : > { %s2817_s9 = scalar_lea.vmem (%p43_p5), %s3424_s0, %s2094_s6 }
  0x1c   : > { %v168_v0 = vld [vmem:[%s2817_s9] sm:$0xff]  ;;  %v170_v1 = vld [vmem:[%s2817_s9 + $0x8] sm:$0xff]  ;;  %v172_v2 = vld [vmem:[%s2817_s9 + $0x30] sm:$0xff] }
  0x1d   : > { %169 = vst [vmem:[%s2822_s10] sm:$0xff] %v168_v0  ;;  %171 = vst [vmem:[%s2822_s10 + $0x8] sm:$0xff] %v170_v1  ;;  %v174_v3 = vld [vmem:[%s2817_s9 + $0x38] sm:$0xff]  ;;  %v176_v4 = vld [vmem:[%s2817_s9 + $0x60] sm:$0xff] }
  0x1e   : > { %173 = vst [vmem:[%s2822_s10 + $0x10] sm:$0xff] %v172_v2  ;;  %v178_v5 = vld [vmem:[%s2817_s9 + $0x68] sm:$0xff]  ;;  %175 = vst [vmem:[%s2822_s10 + $0x18] sm:$0xff] %v174_v3  ;;  %v180_v6 = vld [vmem:[%s2817_s9 + $0x90] sm:$0xff] }
  0x1f   : > { %177 = vst [vmem:[%s2822_s10 + $0x20] sm:$0xff] %v176_v4  ;;  %179 = vst [vmem:[%s2822_s10 + $0x28] sm:$0xff] %v178_v5  ;;  %v182_v7 = vld [vmem:[%s2817_s9 + $0x98] sm:$0xff]  ;;  %v184_v8 = vld [vmem:[%s2817_s9 + $0xc0] sm:$0xff] }
  0x20   : > { %181 = vst [vmem:[%s2822_s10 + $0x30] sm:$0xff] %v180_v6  ;;  %183 = vst [vmem:[%s2822_s10 + $0x38] sm:$0xff] %v182_v7  ;;  %v186_v9 = vld [vmem:[%s2817_s9 + $0xc8] sm:$0xff]  ;;  %v188_v10 = vld [vmem:[%s2817_s9 + $0xf0] sm:$0xff] }
  0x21   : > { %185 = vst [vmem:[%s2822_s10 + $0x40] sm:$0xff] %v184_v8  ;;  %v190_v11 = vld [vmem:[%s2817_s9 + $0xf8] sm:$0xff]  ;;  %187 = vst [vmem:[%s2822_s10 + $0x48] sm:$0xff] %v186_v9  ;;  %v192_v12 = vld [vmem:[%s2817_s9 + $0x120] sm:$0xff] }
  0x22   : > { %189 = vst [vmem:[%s2822_s10 + $0x50] sm:$0xff] %v188_v10  ;;  %191 = vst [vmem:[%s2822_s10 + $0x58] sm:$0xff] %v190_v11  ;;  %v194_v13 = vld [vmem:[%s2817_s9 + $0x128] sm:$0xff]  ;;  %v196_v14 = vld [vmem:[%s2817_s9 + $0x150] sm:$0xff] }
  0x23   : > { %193 = vst [vmem:[%s2822_s10 + $0x60] sm:$0xff] %v192_v12  ;;  %195 = vst [vmem:[%s2822_s10 + $0x68] sm:$0xff] %v194_v13  ;;  %v198_v15 = vld [vmem:[%s2817_s9 + $0x158] sm:$0xff]  ;;  %v200_v16 = vld [vmem:[%s2817_s9 + $0x180] sm:$0xff] }
  0x24   : > { %197 = vst [vmem:[%s2822_s10 + $0x70] sm:$0xff] %v196_v14  ;;  %v202_v17 = vld [vmem:[%s2817_s9 + $0x188] sm:$0xff]  ;;  %199 = vst [vmem:[%s2822_s10 + $0x78] sm:$0xff] %v198_v15  ;;  %v204_v18 = vld [vmem:[%s2817_s9 + $0x1b0] sm:$0xff] }
  0x25   : > { %201 = vst [vmem:[%s2822_s10 + $0x80] sm:$0xff] %v200_v16  ;;  %203 = vst [vmem:[%s2822_s10 + $0x88] sm:$0xff] %v202_v17  ;;  %v206_v19 = vld [vmem:[%s2817_s9 + $0x1b8] sm:$0xff]  ;;  %v208_v20 = vld [vmem:[%s2817_s9 + $0x1e0] sm:$0xff] }
  0x26   : > { %205 = vst [vmem:[%s2822_s10 + $0x90] sm:$0xff] %v204_v18  ;;  %207 = vst [vmem:[%s2822_s10 + $0x98] sm:$0xff] %v206_v19  ;;  %v210_v21 = vld [vmem:[%s2817_s9 + $0x1e8] sm:$0xff]  ;;  %v212_v22 = vld [vmem:[%s2817_s9 + $0x210] sm:$0xff] }
  0x27   : > { %209 = vst [vmem:[%s2822_s10 + $0xa0] sm:$0xff] %v208_v20  ;;  %v214_v23 = vld [vmem:[%s2817_s9 + $0x218] sm:$0xff]  ;;  %211 = vst [vmem:[%s2822_s10 + $0xa8] sm:$0xff] %v210_v21  ;;  %v216_v24 = vld [vmem:[%s2817_s9 + $0x240] sm:$0xff] }
  0x28   : > { %213 = vst [vmem:[%s2822_s10 + $0xb0] sm:$0xff] %v212_v22  ;;  %215 = vst [vmem:[%s2822_s10 + $0xb8] sm:$0xff] %v214_v23  ;;  %v218_v25 = vld [vmem:[%s2817_s9 + $0x248] sm:$0xff]  ;;  %v220_v26 = vld [vmem:[%s2817_s9 + $0x270] sm:$0xff] }
  0x29   : > { %217 = vst [vmem:[%s2822_s10 + $0xc0] sm:$0xff] %v216_v24  ;;  %219 = vst [vmem:[%s2822_s10 + $0xc8] sm:$0xff] %v218_v25  ;;  %v222_v27 = vld [vmem:[%s2817_s9 + $0x278] sm:$0xff]  ;;  %v224_v28 = vld [vmem:[%s2817_s9 + $0x2a0] sm:$0xff] }
  0x2a   : > { %221 = vst [vmem:[%s2822_s10 + $0xd0] sm:$0xff] %v220_v26  ;;  %v226_v29 = vld [vmem:[%s2817_s9 + $0x2a8] sm:$0xff]  ;;  %223 = vst [vmem:[%s2822_s10 + $0xd8] sm:$0xff] %v222_v27  ;;  %v228_v30 = vld [vmem:[%s2817_s9 + $0x2d0] sm:$0xff] }
  0x2b   : > { %225 = vst [vmem:[%s2822_s10 + $0xe0] sm:$0xff] %v224_v28  ;;  %227 = vst [vmem:[%s2822_s10 + $0xe8] sm:$0xff] %v226_v29  ;;  %v230_v31 = vld [vmem:[%s2817_s9 + $0x2d8] sm:$0xff]  ;;  %v232_v32 = vld [vmem:[%s2817_s9 + $0x300] sm:$0xff] }
  0x2c   : > { %229 = vst [vmem:[%s2822_s10 + $0xf0] sm:$0xff] %v228_v30  ;;  %231 = vst [vmem:[%s2822_s10 + $0xf8] sm:$0xff] %v230_v31  ;;  %v234_v33 = vld [vmem:[%s2817_s9 + $0x308] sm:$0xff]  ;;  %v236_v34 = vld [vmem:[%s2817_s9 + $0x330] sm:$0xff] }
  0x2d   : > { %233 = vst [vmem:[%s2822_s10 + $0x100] sm:$0xff] %v232_v32  ;;  %v238_v35 = vld [vmem:[%s2817_s9 + $0x338] sm:$0xff]  ;;  %235 = vst [vmem:[%s2822_s10 + $0x108] sm:$0xff] %v234_v33  ;;  %v240_v36 = vld [vmem:[%s2817_s9 + $0x360] sm:$0xff] }
  0x2e   : > { %237 = vst [vmem:[%s2822_s10 + $0x110] sm:$0xff] %v236_v34  ;;  %239 = vst [vmem:[%s2822_s10 + $0x118] sm:$0xff] %v238_v35  ;;  %v242_v37 = vld [vmem:[%s2817_s9 + $0x368] sm:$0xff]  ;;  %v244_v38 = vld [vmem:[%s2817_s9 + $0x390] sm:$0xff] }
  0x2f   : > { %241 = vst [vmem:[%s2822_s10 + $0x120] sm:$0xff] %v240_v36  ;;  %243 = vst [vmem:[%s2822_s10 + $0x128] sm:$0xff] %v242_v37  ;;  %v246_v39 = vld [vmem:[%s2817_s9 + $0x398] sm:$0xff]  ;;  %v248_v40 = vld [vmem:[%s2817_s9 + $0x3c0] sm:$0xff] }
  0x30   : > { %245 = vst [vmem:[%s2822_s10 + $0x130] sm:$0xff] %v244_v38  ;;  %v250_v41 = vld [vmem:[%s2817_s9 + $0x3c8] sm:$0xff]  ;;  %247 = vst [vmem:[%s2822_s10 + $0x138] sm:$0xff] %v246_v39  ;;  %v252_v42 = vld [vmem:[%s2817_s9 + $0x3f0] sm:$0xff] }
  0x31   : > { %249 = vst [vmem:[%s2822_s10 + $0x140] sm:$0xff] %v248_v40  ;;  %251 = vst [vmem:[%s2822_s10 + $0x148] sm:$0xff] %v250_v41  ;;  %v254_v43 = vld [vmem:[%s2817_s9 + $0x3f8] sm:$0xff]  ;;  %v256_v44 = vld [vmem:[%s2817_s9 + $0x420] sm:$0xff] }
  0x32   : > { %253 = vst [vmem:[%s2822_s10 + $0x150] sm:$0xff] %v252_v42  ;;  %255 = vst [vmem:[%s2822_s10 + $0x158] sm:$0xff] %v254_v43  ;;  %v258_v45 = vld [vmem:[%s2817_s9 + $0x428] sm:$0xff]  ;;  %v260_v46 = vld [vmem:[%s2817_s9 + $0x450] sm:$0xff] }
  0x33   : > { %257 = vst [vmem:[%s2822_s10 + $0x160] sm:$0xff] %v256_v44  ;;  %v262_v47 = vld [vmem:[%s2817_s9 + $0x458] sm:$0xff]  ;;  %259 = vst [vmem:[%s2822_s10 + $0x168] sm:$0xff] %v258_v45  ;;  %v264_v48 = vld [vmem:[%s2817_s9 + $0x480] sm:$0xff] }
  0x34   : > { %261 = vst [vmem:[%s2822_s10 + $0x170] sm:$0xff] %v260_v46  ;;  %263 = vst [vmem:[%s2822_s10 + $0x178] sm:$0xff] %v262_v47  ;;  %v266_v49 = vld [vmem:[%s2817_s9 + $0x488] sm:$0xff]  ;;  %v268_v50 = vld [vmem:[%s2817_s9 + $0x4b0] sm:$0xff] }
  0x35   : > { %265 = vst [vmem:[%s2822_s10 + $0x180] sm:$0xff] %v264_v48  ;;  %267 = vst [vmem:[%s2822_s10 + $0x188] sm:$0xff] %v266_v49  ;;  %v270_v51 = vld [vmem:[%s2817_s9 + $0x4b8] sm:$0xff]  ;;  %v272_v52 = vld [vmem:[%s2817_s9 + $0x4e0] sm:$0xff] }
  0x36   : > { %269 = vst [vmem:[%s2822_s10 + $0x190] sm:$0xff] %v268_v50  ;;  %v274_v53 = vld [vmem:[%s2817_s9 + $0x4e8] sm:$0xff]  ;;  %271 = vst [vmem:[%s2822_s10 + $0x198] sm:$0xff] %v270_v51  ;;  %v276_v54 = vld [vmem:[%s2817_s9 + $0x510] sm:$0xff] }
  0x37   : > { %273 = vst [vmem:[%s2822_s10 + $0x1a0] sm:$0xff] %v272_v52  ;;  %275 = vst [vmem:[%s2822_s10 + $0x1a8] sm:$0xff] %v274_v53  ;;  %v278_v55 = vld [vmem:[%s2817_s9 + $0x518] sm:$0xff]  ;;  %v280_v56 = vld [vmem:[%s2817_s9 + $0x540] sm:$0xff] }
  0x38   : > { %277 = vst [vmem:[%s2822_s10 + $0x1b0] sm:$0xff] %v276_v54  ;;  %279 = vst [vmem:[%s2822_s10 + $0x1b8] sm:$0xff] %v278_v55  ;;  %v282_v57 = vld [vmem:[%s2817_s9 + $0x548] sm:$0xff]  ;;  %v284_v58 = vld [vmem:[%s2817_s9 + $0x570] sm:$0xff] }
  0x39   : > { %281 = vst [vmem:[%s2822_s10 + $0x1c0] sm:$0xff] %v280_v56  ;;  %v286_v59 = vld [vmem:[%s2817_s9 + $0x578] sm:$0xff]  ;;  %283 = vst [vmem:[%s2822_s10 + $0x1c8] sm:$0xff] %v282_v57  ;;  %v288_v60 = vld [vmem:[%s2817_s9 + $0x5a0] sm:$0xff] }
  0x3a   : > { %285 = vst [vmem:[%s2822_s10 + $0x1d0] sm:$0xff] %v284_v58  ;;  %287 = vst [vmem:[%s2822_s10 + $0x1d8] sm:$0xff] %v286_v59  ;;  %v290_v61 = vld [vmem:[%s2817_s9 + $0x5a8] sm:$0xff]  ;;  %v292_v62 = vld [vmem:[%s2817_s9 + $0x5d0] sm:$0xff] }
  0x3b   : > { %289 = vst [vmem:[%s2822_s10 + $0x1e0] sm:$0xff] %v288_v60  ;;  %291 = vst [vmem:[%s2822_s10 + $0x1e8] sm:$0xff] %v290_v61  ;;  %v294_v63 = vld [vmem:[%s2817_s9 + $0x5d8] sm:$0xff]  ;;  %v296_v0 = vld [vmem:[%s2817_s9 + $0x600] sm:$0xff] }
  0x3c   : > { %293 = vst [vmem:[%s2822_s10 + $0x1f0] sm:$0xff] %v292_v62  ;;  %v298_v1 = vld [vmem:[%s2817_s9 + $0x608] sm:$0xff]  ;;  %295 = vst [vmem:[%s2822_s10 + $0x1f8] sm:$0xff] %v294_v63  ;;  %v300_v2 = vld [vmem:[%s2817_s9 + $0x630] sm:$0xff] }
  0x3d   : > { %297 = vst [vmem:[%s2822_s10 + $0x200] sm:$0xff] %v296_v0  ;;  %299 = vst [vmem:[%s2822_s10 + $0x208] sm:$0xff] %v298_v1  ;;  %v302_v3 = vld [vmem:[%s2817_s9 + $0x638] sm:$0xff]  ;;  %v304_v4 = vld [vmem:[%s2817_s9 + $0x660] sm:$0xff] }
  0x3e   : > { %301 = vst [vmem:[%s2822_s10 + $0x210] sm:$0xff] %v300_v2  ;;  %303 = vst [vmem:[%s2822_s10 + $0x218] sm:$0xff] %v302_v3  ;;  %v306_v5 = vld [vmem:[%s2817_s9 + $0x668] sm:$0xff]  ;;  %v308_v6 = vld [vmem:[%s2817_s9 + $0x690] sm:$0xff] }
  0x3f   : > { %305 = vst [vmem:[%s2822_s10 + $0x220] sm:$0xff] %v304_v4  ;;  %v310_v7 = vld [vmem:[%s2817_s9 + $0x698] sm:$0xff]  ;;  %307 = vst [vmem:[%s2822_s10 + $0x228] sm:$0xff] %v306_v5  ;;  %v312_v8 = vld [vmem:[%s2817_s9 + $0x6c0] sm:$0xff] }
  0x40   : > { %309 = vst [vmem:[%s2822_s10 + $0x230] sm:$0xff] %v308_v6  ;;  %311 = vst [vmem:[%s2822_s10 + $0x238] sm:$0xff] %v310_v7  ;;  %v314_v9 = vld [vmem:[%s2817_s9 + $0x6c8] sm:$0xff]  ;;  %v316_v10 = vld [vmem:[%s2817_s9 + $0x6f0] sm:$0xff] }
  0x41   : > { %313 = vst [vmem:[%s2822_s10 + $0x240] sm:$0xff] %v312_v8  ;;  %315 = vst [vmem:[%s2822_s10 + $0x248] sm:$0xff] %v314_v9  ;;  %v318_v11 = vld [vmem:[%s2817_s9 + $0x6f8] sm:$0xff]  ;;  %v320_v12 = vld [vmem:[%s2817_s9 + $0x720] sm:$0xff] }
  0x42   : > { %317 = vst [vmem:[%s2822_s10 + $0x250] sm:$0xff] %v316_v10  ;;  %v322_v13 = vld [vmem:[%s2817_s9 + $0x728] sm:$0xff]  ;;  %319 = vst [vmem:[%s2822_s10 + $0x258] sm:$0xff] %v318_v11  ;;  %v324_v14 = vld [vmem:[%s2817_s9 + $0x750] sm:$0xff] }
  0x43   : > { %321 = vst [vmem:[%s2822_s10 + $0x260] sm:$0xff] %v320_v12  ;;  %323 = vst [vmem:[%s2822_s10 + $0x268] sm:$0xff] %v322_v13  ;;  %v326_v15 = vld [vmem:[%s2817_s9 + $0x758] sm:$0xff]  ;;  %v328_v16 = vld [vmem:[%s2817_s9 + $0x780] sm:$0xff] }
  0x44   : > { %325 = vst [vmem:[%s2822_s10 + $0x270] sm:$0xff] %v324_v14  ;;  %327 = vst [vmem:[%s2822_s10 + $0x278] sm:$0xff] %v326_v15  ;;  %v330_v17 = vld [vmem:[%s2817_s9 + $0x788] sm:$0xff]  ;;  %v332_v18 = vld [vmem:[%s2817_s9 + $0x7b0] sm:$0xff] }
  0x45   : > { %329 = vst [vmem:[%s2822_s10 + $0x280] sm:$0xff] %v328_v16  ;;  %v334_v19 = vld [vmem:[%s2817_s9 + $0x7b8] sm:$0xff]  ;;  %331 = vst [vmem:[%s2822_s10 + $0x288] sm:$0xff] %v330_v17  ;;  %v336_v20 = vld [vmem:[%s2817_s9 + $0x7e0] sm:$0xff] }
  0x46   : > { %333 = vst [vmem:[%s2822_s10 + $0x290] sm:$0xff] %v332_v18  ;;  %335 = vst [vmem:[%s2822_s10 + $0x298] sm:$0xff] %v334_v19  ;;  %v338_v21 = vld [vmem:[%s2817_s9 + $0x7e8] sm:$0xff]  ;;  %v340_v22 = vld [vmem:[%s2817_s9 + $0x810] sm:$0xff] }
  0x47   : > { %337 = vst [vmem:[%s2822_s10 + $0x2a0] sm:$0xff] %v336_v20  ;;  %339 = vst [vmem:[%s2822_s10 + $0x2a8] sm:$0xff] %v338_v21  ;;  %v342_v23 = vld [vmem:[%s2817_s9 + $0x818] sm:$0xff]  ;;  %v344_v24 = vld [vmem:[%s2817_s9 + $0x840] sm:$0xff] }
  0x48   : > { %341 = vst [vmem:[%s2822_s10 + $0x2b0] sm:$0xff] %v340_v22  ;;  %v346_v25 = vld [vmem:[%s2817_s9 + $0x848] sm:$0xff]  ;;  %343 = vst [vmem:[%s2822_s10 + $0x2b8] sm:$0xff] %v342_v23  ;;  %v348_v26 = vld [vmem:[%s2817_s9 + $0x870] sm:$0xff] }
  0x49   : > { %345 = vst [vmem:[%s2822_s10 + $0x2c0] sm:$0xff] %v344_v24  ;;  %347 = vst [vmem:[%s2822_s10 + $0x2c8] sm:$0xff] %v346_v25  ;;  %v350_v27 = vld [vmem:[%s2817_s9 + $0x878] sm:$0xff]  ;;  %v352_v28 = vld [vmem:[%s2817_s9 + $0x8a0] sm:$0xff] }
  0x4a   : > { %349 = vst [vmem:[%s2822_s10 + $0x2d0] sm:$0xff] %v348_v26  ;;  %351 = vst [vmem:[%s2822_s10 + $0x2d8] sm:$0xff] %v350_v27  ;;  %v354_v29 = vld [vmem:[%s2817_s9 + $0x8a8] sm:$0xff]  ;;  %v356_v30 = vld [vmem:[%s2817_s9 + $0x8d0] sm:$0xff] }
  0x4b   : > { %353 = vst [vmem:[%s2822_s10 + $0x2e0] sm:$0xff] %v352_v28  ;;  %v358_v31 = vld [vmem:[%s2817_s9 + $0x8d8] sm:$0xff]  ;;  %355 = vst [vmem:[%s2822_s10 + $0x2e8] sm:$0xff] %v354_v29  ;;  %v360_v32 = vld [vmem:[%s2817_s9 + $0x900] sm:$0xff] }
  0x4c   : > { %357 = vst [vmem:[%s2822_s10 + $0x2f0] sm:$0xff] %v356_v30  ;;  %359 = vst [vmem:[%s2822_s10 + $0x2f8] sm:$0xff] %v358_v31  ;;  %v362_v33 = vld [vmem:[%s2817_s9 + $0x908] sm:$0xff]  ;;  %v364_v34 = vld [vmem:[%s2817_s9 + $0x930] sm:$0xff] }
  0x4d   : > { %361 = vst [vmem:[%s2822_s10 + $0x300] sm:$0xff] %v360_v32  ;;  %363 = vst [vmem:[%s2822_s10 + $0x308] sm:$0xff] %v362_v33  ;;  %v366_v35 = vld [vmem:[%s2817_s9 + $0x938] sm:$0xff]  ;;  %v368_v36 = vld [vmem:[%s2817_s9 + $0x960] sm:$0xff] }
  0x4e   : > { %365 = vst [vmem:[%s2822_s10 + $0x310] sm:$0xff] %v364_v34  ;;  %v370_v37 = vld [vmem:[%s2817_s9 + $0x968] sm:$0xff]  ;;  %367 = vst [vmem:[%s2822_s10 + $0x318] sm:$0xff] %v366_v35  ;;  %v372_v38 = vld [vmem:[%s2817_s9 + $0x990] sm:$0xff] }
  0x4f   : > { %369 = vst [vmem:[%s2822_s10 + $0x320] sm:$0xff] %v368_v36  ;;  %371 = vst [vmem:[%s2822_s10 + $0x328] sm:$0xff] %v370_v37  ;;  %v374_v39 = vld [vmem:[%s2817_s9 + $0x998] sm:$0xff]  ;;  %v376_v40 = vld [vmem:[%s2817_s9 + $0x9c0] sm:$0xff] }
  0x50   : > { %373 = vst [vmem:[%s2822_s10 + $0x330] sm:$0xff] %v372_v38  ;;  %375 = vst [vmem:[%s2822_s10 + $0x338] sm:$0xff] %v374_v39  ;;  %v378_v41 = vld [vmem:[%s2817_s9 + $0x9c8] sm:$0xff]  ;;  %v380_v42 = vld [vmem:[%s2817_s9 + $0x9f0] sm:$0xff] }
  0x51   : > { %377 = vst [vmem:[%s2822_s10 + $0x340] sm:$0xff] %v376_v40  ;;  %v382_v43 = vld [vmem:[%s2817_s9 + $0x9f8] sm:$0xff]  ;;  %379 = vst [vmem:[%s2822_s10 + $0x348] sm:$0xff] %v378_v41  ;;  %v384_v44 = vld [vmem:[%s2817_s9 + $0xa20] sm:$0xff] }
  0x52   : > { %381 = vst [vmem:[%s2822_s10 + $0x350] sm:$0xff] %v380_v42  ;;  %383 = vst [vmem:[%s2822_s10 + $0x358] sm:$0xff] %v382_v43  ;;  %v386_v45 = vld [vmem:[%s2817_s9 + $0xa28] sm:$0xff]  ;;  %v388_v46 = vld [vmem:[%s2817_s9 + $0xa50] sm:$0xff] }
  0x53   : > { %385 = vst [vmem:[%s2822_s10 + $0x360] sm:$0xff] %v384_v44  ;;  %387 = vst [vmem:[%s2822_s10 + $0x368] sm:$0xff] %v386_v45  ;;  %v390_v47 = vld [vmem:[%s2817_s9 + $0xa58] sm:$0xff]  ;;  %v392_v48 = vld [vmem:[%s2817_s9 + $0xa80] sm:$0xff] }
  0x54   : > { %389 = vst [vmem:[%s2822_s10 + $0x370] sm:$0xff] %v388_v46  ;;  %v394_v49 = vld [vmem:[%s2817_s9 + $0xa88] sm:$0xff]  ;;  %391 = vst [vmem:[%s2822_s10 + $0x378] sm:$0xff] %v390_v47  ;;  %v396_v50 = vld [vmem:[%s2817_s9 + $0xab0] sm:$0xff] }
  0x55   : > { %393 = vst [vmem:[%s2822_s10 + $0x380] sm:$0xff] %v392_v48  ;;  %395 = vst [vmem:[%s2822_s10 + $0x388] sm:$0xff] %v394_v49  ;;  %v398_v51 = vld [vmem:[%s2817_s9 + $0xab8] sm:$0xff]  ;;  %v400_v52 = vld [vmem:[%s2817_s9 + $0xae0] sm:$0xff] }
  0x56   : > { %397 = vst [vmem:[%s2822_s10 + $0x390] sm:$0xff] %v396_v50  ;;  %399 = vst [vmem:[%s2822_s10 + $0x398] sm:$0xff] %v398_v51  ;;  %v402_v53 = vld [vmem:[%s2817_s9 + $0xae8] sm:$0xff]  ;;  %v404_v54 = vld [vmem:[%s2817_s9 + $0xb10] sm:$0xff] }
  0x57   : > { %401 = vst [vmem:[%s2822_s10 + $0x3a0] sm:$0xff] %v400_v52  ;;  %v406_v55 = vld [vmem:[%s2817_s9 + $0xb18] sm:$0xff]  ;;  %403 = vst [vmem:[%s2822_s10 + $0x3a8] sm:$0xff] %v402_v53  ;;  %v408_v56 = vld [vmem:[%s2817_s9 + $0xb40] sm:$0xff] }
  0x58   : > { %405 = vst [vmem:[%s2822_s10 + $0x3b0] sm:$0xff] %v404_v54  ;;  %407 = vst [vmem:[%s2822_s10 + $0x3b8] sm:$0xff] %v406_v55  ;;  %v410_v57 = vld [vmem:[%s2817_s9 + $0xb48] sm:$0xff]  ;;  %v412_v58 = vld [vmem:[%s2817_s9 + $0xb70] sm:$0xff] }
  0x59   : > { %409 = vst [vmem:[%s2822_s10 + $0x3c0] sm:$0xff] %v408_v56  ;;  %411 = vst [vmem:[%s2822_s10 + $0x3c8] sm:$0xff] %v410_v57  ;;  %v414_v59 = vld [vmem:[%s2817_s9 + $0xb78] sm:$0xff]  ;;  %v416_v60 = vld [vmem:[%s2817_s9 + $0xba0] sm:$0xff] }
  0x5a   : > { %413 = vst [vmem:[%s2822_s10 + $0x3d0] sm:$0xff] %v412_v58  ;;  %v418_v61 = vld [vmem:[%s2817_s9 + $0xba8] sm:$0xff]  ;;  %415 = vst [vmem:[%s2822_s10 + $0x3d8] sm:$0xff] %v414_v59  ;;  %v420_v62 = vld [vmem:[%s2817_s9 + $0xbd0] sm:$0xff] }
  0x5b   : > { %417 = vst [vmem:[%s2822_s10 + $0x3e0] sm:$0xff] %v416_v60  ;;  %419 = vst [vmem:[%s2822_s10 + $0x3e8] sm:$0xff] %v418_v61  ;;  %v422_v63 = vld [vmem:[%s2817_s9 + $0xbd8] sm:$0xff]  ;;  %v424_v0 = vld [vmem:[%s2817_s9 + $0xc00] sm:$0xff] }
  0x5c   : > { %421 = vst [vmem:[%s2822_s10 + $0x3f0] sm:$0xff] %v420_v62  ;;  %423 = vst [vmem:[%s2822_s10 + $0x3f8] sm:$0xff] %v422_v63  ;;  %v426_v1 = vld [vmem:[%s2817_s9 + $0xc08] sm:$0xff]  ;;  %v428_v2 = vld [vmem:[%s2817_s9 + $0xc30] sm:$0xff] }
  0x5d   : > { %425 = vst [vmem:[%s2822_s10 + $0x400] sm:$0xff] %v424_v0  ;;  %v430_v3 = vld [vmem:[%s2817_s9 + $0xc38] sm:$0xff]  ;;  %427 = vst [vmem:[%s2822_s10 + $0x408] sm:$0xff] %v426_v1  ;;  %v432_v4 = vld [vmem:[%s2817_s9 + $0xc60] sm:$0xff] }
  0x5e   : > { %429 = vst [vmem:[%s2822_s10 + $0x410] sm:$0xff] %v428_v2  ;;  %431 = vst [vmem:[%s2822_s10 + $0x418] sm:$0xff] %v430_v3  ;;  %v434_v5 = vld [vmem:[%s2817_s9 + $0xc68] sm:$0xff]  ;;  %v436_v6 = vld [vmem:[%s2817_s9 + $0xc90] sm:$0xff] }
  0x5f   : > { %433 = vst [vmem:[%s2822_s10 + $0x420] sm:$0xff] %v432_v4  ;;  %435 = vst [vmem:[%s2822_s10 + $0x428] sm:$0xff] %v434_v5  ;;  %v438_v7 = vld [vmem:[%s2817_s9 + $0xc98] sm:$0xff]  ;;  %v440_v8 = vld [vmem:[%s2817_s9 + $0xcc0] sm:$0xff] }
  0x60   : > { %437 = vst [vmem:[%s2822_s10 + $0x430] sm:$0xff] %v436_v6  ;;  %v442_v9 = vld [vmem:[%s2817_s9 + $0xcc8] sm:$0xff]  ;;  %439 = vst [vmem:[%s2822_s10 + $0x438] sm:$0xff] %v438_v7  ;;  %v444_v10 = vld [vmem:[%s2817_s9 + $0xcf0] sm:$0xff] }
  0x61   : > { %441 = vst [vmem:[%s2822_s10 + $0x440] sm:$0xff] %v440_v8  ;;  %443 = vst [vmem:[%s2822_s10 + $0x448] sm:$0xff] %v442_v9  ;;  %v446_v11 = vld [vmem:[%s2817_s9 + $0xcf8] sm:$0xff]  ;;  %v448_v12 = vld [vmem:[%s2817_s9 + $0xd20] sm:$0xff] }
  0x62   : > { %445 = vst [vmem:[%s2822_s10 + $0x450] sm:$0xff] %v444_v10  ;;  %447 = vst [vmem:[%s2822_s10 + $0x458] sm:$0xff] %v446_v11  ;;  %v450_v13 = vld [vmem:[%s2817_s9 + $0xd28] sm:$0xff]  ;;  %v452_v14 = vld [vmem:[%s2817_s9 + $0xd50] sm:$0xff] }
  0x63   : > { %449 = vst [vmem:[%s2822_s10 + $0x460] sm:$0xff] %v448_v12  ;;  %v454_v15 = vld [vmem:[%s2817_s9 + $0xd58] sm:$0xff]  ;;  %451 = vst [vmem:[%s2822_s10 + $0x468] sm:$0xff] %v450_v13 }
  0x64   : > { %453 = vst [vmem:[%s2822_s10 + $0x470] sm:$0xff] %v452_v14  ;;  %455 = vst [vmem:[%s2822_s10 + $0x478] sm:$0xff] %v454_v15 }
  0x65 PF: > { %p2095_p9 = scmp.ge.s32.totalorder %s2729_s18, 1  ;;  %p460_p10 = scmp.lt.s32.totalorder %s2729_s18, 7 }
  0x67   : > { %p461_p11 = pnand %p2095_p9, %p460_p10 }
  0x68   : > { %s467_s11 = sand.u32 (!%p461_p11), 1, %s2705_s12   ;;  %v3115_v16 = vld [vmem:[%s3425_s1 + $0x4] ss:$8 sps:$4 sm:$0xff] (!%p461_p11)   ;;  %vm730_vm0 = vcmask (!%p461_p11), 130048   ;;  %v2731_v51 = vmov (!%p461_p11), 0  }
  0x69   : > { %464 = sbr.rel (%p461_p11) target bundleno = 495 (0x1ef), region = 51  ;;  %2137 = vmatprep.mubr.msk.bf16.mxu0 (!%p461_p11), %vm730_vm0, %v3115_v16  ;;  %2139 = vmatprep.mubr.msk.bf16.mxu1 (!%p461_p11), %vm730_vm0, %v3115_v16  ;;  %v3166_v56 = vld [vmem:[%s3425_s1] ss:$8 sps:$4 sm:$0xff] (!%p461_p11)   ;;  %v3175_v61 = vld [vmem:[%s3425_s1 + $0x14] ss:$8 sps:$4 sm:$0xff] (!%p461_p11)  }
  0x6a   : > { %s2392_s24 = smul.u32 (!%p461_p11), 1152, %s467_s11  ;;  %2451 = vset.pattern.permute.xlu0 (!%p461_p11), %v2731_v51  ;;  %2452 = vset.pattern.permute.xlu1 (!%p461_p11), %v2731_v51  ;;  %v3190_v2 = vld [vmem:[%s3425_s1 + $0x10] ss:$8 sps:$4 sm:$0xff] (!%p461_p11)  }
  0x6c   : > { %s3123_s25 = scalar_lea.vmem (!%p461_p11), [#allocation2], %s2392_s24 }
  0x6d   : > { %v2453_v17 = vld [vmem:[%s3123_s25 + $0x4] ss:$16 sps:$4 sm:$0xff] (!%p461_p11)   ;;  %v2455_v18 = vld [vmem:[%s3123_s25 + $0xc] ss:$16 sps:$4 sm:$0xff] (!%p461_p11)   ;;  %v2457_v19 = vld [vmem:[%s3123_s25] ss:$16 sps:$4 sm:$0xff] (!%p461_p11)  }
  0x6e   : > { %737 = vmatprep.subr.bf16.mxu0 (!%p461_p11), %v2453_v17  ;;  %v2458_v20 = vld [vmem:[%s3123_s25 + $0x8] ss:$16 sps:$4 sm:$0xff] (!%p461_p11)   ;;  %790 = vmatprep.subr.bf16.mxu1 (!%p461_p11), %v2455_v18  ;;  %v2459_v21 = vld [vmem:[%s3123_s25 + $0x24] ss:$16 sps:$4 sm:$0xff] (!%p461_p11)   ;;  %v2461_v22 = vld [vmem:[%s3123_s25 + $0x2c] ss:$16 sps:$4 sm:$0xff] (!%p461_p11)  }
  0x6f   : > { %738 = vmatpush1.bf16.msra.mxu0 (!%p461_p11), %v2457_v19  ;;  %791 = vmatpush1.bf16.msra.mxu1 (!%p461_p11), %v2458_v20  ;;  %v2463_v23 = vld [vmem:[%s3123_s25 + $0x20] ss:$16 sps:$4 sm:$0xff] (!%p461_p11)   ;;  %v2464_v24 = vld [vmem:[%s3123_s25 + $0x28] ss:$16 sps:$4 sm:$0xff] (!%p461_p11)   ;;  %v2465_v25 = vld [vmem:[%s3123_s25 + $0x44] ss:$16 sps:$4 sm:$0xff] (!%p461_p11)  }
  0x70   : > { %739 = vmatprep.subr.bf16.mxu0 %v2459_v21  ;;  %792 = vmatprep.subr.bf16.mxu1 %v2461_v22  ;;  %v2467_v26 = vld [vmem:[%s3123_s25 + $0x4c] ss:$16 sps:$4 sm:$0xff]   ;;  %v2469_v27 = vld [vmem:[%s3123_s25 + $0x40] ss:$16 sps:$4 sm:$0xff]   ;;  %v2470_v28 = vld [vmem:[%s3123_s25 + $0x48] ss:$16 sps:$4 sm:$0xff]  }
  0x71   : > { %v2471_v29 = vld [vmem:[%s3123_s25 + $0x64] ss:$16 sps:$4 sm:$0xff]   ;;  %v2473_v30 = vld [vmem:[%s3123_s25 + $0x6c] ss:$16 sps:$4 sm:$0xff]   ;;  %v2475_v31 = vld [vmem:[%s3123_s25 + $0x60] ss:$16 sps:$4 sm:$0xff]  }
  0x72   : > { %v2476_v32 = vld [vmem:[%s3123_s25 + $0x68] ss:$16 sps:$4 sm:$0xff]   ;;  %v2477_v33 = vld [vmem:[%s3123_s25 + $0x84] ss:$16 sps:$4 sm:$0xff]   ;;  %v2479_v34 = vld [vmem:[%s3123_s25 + $0x8c] ss:$16 sps:$4 sm:$0xff]  }
  0x73   : > { %740 = vmatpush1.bf16.msra.mxu0 %v2463_v23  ;;  %793 = vmatpush1.bf16.msra.mxu1 %v2464_v24  ;;  %v2481_v35 = vld [vmem:[%s3123_s25 + $0x80] ss:$16 sps:$4 sm:$0xff]   ;;  %v2482_v36 = vld [vmem:[%s3123_s25 + $0x88] ss:$16 sps:$4 sm:$0xff]   ;;  %v2483_v37 = vld [vmem:[%s3123_s25 + $0xa4] ss:$16 sps:$4 sm:$0xff]  }
  0x74   : > { %741 = vmatprep.subr.bf16.mxu0 %v2465_v25  ;;  %794 = vmatprep.subr.bf16.mxu1 %v2467_v26  ;;  %v2485_v38 = vld [vmem:[%s3123_s25 + $0xac] ss:$16 sps:$4 sm:$0xff]   ;;  %v2487_v39 = vld [vmem:[%s3123_s25 + $0xa0] ss:$16 sps:$4 sm:$0xff]   ;;  %v2488_v40 = vld [vmem:[%s3123_s25 + $0xa8] ss:$16 sps:$4 sm:$0xff]  }
  0x75   : > { %v2489_v41 = vld [vmem:[%s3123_s25 + $0xc4] ss:$16 sps:$4 sm:$0xff]   ;;  %v2491_v42 = vld [vmem:[%s3123_s25 + $0xcc] ss:$16 sps:$4 sm:$0xff]   ;;  %v2493_v43 = vld [vmem:[%s3123_s25 + $0xc0] ss:$16 sps:$4 sm:$0xff]  }
  0x76   : > { %v2494_v44 = vld [vmem:[%s3123_s25 + $0xc8] ss:$16 sps:$4 sm:$0xff]   ;;  %v2495_v45 = vld [vmem:[%s3123_s25 + $0xe4] ss:$16 sps:$4 sm:$0xff]   ;;  %v2497_v46 = vld [vmem:[%s3123_s25 + $0xec] ss:$16 sps:$4 sm:$0xff]  }
  0x77   : > { %742 = vmatpush1.bf16.msra.mxu0 %v2469_v27  ;;  %795 = vmatpush1.bf16.msra.mxu1 %v2470_v28  ;;  %v2499_v47 = vld [vmem:[%s3123_s25 + $0xe0] ss:$16 sps:$4 sm:$0xff]   ;;  %v2500_v48 = vld [vmem:[%s3123_s25 + $0xe8] ss:$16 sps:$4 sm:$0xff]   ;;  %v2501_v49 = vld [vmem:[%s3123_s25 + $0x104] ss:$16 sps:$4 sm:$0xff]  }
  0x78   : > { %743 = vmatprep.subr.bf16.mxu0 %v2471_v29  ;;  %796 = vmatprep.subr.bf16.mxu1 %v2473_v30  ;;  %v2503_v50 = vld [vmem:[%s3123_s25 + $0x10c] ss:$16 sps:$4 sm:$0xff]   ;;  %v2505_v52 = vld [vmem:[%s3123_s25 + $0x100] ss:$16 sps:$4 sm:$0xff]   ;;  %v2506_v53 = vld [vmem:[%s3123_s25 + $0x108] ss:$16 sps:$4 sm:$0xff]  }
  0x79   : > { %v2512_v54 = vld [vmem:[%s3123_s25 + $0x124] ss:$16 sps:$4 sm:$0xff]   ;;  %v2515_v55 = vld [vmem:[%s3123_s25 + $0x12c] ss:$16 sps:$4 sm:$0xff]   ;;  %v2510_v57 = vld [vmem:[%s3123_s25 + $0x120] ss:$16 sps:$4 sm:$0xff]  }
  0x7a   : > { %v2513_v58 = vld [vmem:[%s3123_s25 + $0x128] ss:$16 sps:$4 sm:$0xff]   ;;  %v2518_v59 = vld [vmem:[%s3123_s25 + $0x144] ss:$16 sps:$4 sm:$0xff]   ;;  %v2521_v60 = vld [vmem:[%s3123_s25 + $0x14c] ss:$16 sps:$4 sm:$0xff]  }
  0x7b   : > { %744 = vmatpush1.bf16.msra.mxu0 %v2475_v31  ;;  %797 = vmatpush1.bf16.msra.mxu1 %v2476_v32  ;;  %v2516_v62 = vld [vmem:[%s3123_s25 + $0x140] ss:$16 sps:$4 sm:$0xff]   ;;  %v2519_v63 = vld [vmem:[%s3123_s25 + $0x148] ss:$16 sps:$4 sm:$0xff]   ;;  %v2524_v0 = vld [vmem:[%s3123_s25 + $0x164] ss:$16 sps:$4 sm:$0xff]  }
  0x7c   : > { %745 = vmatprep.subr.bf16.mxu0 %v2477_v33  ;;  %798 = vmatprep.subr.bf16.mxu1 %v2479_v34  ;;  %v2527_v1 = vld [vmem:[%s3123_s25 + $0x16c] ss:$16 sps:$4 sm:$0xff]   ;;  %v2522_v3 = vld [vmem:[%s3123_s25 + $0x160] ss:$16 sps:$4 sm:$0xff]   ;;  %v2525_v4 = vld [vmem:[%s3123_s25 + $0x168] ss:$16 sps:$4 sm:$0xff]  }
  0x7d   : > { %v2530_v5 = vld [vmem:[%s3123_s25 + $0x184] ss:$16 sps:$4 sm:$0xff]   ;;  %v2533_v6 = vld [vmem:[%s3123_s25 + $0x18c] ss:$16 sps:$4 sm:$0xff]   ;;  %v2528_v7 = vld [vmem:[%s3123_s25 + $0x180] ss:$16 sps:$4 sm:$0xff]  }
  0x7e   : > { %v2531_v8 = vld [vmem:[%s3123_s25 + $0x188] ss:$16 sps:$4 sm:$0xff]   ;;  %v2536_v9 = vld [vmem:[%s3123_s25 + $0x1a4] ss:$16 sps:$4 sm:$0xff]   ;;  %v2539_v10 = vld [vmem:[%s3123_s25 + $0x1ac] ss:$16 sps:$4 sm:$0xff]  }
  0x7f   : > { %746 = vmatpush1.bf16.msra.mxu0 %v2481_v35  ;;  %799 = vmatpush1.bf16.msra.mxu1 %v2482_v36  ;;  %v2534_v11 = vld [vmem:[%s3123_s25 + $0x1a0] ss:$16 sps:$4 sm:$0xff]   ;;  %v2537_v12 = vld [vmem:[%s3123_s25 + $0x1a8] ss:$16 sps:$4 sm:$0xff]   ;;  %v2542_v13 = vld [vmem:[%s3123_s25 + $0x1c4] ss:$16 sps:$4 sm:$0xff]  }
  0x80   : > { %747 = vmatprep.subr.bf16.mxu0 %v2483_v37  ;;  %800 = vmatprep.subr.bf16.mxu1 %v2485_v38  ;;  %v2545_v14 = vld [vmem:[%s3123_s25 + $0x1cc] ss:$16 sps:$4 sm:$0xff]   ;;  %v2540_v15 = vld [vmem:[%s3123_s25 + $0x1c0] ss:$16 sps:$4 sm:$0xff]   ;;  %v2543_v17 = vld [vmem:[%s3123_s25 + $0x1c8] ss:$16 sps:$4 sm:$0xff]  }
  0x81   : > { %v2548_v18 = vld [vmem:[%s3123_s25 + $0x1e4] ss:$16 sps:$4 sm:$0xff]   ;;  %v2551_v19 = vld [vmem:[%s3123_s25 + $0x1ec] ss:$16 sps:$4 sm:$0xff]   ;;  %v2546_v20 = vld [vmem:[%s3123_s25 + $0x1e0] ss:$16 sps:$4 sm:$0xff]  }
  0x82   : > { %v2549_v21 = vld [vmem:[%s3123_s25 + $0x1e8] ss:$16 sps:$4 sm:$0xff]   ;;  %v2557_v22 = vld [vmem:[%s3123_s25 + $0x204] ss:$16 sps:$4 sm:$0xff]   ;;  %v2560_v23 = vld [vmem:[%s3123_s25 + $0x20c] ss:$16 sps:$4 sm:$0xff]  }
  0x83   : > { %748 = vmatpush1.bf16.msra.mxu0 %v2487_v39  ;;  %801 = vmatpush1.bf16.msra.mxu1 %v2488_v40  ;;  %v2555_v24 = vld [vmem:[%s3123_s25 + $0x200] ss:$16 sps:$4 sm:$0xff]   ;;  %v2558_v25 = vld [vmem:[%s3123_s25 + $0x208] ss:$16 sps:$4 sm:$0xff]   ;;  %v2563_v26 = vld [vmem:[%s3123_s25 + $0x224] ss:$16 sps:$4 sm:$0xff]  }
  0x84   : > { %749 = vmatprep.subr.bf16.mxu0 %v2489_v41  ;;  %802 = vmatprep.subr.bf16.mxu1 %v2491_v42  ;;  %v2566_v27 = vld [vmem:[%s3123_s25 + $0x22c] ss:$16 sps:$4 sm:$0xff]   ;;  %v2561_v28 = vld [vmem:[%s3123_s25 + $0x220] ss:$16 sps:$4 sm:$0xff]   ;;  %v2564_v29 = vld [vmem:[%s3123_s25 + $0x228] ss:$16 sps:$4 sm:$0xff]  }
  0x85   : > { %v2569_v30 = vld [vmem:[%s3123_s25 + $0x244] ss:$16 sps:$4 sm:$0xff]   ;;  %v2572_v31 = vld [vmem:[%s3123_s25 + $0x24c] ss:$16 sps:$4 sm:$0xff]   ;;  %v2567_v32 = vld [vmem:[%s3123_s25 + $0x240] ss:$16 sps:$4 sm:$0xff]  }
  0x86   : > { %v2570_v33 = vld [vmem:[%s3123_s25 + $0x248] ss:$16 sps:$4 sm:$0xff]   ;;  %v2575_v34 = vld [vmem:[%s3123_s25 + $0x264] ss:$16 sps:$4 sm:$0xff]   ;;  %v2578_v35 = vld [vmem:[%s3123_s25 + $0x26c] ss:$16 sps:$4 sm:$0xff]  }
  0x87   : > { %750 = vmatpush1.bf16.msra.mxu0 %v2493_v43  ;;  %803 = vmatpush1.bf16.msra.mxu1 %v2494_v44  ;;  %v2573_v36 = vld [vmem:[%s3123_s25 + $0x260] ss:$16 sps:$4 sm:$0xff]   ;;  %v2576_v37 = vld [vmem:[%s3123_s25 + $0x268] ss:$16 sps:$4 sm:$0xff]   ;;  %v2581_v38 = vld [vmem:[%s3123_s25 + $0x284] ss:$16 sps:$4 sm:$0xff]  }
  0x88   : > { %751 = vmatprep.subr.bf16.mxu0 %v2495_v45  ;;  %804 = vmatprep.subr.bf16.mxu1 %v2497_v46  ;;  %v2584_v39 = vld [vmem:[%s3123_s25 + $0x28c] ss:$16 sps:$4 sm:$0xff]   ;;  %v2579_v40 = vld [vmem:[%s3123_s25 + $0x280] ss:$16 sps:$4 sm:$0xff]   ;;  %v2582_v41 = vld [vmem:[%s3123_s25 + $0x288] ss:$16 sps:$4 sm:$0xff]  }
  0x89   : > { %v2587_v42 = vld [vmem:[%s3123_s25 + $0x2a4] ss:$16 sps:$4 sm:$0xff]   ;;  %v2590_v43 = vld [vmem:[%s3123_s25 + $0x2ac] ss:$16 sps:$4 sm:$0xff]   ;;  %v2585_v44 = vld [vmem:[%s3123_s25 + $0x2a0] ss:$16 sps:$4 sm:$0xff]  }
  0x8a   : > { %v2588_v45 = vld [vmem:[%s3123_s25 + $0x2a8] ss:$16 sps:$4 sm:$0xff]   ;;  %v2593_v46 = vld [vmem:[%s3123_s25 + $0x2c4] ss:$16 sps:$4 sm:$0xff]   ;;  %v2602_v51 = vld [vmem:[%s3123_s25 + $0x2ec] ss:$16 sps:$4 sm:$0xff]  }
  0x8b   : > { %752 = vmatpush1.bf16.msra.mxu0 %v2499_v47  ;;  %805 = vmatpush1.bf16.msra.mxu1 %v2500_v48  ;;  %v2596_v47 = vld [vmem:[%s3123_s25 + $0x2cc] ss:$16 sps:$4 sm:$0xff]   ;;  %v2591_v48 = vld [vmem:[%s3123_s25 + $0x2c0] ss:$16 sps:$4 sm:$0xff]   ;;  %s2393_s26 = smul.u32 (%p2800_p6), 48, %s2717_s15 }
  0x8c   : > { %753 = vmatprep.subr.bf16.mxu0 %v2501_v49  ;;  %806 = vmatprep.subr.bf16.mxu1 %v2503_v50  ;;  %v2594_v49 = vld [vmem:[%s3123_s25 + $0x2c8] ss:$16 sps:$4 sm:$0xff]   ;;  %v2599_v50 = vld [vmem:[%s3123_s25 + $0x2e4] ss:$16 sps:$4 sm:$0xff]  }
  0x8f   : > { %754 = vmatpush1.bf16.msra.mxu0 %v2505_v52  ;;  %807 = vmatpush1.bf16.msra.mxu1 %v2506_v53  ;;  %v2597_v52 = vld [vmem:[%s3123_s25 + $0x2e0] ss:$16 sps:$4 sm:$0xff]   ;;  %v2600_v53 = vld [vmem:[%s3123_s25 + $0x2e8] ss:$16 sps:$4 sm:$0xff]  }
  0x90   : > { %1060 = vmatprep.subr.bf16.mxu0 %v2512_v54  ;;  %1113 = vmatprep.subr.bf16.mxu1 %v2515_v55  ;;  %v2605_v54 = vld [vmem:[%s3123_s25 + $0x304] ss:$16 sps:$4 sm:$0xff]   ;;  %v2608_v55 = vld [vmem:[%s3123_s25 + $0x30c] ss:$16 sps:$4 sm:$0xff]  }
  0x92   : > { %770 = vmatmul.mubr.bf16.vlgmr.msra.gmra.mrb[0].mxu0 %v3166_v56  ;;  %823 = vmatmul.mubr.bf16.vlgmr.msra.gmra.mrb[0].mxu1 %v3166_v56 }
  0x93   : > { %1061 = vmatpush1.bf16.msra.mxu0 %v2510_v57  ;;  %1114 = vmatpush1.bf16.msra.mxu1 %v2513_v58  ;;  %v2603_v57 = vld [vmem:[%s3123_s25 + $0x300] ss:$16 sps:$4 sm:$0xff]   ;;  %v2606_v58 = vld [vmem:[%s3123_s25 + $0x308] ss:$16 sps:$4 sm:$0xff]  }
  0x94   : > { %1062 = vmatprep.subr.bf16.mxu0 %v2518_v59  ;;  %1115 = vmatprep.subr.bf16.mxu1 %v2521_v60  ;;  %v1860_v59 = vld [vmem:[%s3426_s2] sm:$0xff]  ;;  %v1862_v60 = vld [vmem:[%s3426_s2 + $0x10] sm:$0xff] }
  0x95   : > { %2138 = vmatprep.mubr.msk.bf16.mxu0 %vm730_vm0, %v3175_v61  ;;  %2140 = vmatprep.mubr.msk.bf16.mxu1 %vm730_vm0, %v3175_v61 }
  0x96   : > { %1866 = vperm.xlu0 %2451, %v1860_v59   ;;  %1876 = vperm.xlu1 %2452, %v1862_v60  }
  0x97   : > { %1063 = vmatpush1.bf16.msra.mxu0 %v2516_v62  ;;  %1116 = vmatpush1.bf16.msra.mxu1 %v2519_v63  ;;  %v2611_v62 = vld [vmem:[%s3123_s25 + $0x324] ss:$16 sps:$4 sm:$0xff]   ;;  %v2614_v63 = vld [vmem:[%s3123_s25 + $0x32c] ss:$16 sps:$4 sm:$0xff]  }
  0x98   : > { %1064 = vmatprep.subr.bf16.mxu0 %v2524_v0  ;;  %1117 = vmatprep.subr.bf16.mxu1 %v2527_v1  ;;  %v1861_v0 = vld [vmem:[%s3426_s2 + $0x8] sm:$0xff]  ;;  %v1863_v1 = vld [vmem:[%s3426_s2 + $0x18] sm:$0xff] }
  0x9a   : > { %780 = vmatmul.mubr.bf16.gmra.mrb[4].mxu0 %v3190_v2  ;;  %833 = vmatmul.mubr.bf16.gmra.mrb[4].mxu1 %v3190_v2 }
  0x9b   : > { %1065 = vmatpush1.bf16.msra.mxu0 %v2522_v3  ;;  %1118 = vmatpush1.bf16.msra.mxu1 %v2525_v4  ;;  %v2609_v3 = vld [vmem:[%s3123_s25 + $0x320] ss:$16 sps:$4 sm:$0xff]   ;;  %v2612_v4 = vld [vmem:[%s3123_s25 + $0x328] ss:$16 sps:$4 sm:$0xff]  }
  0x9c   : > { %1066 = vmatprep.subr.bf16.mxu0 %v2530_v5  ;;  %1119 = vmatprep.subr.bf16.mxu1 %v2533_v6  ;;  %v2617_v5 = vld [vmem:[%s3123_s25 + $0x344] ss:$16 sps:$4 sm:$0xff]   ;;  %v2620_v6 = vld [vmem:[%s3123_s25 + $0x34c] ss:$16 sps:$4 sm:$0xff]  }
  0x9d   : > { %2213 = vmatprep.mubr.msk.bf16.mxu0 %vm730_vm0, %v3115_v16  ;;  %2215 = vmatprep.mubr.msk.bf16.mxu1 %vm730_vm0, %v3115_v16 }
  0x9e   : > { %1871 = vperm.xlu0 %2451, %v1861_v0   ;;  %1881 = vperm.xlu1 %2452, %v1863_v1  }
  0x9f   : > { %1067 = vmatpush1.bf16.msra.mxu0 %v2528_v7  ;;  %1120 = vmatpush1.bf16.msra.mxu1 %v2531_v8  ;;  %v2615_v7 = vld [vmem:[%s3123_s25 + $0x340] ss:$16 sps:$4 sm:$0xff]   ;;  %v2618_v8 = vld [vmem:[%s3123_s25 + $0x348] ss:$16 sps:$4 sm:$0xff]  }
  0xa0   : > { %1068 = vmatprep.subr.bf16.mxu0 %v2536_v9  ;;  %1121 = vmatprep.subr.bf16.mxu1 %v2539_v10  ;;  %v2623_v9 = vld [vmem:[%s3123_s25 + $0x364] ss:$16 sps:$4 sm:$0xff]   ;;  %v2626_v10 = vld [vmem:[%s3123_s25 + $0x36c] ss:$16 sps:$4 sm:$0xff]  }
  0xa3   : > { %1069 = vmatpush1.bf16.msra.mxu0 %v2534_v11  ;;  %1122 = vmatpush1.bf16.msra.mxu1 %v2537_v12  ;;  %v2621_v11 = vld [vmem:[%s3123_s25 + $0x360] ss:$16 sps:$4 sm:$0xff]   ;;  %v2624_v12 = vld [vmem:[%s3123_s25 + $0x368] ss:$16 sps:$4 sm:$0xff]  }
  0xa4   : > { %1070 = vmatprep.subr.bf16.mxu0 %v2542_v13  ;;  %1123 = vmatprep.subr.bf16.mxu1 %v2545_v14  ;;  %v2629_v13 = vld [vmem:[%s3123_s25 + $0x384] ss:$16 sps:$4 sm:$0xff]   ;;  %v2632_v14 = vld [vmem:[%s3123_s25 + $0x38c] ss:$16 sps:$4 sm:$0xff]  }
  0xa7   : > { %1071 = vmatpush1.bf16.msra.mxu0 %v2540_v15  ;;  %1124 = vmatpush1.bf16.msra.mxu1 %v2543_v17  ;;  %v2627_v15 = vld [vmem:[%s3123_s25 + $0x380] ss:$16 sps:$4 sm:$0xff]   ;;  %v2630_v17 = vld [vmem:[%s3123_s25 + $0x388] ss:$16 sps:$4 sm:$0xff]  }
  0xa8   : > { %1072 = vmatprep.subr.bf16.mxu0 %v2548_v18  ;;  %1125 = vmatprep.subr.bf16.mxu1 %v2551_v19  ;;  %v2635_v18 = vld [vmem:[%s3123_s25 + $0x3a4] ss:$16 sps:$4 sm:$0xff]   ;;  %v2638_v19 = vld [vmem:[%s3123_s25 + $0x3ac] ss:$16 sps:$4 sm:$0xff]  }
  0xab   : > { %1073 = vmatpush1.bf16.msra.mxu0 %v2546_v20  ;;  %1126 = vmatpush1.bf16.msra.mxu1 %v2549_v21  ;;  %v2633_v20 = vld [vmem:[%s3123_s25 + $0x3a0] ss:$16 sps:$4 sm:$0xff]   ;;  %v2636_v21 = vld [vmem:[%s3123_s25 + $0x3a8] ss:$16 sps:$4 sm:$0xff]  }
  0xac   : > { %1074 = vmatprep.subr.bf16.mxu0 %v2557_v22  ;;  %1127 = vmatprep.subr.bf16.mxu1 %v2560_v23  ;;  %v2641_v22 = vld [vmem:[%s3123_s25 + $0x3c4] ss:$16 sps:$4 sm:$0xff]   ;;  %v2644_v23 = vld [vmem:[%s3123_s25 + $0x3cc] ss:$16 sps:$4 sm:$0xff]  }
  0xaf   : > { %1075 = vmatpush1.bf16.msra.mxu0 %v2555_v24  ;;  %1128 = vmatpush1.bf16.msra.mxu1 %v2558_v25  ;;  %v2639_v24 = vld [vmem:[%s3123_s25 + $0x3c0] ss:$16 sps:$4 sm:$0xff]   ;;  %v2642_v25 = vld [vmem:[%s3123_s25 + $0x3c8] ss:$16 sps:$4 sm:$0xff]  }
  0xb0   : > { %1076 = vmatprep.subr.bf16.mxu0 %v2563_v26  ;;  %1129 = vmatprep.subr.bf16.mxu1 %v2566_v27  ;;  %v2647_v26 = vld [vmem:[%s3123_s25 + $0x3e4] ss:$16 sps:$4 sm:$0xff]   ;;  %v2650_v27 = vld [vmem:[%s3123_s25 + $0x3ec] ss:$16 sps:$4 sm:$0xff]  }
  0xb3   : > { %1077 = vmatpush1.bf16.msra.mxu0 %v2561_v28  ;;  %1130 = vmatpush1.bf16.msra.mxu1 %v2564_v29  ;;  %v2645_v28 = vld [vmem:[%s3123_s25 + $0x3e0] ss:$16 sps:$4 sm:$0xff]   ;;  %v2648_v29 = vld [vmem:[%s3123_s25 + $0x3e8] ss:$16 sps:$4 sm:$0xff]  }
  0xb4   : > { %1399 = vmatprep.subr.bf16.mxu0 %v2569_v30  ;;  %1452 = vmatprep.subr.bf16.mxu1 %v2572_v31  ;;  %v2653_v30 = vld [vmem:[%s3123_s25 + $0x404] ss:$16 sps:$4 sm:$0xff]   ;;  %v2656_v31 = vld [vmem:[%s3123_s25 + $0x40c] ss:$16 sps:$4 sm:$0xff]  }
  0xb6   : > { %1093 = vmatmul.mubr.bf16.vlgmr.msra.gmra.mrb[8].mxu0 %v3166_v56  ;;  %1146 = vmatmul.mubr.bf16.vlgmr.msra.gmra.mrb[8].mxu1 %v3166_v56 }
  0xb7   : > { %1400 = vmatpush1.bf16.msra.mxu0 %v2567_v32  ;;  %1453 = vmatpush1.bf16.msra.mxu1 %v2570_v33  ;;  %v2651_v32 = vld [vmem:[%s3123_s25 + $0x400] ss:$16 sps:$4 sm:$0xff]   ;;  %v2654_v33 = vld [vmem:[%s3123_s25 + $0x408] ss:$16 sps:$4 sm:$0xff]  }
  0xb8   : > { %1401 = vmatprep.subr.bf16.mxu0 %v2575_v34  ;;  %1454 = vmatprep.subr.bf16.mxu1 %v2578_v35  ;;  %v2662_v34 = vld [vmem:[%s3123_s25 + $0x42c] ss:$16 sps:$4 sm:$0xff]   ;;  %v2657_v35 = vld [vmem:[%s3123_s25 + $0x420] ss:$16 sps:$4 sm:$0xff]  }
  0xb9   : > { %2214 = vmatprep.mubr.msk.bf16.mxu0 %vm730_vm0, %v3175_v61  ;;  %2216 = vmatprep.mubr.msk.bf16.mxu1 %vm730_vm0, %v3175_v61 }
  0xbb   : > { %1402 = vmatpush1.bf16.msra.mxu0 %v2573_v36  ;;  %1455 = vmatpush1.bf16.msra.mxu1 %v2576_v37  ;;  %v2660_v36 = vld [vmem:[%s3123_s25 + $0x428] ss:$16 sps:$4 sm:$0xff]   ;;  %v2665_v37 = vld [vmem:[%s3123_s25 + $0x444] ss:$16 sps:$4 sm:$0xff]  }
  0xbc   : > { %1403 = vmatprep.subr.bf16.mxu0 %v2581_v38  ;;  %1456 = vmatprep.subr.bf16.mxu1 %v2584_v39  ;;  %v2668_v38 = vld [vmem:[%s3123_s25 + $0x44c] ss:$16 sps:$4 sm:$0xff]   ;;  %v2663_v39 = vld [vmem:[%s3123_s25 + $0x440] ss:$16 sps:$4 sm:$0xff]  }
  0xbe   : > { %1103 = vmatmul.mubr.bf16.gmra.mrb[12].mxu0 %v3190_v2  ;;  %1156 = vmatmul.mubr.bf16.gmra.mrb[12].mxu1 %v3190_v2 }
  0xbf   : > { %1404 = vmatpush1.bf16.msra.mxu0 %v2579_v40  ;;  %1457 = vmatpush1.bf16.msra.mxu1 %v2582_v41  ;;  %v2666_v40 = vld [vmem:[%s3123_s25 + $0x448] ss:$16 sps:$4 sm:$0xff]   ;;  %v2671_v41 = vld [vmem:[%s3123_s25 + $0x464] ss:$16 sps:$4 sm:$0xff]  }
  0xc0   : > { %1405 = vmatprep.subr.bf16.mxu0 %v2587_v42  ;;  %1458 = vmatprep.subr.bf16.mxu1 %v2590_v43  ;;  %v2674_v42 = vld [vmem:[%s3123_s25 + $0x46c] ss:$16 sps:$4 sm:$0xff]   ;;  %v2669_v43 = vld [vmem:[%s3123_s25 + $0x460] ss:$16 sps:$4 sm:$0xff]  }
  0xc1   : > { %2289 = vmatprep.mubr.msk.bf16.mxu0 %vm730_vm0, %v3115_v16  ;;  %2291 = vmatprep.mubr.msk.bf16.mxu1 %vm730_vm0, %v3115_v16 }
  0xc3   : > { %1406 = vmatpush1.bf16.msra.mxu0 %v2585_v44  ;;  %1459 = vmatpush1.bf16.msra.mxu1 %v2588_v45  ;;  %v2672_v44 = vld [vmem:[%s3123_s25 + $0x468] ss:$16 sps:$4 sm:$0xff]  }
  0xc4   : > { %1407 = vmatprep.subr.bf16.mxu0 %v2593_v46  ;;  %1460 = vmatprep.subr.bf16.mxu1 %v2596_v47 }
  0xc7   : > { %1408 = vmatpush1.bf16.msra.mxu0 %v2591_v48  ;;  %1461 = vmatpush1.bf16.msra.mxu1 %v2594_v49 }
  0xc8   : > { %1409 = vmatprep.subr.bf16.mxu0 %v2599_v50  ;;  %1462 = vmatprep.subr.bf16.mxu1 %v2602_v51 }
  0xcb   : > { %1410 = vmatpush1.bf16.msra.mxu0 %v2597_v52  ;;  %1463 = vmatpush1.bf16.msra.mxu1 %v2600_v53 }
  0xcc   : > { %1411 = vmatprep.subr.bf16.mxu0 %v2605_v54  ;;  %1464 = vmatprep.subr.bf16.mxu1 %v2608_v55 }
  0xcf   : > { %1412 = vmatpush1.bf16.msra.mxu0 %v2603_v57  ;;  %1465 = vmatpush1.bf16.msra.mxu1 %v2606_v58 }
  0xd0   : > { %1413 = vmatprep.subr.bf16.mxu0 %v2611_v62  ;;  %1466 = vmatprep.subr.bf16.mxu1 %v2614_v63 }
  0xd3   : > { %1414 = vmatpush1.bf16.msra.mxu0 %v2609_v3  ;;  %1467 = vmatpush1.bf16.msra.mxu1 %v2612_v4 }
  0xd4   : > { %1415 = vmatprep.subr.bf16.mxu0 %v2617_v5  ;;  %1468 = vmatprep.subr.bf16.mxu1 %v2620_v6 }
  0xd7   : > { %1416 = vmatpush1.bf16.msra.mxu0 %v2615_v7  ;;  %1469 = vmatpush1.bf16.msra.mxu1 %v2618_v8 }
  0xd8   : > { %1738 = vmatprep.subr.bf16.mxu0 %v2623_v9  ;;  %1791 = vmatprep.subr.bf16.mxu1 %v2626_v10 }
  0xda   : > { %1432 = vmatmul.mubr.bf16.vlgmr.msra.gmra.mrb[16].mxu0 %v3166_v56  ;;  %1485 = vmatmul.mubr.bf16.vlgmr.msra.gmra.mrb[16].mxu1 %v3166_v56 }
  0xdb   : > { %1739 = vmatpush1.bf16.msra.mxu0 %v2621_v11  ;;  %1792 = vmatpush1.bf16.msra.mxu1 %v2624_v12 }
  0xdc   : > { %1740 = vmatprep.subr.bf16.mxu0 %v2629_v13  ;;  %1793 = vmatprep.subr.bf16.mxu1 %v2632_v14 }
  0xdd   : > { %2290 = vmatprep.mubr.msk.bf16.mxu0 %vm730_vm0, %v3175_v61  ;;  %2292 = vmatprep.mubr.msk.bf16.mxu1 %vm730_vm0, %v3175_v61 }
  0xdf   : > { %1741 = vmatpush1.bf16.msra.mxu0 %v2627_v15  ;;  %1794 = vmatpush1.bf16.msra.mxu1 %v2630_v17 }
  0xe0   : > { %1742 = vmatprep.subr.bf16.mxu0 %v2635_v18  ;;  %1795 = vmatprep.subr.bf16.mxu1 %v2638_v19 }
  0xe2   : > { %1442 = vmatmul.mubr.bf16.gmra.mrb[20].mxu0 %v3190_v2  ;;  %1495 = vmatmul.mubr.bf16.gmra.mrb[20].mxu1 %v3190_v2 }
  0xe3   : > { %1743 = vmatpush1.bf16.msra.mxu0 %v2633_v20  ;;  %1796 = vmatpush1.bf16.msra.mxu1 %v2636_v21 }
  0xe4   : > { %1744 = vmatprep.subr.bf16.mxu0 %v2641_v22  ;;  %1797 = vmatprep.subr.bf16.mxu1 %v2644_v23 }
  0xe5   : > { %2365 = vmatprep.mubr.msk.bf16.mxu0 %vm730_vm0, %v3115_v16  ;;  %2367 = vmatprep.mubr.msk.bf16.mxu1 %vm730_vm0, %v3115_v16  ;;  %v2659_v16 = vld [vmem:[%s3123_s25 + $0x424] ss:$16 sps:$4 sm:$0xff]   ;;  %s2096_s25 = sshll.u32 %s467_s11, 6  ;;  %s2378_s11 = sshll.u32 (%p2800_p6), %s2713_s14, 2 }
  0xe6   : > { %s3372_s12 = scalar_lea.vmem [#allocation3], %s2096_s25  ;;  %s1981_s28 = sadd.s32 (%p2800_p6), %s2393_s26, %s2378_s11 }
  0xe7   : > { %1745 = vmatpush1.bf16.msra.mxu0 %v2639_v24  ;;  %1798 = vmatpush1.bf16.msra.mxu1 %v2642_v25  ;;  %s2379_s23 = sshll.u32 (%p2800_p6), %s1981_s28, 2 }
  0xe8   : > { %1746 = vmatprep.subr.bf16.mxu0 %v2647_v26  ;;  %1799 = vmatprep.subr.bf16.mxu1 %v2650_v27  ;;  %s1983_s4 = scalar_lea.vmem (%p2800_p6), %s3427_s3, %s2379_s23 }
  0xeb   : > { %1747 = vmatpush1.bf16.msra.mxu0 %v2645_v28  ;;  %1800 = vmatpush1.bf16.msra.mxu1 %v2648_v29 }
  0xec   : > { %1748 = vmatprep.subr.bf16.mxu0 %v2653_v30  ;;  %1801 = vmatprep.subr.bf16.mxu1 %v2656_v31 }
  0xef   : > { %1749 = vmatpush1.bf16.msra.mxu0 %v2651_v32  ;;  %1802 = vmatpush1.bf16.msra.mxu1 %v2654_v33 }
  0xf0   : > { %1750 = vmatprep.subr.bf16.mxu0 %v2659_v16  ;;  %1803 = vmatprep.subr.bf16.mxu1 %v2662_v34 }
  0xf3   : > { %1751 = vmatpush1.bf16.msra.mxu0 %v2657_v35  ;;  %1804 = vmatpush1.bf16.msra.mxu1 %v2660_v36 }
  0xf4   : > { %1752 = vmatprep.subr.bf16.mxu0 %v2665_v37  ;;  %1805 = vmatprep.subr.bf16.mxu1 %v2668_v38 }
  0xf7   : > { %1753 = vmatpush1.bf16.msra.mxu0 %v2663_v39  ;;  %1806 = vmatpush1.bf16.msra.mxu1 %v2666_v40 }
  0xf8   : > { %1754 = vmatprep.subr.bf16.mxu0 %v2671_v41  ;;  %1807 = vmatprep.subr.bf16.mxu1 %v2674_v42 }
  0xfb   : > { %1755 = vmatpush1.bf16.msra.mxu0 %v2669_v43  ;;  %1808 = vmatpush1.bf16.msra.mxu1 %v2672_v44 }
  0xfe   : > { %1771 = vmatmul.mubr.bf16.vlgmr.msra.gmra.mrb[24].mxu0 %v3166_v56  ;;  %1824 = vmatmul.mubr.bf16.vlgmr.msra.gmra.mrb[24].mxu1 %v3166_v56 }
  0xff   : > { %2366 = vmatprep.mubr.msk.bf16.mxu0 %vm730_vm0, %v3175_v61  ;;  %2368 = vmatprep.mubr.msk.bf16.mxu1 %vm730_vm0, %v3175_v61 }
 0x106   : > { %1781 = vmatmul.mubr.bf16.gmra.mrb[28].mxu0 %v3190_v2  ;;  %1834 = vmatmul.mubr.bf16.gmra.mrb[28].mxu1 %v3190_v2 }
 0x165   : > { %v771_v45 = vpop.f32.mrb[0].mxu0  ;;  %v824_v46 = vpop.f32.mrb[0].mxu1 }
 0x166   : > { %v773_v47 = vpop.f32.mrb[1].mxu0  ;;  %v826_v48 = vpop.f32.mrb[1].mxu1 }
 0x167   : > { %v775_v49 = vpop.f32.mrb[2].mxu0  ;;  %v828_v50 = vpop.f32.mrb[2].mxu1 }
 0x168   : > { %v777_v51 = vpop.f32.mrb[3].mxu0  ;;  %v830_v52 = vpop.f32.mrb[3].mxu1 }
 0x16d   : > { %v781_v53 = vpop.f32.mrb[4].mxu0  ;;  %v834_v56 = vpop.f32.mrb[4].mxu1 }
 0x16e   : > { %v783_v54 = vpop.f32.mrb[5].mxu0  ;;  %v836_v55 = vpop.f32.mrb[5].mxu1 }
 0x16f   : > { %v3340_v57 = vpop.f32.mrb[6].mxu0  ;;  %v3342_v58 = vpop.f32.mrb[6].mxu1 }
 0x170   : > { %v3344_v61 = vpop.f32.mrb[7].mxu0  ;;  %v3346_v59 = vpop.f32.mrb[7].mxu1 }
 0x189   : > { %v1094_v2 = vpop.f32.mrb[8].mxu0  ;;  %v1147_v60 = vpop.f32.mrb[8].mxu1 }
 0x18a   : > { %v1166_v62 = vmax.f32 %v771_v45, %v1094_v2  ;;  %v1168_v63 = vmax.f32 %v824_v46, %v1147_v60  ;;  %v1096_v0 = vpop.f32.mrb[9].mxu0  ;;  %v1149_v1 = vpop.f32.mrb[9].mxu1 }
 0x18b   : > { %v1167_v3 = vmax.f32 %v773_v47, %v1096_v0  ;;  %v1169_v4 = vmax.f32 %v826_v48, %v1149_v1  ;;  %v1098_v5 = vpop.f32.mrb[10].mxu0  ;;  %v1151_v6 = vpop.f32.mrb[10].mxu1 }
 0x18c   : > { %v1170_v7 = vmax.f32 %v775_v49, %v1098_v5  ;;  %v1172_v8 = vmax.f32 %v828_v50, %v1151_v6  ;;  %v1100_v9 = vpop.f32.mrb[11].mxu0  ;;  %v1153_v10 = vpop.f32.mrb[11].mxu1 }
 0x18d   : > { %v1171_v11 = vmax.f32 %v777_v51, %v1100_v9  ;;  %v1173_v12 = vmax.f32 %v830_v52, %v1153_v10  ;;  %v1867_v2 = vpop.permute.xlu0 %1866 }
 0x191   : > { %v1104_v13 = vpop.f32.mrb[12].mxu0  ;;  %v1157_v14 = vpop.f32.mrb[12].mxu1 }
 0x192   : > { %v1174_v15 = vmax.f32 %v781_v53, %v1104_v13  ;;  %v1176_v17 = vmax.f32 %v834_v56, %v1157_v14  ;;  %v1106_v18 = vpop.f32.mrb[13].mxu0  ;;  %v1159_v19 = vpop.f32.mrb[13].mxu1 }
 0x193   : > { %v1175_v20 = vmax.f32 %v783_v54, %v1106_v18  ;;  %v1177_v21 = vmax.f32 %v836_v55, %v1159_v19  ;;  %v1108_v22 = vpop.f32.mrb[14].mxu0  ;;  %v1161_v23 = vpop.f32.mrb[14].mxu1 }
 0x194   : > { %v1178_v24 = vmax.f32 %v3340_v57, %v1108_v22  ;;  %v1180_v25 = vmax.f32 %v3342_v58, %v1161_v23  ;;  %v1110_v26 = vpop.f32.mrb[15].mxu0  ;;  %v1163_v27 = vpop.f32.mrb[15].mxu1 }
 0x195   : > { %v1179_v28 = vmax.f32 %v3344_v61, %v1110_v26  ;;  %v1181_v29 = vmax.f32 %v3346_v59, %v1163_v27  ;;  %v1872_v60 = vpop.permute.xlu0 %1871 }
 0x1ad   : > { %v1433_v30 = vpop.f32.mrb[16].mxu0  ;;  %v1486_v31 = vpop.f32.mrb[16].mxu1 }
 0x1ae   : > { %v1505_v32 = vmax.f32 %v1166_v62, %v1433_v30  ;;  %v1507_v33 = vmax.f32 %v1168_v63, %v1486_v31  ;;  %v1435_v16 = vpop.f32.mrb[17].mxu0  ;;  %v1488_v34 = vpop.f32.mrb[17].mxu1 }
 0x1af   : > { %v1506_v35 = vmax.f32 %v1167_v3, %v1435_v16  ;;  %v1508_v36 = vmax.f32 %v1169_v4, %v1488_v34  ;;  %v1437_v37 = vpop.f32.mrb[18].mxu0  ;;  %v1490_v38 = vpop.f32.mrb[18].mxu1 }
 0x1b0   : > { %v1509_v39 = vmax.f32 %v1170_v7, %v1437_v37  ;;  %v1511_v40 = vmax.f32 %v1172_v8, %v1490_v38  ;;  %v1439_v41 = vpop.f32.mrb[19].mxu0  ;;  %v1492_v42 = vpop.f32.mrb[19].mxu1 }
 0x1b1   : > { %v1510_v43 = vmax.f32 %v1171_v11, %v1439_v41  ;;  %v1512_v44 = vmax.f32 %v1173_v12, %v1492_v42 }
 0x1b5   : > { %v1443_v45 = vpop.f32.mrb[20].mxu0  ;;  %v1496_v46 = vpop.f32.mrb[20].mxu1 }
 0x1b6   : > { %v3352_v47 = vmax.f32 %v1174_v15, %v1443_v45  ;;  %v3354_v48 = vmax.f32 %v1176_v17, %v1496_v46  ;;  %v1445_v49 = vpop.f32.mrb[21].mxu0  ;;  %v1498_v50 = vpop.f32.mrb[21].mxu1 }
 0x1b7   : > { %v3356_v51 = vmax.f32 %v1175_v20, %v1445_v49  ;;  %v3358_v52 = vmax.f32 %v1177_v21, %v1498_v50  ;;  %v1447_v53 = vpop.f32.mrb[22].mxu0  ;;  %v1500_v56 = vpop.f32.mrb[22].mxu1 }
 0x1b8   : > { %v3360_v54 = vmax.f32 %v1178_v24, %v1447_v53  ;;  %v3362_v55 = vmax.f32 %v1180_v25, %v1500_v56  ;;  %v1449_v57 = vpop.f32.mrb[23].mxu0  ;;  %v1502_v58 = vpop.f32.mrb[23].mxu1 }
 0x1b9   : > { %v3364_v61 = vmax.f32 %v1179_v28, %v1449_v57  ;;  %v3366_v59 = vmax.f32 %v1181_v29, %v1502_v58  ;;  %v1877_v28 = vpop.permute.xlu1 %1876 }
 0x1bd   : > { %v1882_v56 = vpop.permute.xlu1 %1881 }
 0x1d1   : > { %v1772_v62 = vpop.f32.mrb[24].mxu0  ;;  %v1825_v63 = vpop.f32.mrb[24].mxu1 }
 0x1d2   : > { %v1844_v0 = vmax.f32 %v1505_v32, %v1772_v62  ;;  %v1846_v1 = vmax.f32 %v1507_v33, %v1825_v63  ;;  %v1774_v3 = vpop.f32.mrb[25].mxu0  ;;  %v1827_v4 = vpop.f32.mrb[25].mxu1 }
 0x1d3   : > { %v1845_v5 = vmax.f32 %v1506_v35, %v1774_v3  ;;  %v1847_v6 = vmax.f32 %v1508_v36, %v1827_v4  ;;  %v1776_v7 = vpop.f32.mrb[26].mxu0  ;;  %v1829_v8 = vpop.f32.mrb[26].mxu1 }
 0x1d4   : > { %v1884_v9 = vadd.f32 %v1867_v2, %v1844_v0  ;;  %v1886_v10 = vadd.f32 %v1867_v2, %v1846_v1  ;;  %v1848_v11 = vmax.f32 %v1509_v39, %v1776_v7  ;;  %v1850_v12 = vmax.f32 %v1511_v40, %v1829_v8  ;;  %v1778_v13 = vpop.f32.mrb[27].mxu0  ;;  %v1831_v14 = vpop.f32.mrb[27].mxu1 }
 0x1d5   : > { %v1885_v15 = vadd.f32 %v1867_v2, %v1845_v5  ;;  %v1887_v17 = vadd.f32 %v1867_v2, %v1847_v6  ;;  %v1849_v18 = vmax.f32 %v1510_v43, %v1778_v13  ;;  %v1851_v19 = vmax.f32 %v1512_v44, %v1831_v14 }
 0x1d6   : > { %v1900_v20 = vmax.f32 %v1884_v9, 0.0  ;;  %v1902_v21 = vmax.f32 %v1886_v10, 0.0  ;;  %v1888_v22 = vadd.f32 %v1872_v60, %v1848_v11  ;;  %v1890_v23 = vadd.f32 %v1872_v60, %v1850_v12 }
 0x1d7   : > { %v1901_v24 = vmax.f32 %v1885_v15, 0.0  ;;  %v1903_v25 = vmax.f32 %v1887_v17, 0.0  ;;  %v1889_v26 = vadd.f32 %v1872_v60, %v1849_v18  ;;  %v1891_v27 = vadd.f32 %v1872_v60, %v1851_v19 }
 0x1d8   : > { %v1904_v29 = vmax.f32 %v1888_v22, 0.0  ;;  %v1906_v30 = vmax.f32 %v1890_v23, 0.0 }
 0x1d9   : > { %v2382_v31 = vpack.c.bf16 %v1901_v24, %v1900_v20  ;;  %v2383_v32 = vpack.c.bf16 %v1903_v25, %v1902_v21  ;;  %v1905_v33 = vmax.f32 %v1889_v26, 0.0  ;;  %v1907_v16 = vmax.f32 %v1891_v27, 0.0  ;;  %v1782_v34 = vpop.f32.mrb[28].mxu0  ;;  %v1835_v35 = vpop.f32.mrb[28].mxu1 }
 0x1da   : > { %v1852_v36 = vmax.f32 %v3352_v47, %v1782_v34  ;;  %v1854_v37 = vmax.f32 %v3354_v48, %v1835_v35  ;;  %v1784_v38 = vpop.f32.mrb[29].mxu0  ;;  %v1837_v39 = vpop.f32.mrb[29].mxu1 }
 0x1db   : > { %1964 = vst [vmem:[%s3372_s12] sm:$0xff] %v2382_v31  ;;  %1965 = vst [vmem:[%s3372_s12 + $0x8] sm:$0xff] %v2383_v32  ;;  %v2384_v40 = vpack.c.bf16 %v1905_v33, %v1904_v29  ;;  %v2385_v41 = vpack.c.bf16 %v1907_v16, %v1906_v30  ;;  %v1853_v42 = vmax.f32 %v3356_v51, %v1784_v38  ;;  %v1786_v44 = vpop.f32.mrb[30].mxu0  ;;  %v1839_v45 = vpop.f32.mrb[30].mxu1 }
 0x1dc   : > { %v1855_v43 = vmax.f32 %v3358_v52, %v1837_v39  ;;  %v1892_v46 = vadd.f32 %v1877_v28, %v1852_v36  ;;  %v1894_v47 = vadd.f32 %v1877_v28, %v1854_v37  ;;  %v1856_v48 = vmax.f32 %v3360_v54, %v1786_v44  ;;  %v1788_v50 = vpop.f32.mrb[31].mxu0  ;;  %v1841_v53 = vpop.f32.mrb[31].mxu1 }
 0x1dd   : > { %v1858_v49 = vmax.f32 %v3362_v55, %v1839_v45  ;;  %1966 = vst [vmem:[%s3372_s12 + $0x10] sm:$0xff] %v2384_v40  ;;  %1967 = vst [vmem:[%s3372_s12 + $0x18] sm:$0xff] %v2385_v41  ;;  %v1893_v57 = vadd.f32 %v1877_v28, %v1853_v42  ;;  %v1857_v2 = vmax.f32 %v3364_v61, %v1788_v50 }
 0x1de   : > { %v1895_v58 = vadd.f32 %v1877_v28, %v1855_v43  ;;  %v1859_v51 = vmax.f32 %v3366_v59, %v1841_v53  ;;  %v1908_v52 = vmax.f32 %v1892_v46, 0.0  ;;  %v1910_v60 = vmax.f32 %v1894_v47, 0.0 }
 0x1df   : > { %v1896_v62 = vadd.f32 %v1882_v56, %v1856_v48  ;;  %v1898_v54 = vadd.f32 %v1882_v56, %v1858_v49  ;;  %v1909_v55 = vmax.f32 %v1893_v57, 0.0  ;;  %v1897_v0 = vadd.f32 %v1882_v56, %v1857_v2 }
 0x1e0   : > { %v1911_v63 = vmax.f32 %v1895_v58, 0.0  ;;  %v1899_v1 = vadd.f32 %v1882_v56, %v1859_v51  ;;  %1978 = sbr.rel (!%p2800_p6) target bundleno = 495 (0x1ef), region = 59 }
 0x1e1   : > { %v1912_v3 = vmax.f32 %v1896_v62, 0.0  ;;  %v1914_v4 = vmax.f32 %v1898_v54, 0.0  ;;  %v2386_v5 = vpack.c.bf16 %v1909_v55, %v1908_v52  ;;  %v1913_v7 = vmax.f32 %v1897_v0, 0.0 }
 0x1e2   : > { %v2387_v6 = vpack.c.bf16 %v1911_v63, %v1910_v60  ;;  %v1915_v61 = vmax.f32 %v1899_v1, 0.0  ;;  %v1996_v9 = vld [vmem:[%s3372_s12] sm:$0xff] (%p2800_p6)  ;;  %v1998_v10 = vld [vmem:[%s3372_s12 + $0x8] sm:$0xff] (%p2800_p6) }
 0x1e3   : > { %1968 = vst [vmem:[%s3372_s12 + $0x20] sm:$0xff] %v2386_v5  ;;  %v2388_v59 = vpack.c.bf16 %v1913_v7, %v1912_v3  ;;  %1997 = vst [vmem:[%s1983_s4] sm:$0xff] (%p2800_p6), %v1996_v9 }
 0x1e4   : > { %1969 = vst [vmem:[%s3372_s12 + $0x28] sm:$0xff] %v2387_v6  ;;  %v2389_v8 = vpack.c.bf16 %v1915_v61, %v1914_v4  ;;  %v2000_v11 = vld [vmem:[%s3372_s12 + $0x10] sm:$0xff] (%p2800_p6)  ;;  %v2002_v12 = vld [vmem:[%s3372_s12 + $0x18] sm:$0xff] (%p2800_p6)  ;;  %1999 = vst [vmem:[%s1983_s4 + $0x8] sm:$0xff] (%p2800_p6), %v1998_v10 }
 0x1e5   : > { %1970 = vst [vmem:[%s3372_s12 + $0x30] sm:$0xff] %v2388_v59  ;;  %2001 = vst [vmem:[%s1983_s4 + $0x30] sm:$0xff] (%p2800_p6), %v2000_v11 }
 0x1e6   : > { %1971 = vst [vmem:[%s3372_s12 + $0x38] sm:$0xff] %v2389_v8  ;;  %2003 = vst [vmem:[%s1983_s4 + $0x38] sm:$0xff] (%p2800_p6), %v2002_v12 }
 0x1ea   : > { %v2004_v13 = vld [vmem:[%s3372_s12 + $0x20] sm:$0xff] }
 0x1eb   : > { %v2006_v14 = vld [vmem:[%s3372_s12 + $0x28] sm:$0xff]  ;;  %2005 = vst [vmem:[%s1983_s4 + $0x60] sm:$0xff] %v2004_v13 }
 0x1ec   : > { %v2008_v15 = vld [vmem:[%s3372_s12 + $0x30] sm:$0xff]  ;;  %2007 = vst [vmem:[%s1983_s4 + $0x68] sm:$0xff] %v2006_v14 }
 0x1ed   : > { %v2010_v17 = vld [vmem:[%s3372_s12 + $0x38] sm:$0xff]  ;;  %2009 = vst [vmem:[%s1983_s4 + $0x90] sm:$0xff] %v2008_v15 }
 0x1ee   : > { %2011 = vst [vmem:[%s1983_s4 + $0x98] sm:$0xff] %v2010_v17 }
 0x1ef PF: > { %s13_s18 = sadd.s32 1, %s2729_s18   ;;  %s3429_s12 = smov %s2709_s13 }
 0x1f0   : > { %p10_p12 = scmp.ge.s32.totalorder %s13_s18, 8   ;;  %s3430_s13 = smov %s2808_s27 }
 0x1f1   : > { %s3431_s14 = smov %s2721_s16  ;;  %s3432_s15 = smov %s2725_s17 }
 0x1f2   : > { %s3433_s16 = smov %s3436_s19  ;;  %s3434_s17 = smov %s3440_s20 }
 0x1f3   :  { %12 = sbr.rel (!%p10_p12) target bundleno = 4 (0x4), region = 116 }

// kernel: somi_cnn_forward.5
= control target key start
LH: loop header
LB: loop body
LE: loop exit
PB: predicated region body
PF: predicated region fallthrough
CT: control target
= control target key end

     0   :  { %10 = vsyncpa [#allocation4], 0  ;;  %s5710_s18 = smov 0   ;;  %s6220_s0 = inlined_call_operand.vmem [shape: bf16[2,44032], index: 0, kind: input, shape index: {}]   ;;  %s6221_s1 = inlined_call_operand.vmem [shape: bf16[44032,64], index: 1, kind: input, shape index: {}]   ;;  %s6222_s2 = inlined_call_operand.vmem [shape: f32[1,64], index: 2, kind: input, shape index: {}]   ;;  %s6223_s3 = inlined_call_operand.vmem [shape: f32[64,7], index: 3, kind: input, shape index: {}]   ;;  %s6224_s4 = inlined_call_operand.vmem [shape: f32[1,7], index: 4, kind: input, shape index: {}]   ;;  %s6225_s5 = inlined_call_operand.hbm [shape: f32[2,7], index: 5, kind: output, shape index: {}]  }
   0x1 LB: > { %s5716_s19 = sadd.s32 4294967295, %s5670_s18   ;;  %p4372_p0 = scmp.ge.s32.totalorder %s5670_s18, 1  ;;  %s5670_s18 = sphi %s5710_s18, %s16_s18  }
   0x2   : > { %p194_p1 = scmp.lt.s32.totalorder %s5670_s18, 9 }
   0x4   : > { %p195_p2 = pnand %p4372_p0, %p194_p1 }
   0x5   : > { %s221_s20 = smul.u32 (!%p195_p2), 43, %s5716_s19  ;;  %p4374_p5 = scmp.ne.s32.totalorder (!%p195_p2), %s5716_s19, 0 }
   0x6   : > { %198 = sbr.rel (%p195_p2) target bundleno = 1163 (0x48b), region = 40 }
   0x7   : > { %s226_s21 = smul.u32 (!%p195_p2), 688, %s5716_s19  ;;  %p222_p3 = scmp.lt.s32.totalorder (!%p195_p2), %s221_s20, 343 }
   0x9   : > { %p227_p4 = scmp.lt.s32.totalorder (!%p195_p2), %s226_s21, 5503 }
   0xd   : > { %s6227_s20 = smov (!%p222_p3, %s221_s20), 343  ;;  %s6229_s21 = smov (!%p227_p4, %s226_s21), 5503 }
   0xe   : > { %s5725_s24 = scalar_lea.vmem %s6220_s0, %s6227_s20  ;;  %s4373_s25 = sshll.u32 %s6229_s21, 2  ;;  %vm237_vm0 = vcmask (!%p4374_p5), 517120   ;;  %v5672_v0 = vmov (!%p4374_p5), 0.0  }
   0xf   : > { %s5730_s28 = scalar_lea.vmem %s6221_s1, %s4373_s25  ;;  %236 = sbr.rel (%p4374_p5) target bundleno = 22 (0x16), region = 44  ;;  %238 = vst.msk [vmem:[#allocation2] sm:$0x3] (!%p4374_p5), %vm237_vm0, %v5672_v0 }
  0x16 PF: > { %v5281_v1 = vld [vmem:[%s5730_s28 + $0x40] sm:$0xff]   ;;  %v5285_v5 = vld [vmem:[%s5730_s28 + $0x48] sm:$0xff]   ;;  %v5289_v9 = vld [vmem:[%s5730_s28 + $0x50] sm:$0xff]   ;;  %v944_v30 = vlaneseq  ;;  %v5673_v36 = vmov 1966171168   ;;  %vm5675_vm1 = vmmov 0  }
  0x17   : > { %v5282_v2 = vld [vmem:[%s5730_s28 + $0xc0] sm:$0xff]   ;;  %4728 = vmatprep.subr.bf16.mxu0 %v5281_v1  ;;  %v5286_v6 = vld [vmem:[%s5730_s28 + $0xc8] sm:$0xff]   ;;  %v5290_v10 = vld [vmem:[%s5730_s28 + $0xd0] sm:$0xff]   ;;  %v942_v37 = vunpack.c.l.s4 %v5673_v36  ;;  %vm4196_vm2 = vcmask 517120   ;;  %p4720_p6 = scmp.ne.s32.totalorder %s5716_s19, 7 }
  0x18   : > { %v5283_v3 = vld [vmem:[%s5730_s28] sm:$0xff]   ;;  %4750 = vmatprep.subr.bf16.mxu1 %v5282_v2  ;;  %v5287_v7 = vld [vmem:[%s5730_s28 + $0x8] sm:$0xff]   ;;  %v5291_v11 = vld [vmem:[%s5730_s28 + $0x10] sm:$0xff]   ;;  %v945_v34 = vshrl.u32 %v944_v30, 7  ;;  %vm5677_vm3 = vmmov (!%p4720_p6), 0   ;;  %vm4227_vm4 = vcmask (!%p4720_p6), 523264  }
  0x19   : > { %v5284_v4 = vld [vmem:[%s5730_s28 + $0x80] sm:$0xff]   ;;  %4729 = vmatpush3.bf16.msra.mxu0 %v5283_v3  ;;  %v5288_v8 = vld [vmem:[%s5730_s28 + $0x88] sm:$0xff]   ;;  %v5292_v12 = vld [vmem:[%s5730_s28 + $0x90] sm:$0xff]   ;;  %v943_v40 = vunpack.c.0.s8 %v942_v37  ;;  %vm4301_vm5 = vcmask (!%p4720_p6), 50176  }
  0x1a   : > { %4751 = vmatpush3.bf16.msra.mxu1 %v5284_v4  ;;  %4730 = vmatprep.subr.bf16.mxu0 %v5285_v5  ;;  %v5293_v13 = vld [vmem:[%s5730_s28 + $0x58] sm:$0xff]   ;;  %v5297_v17 = vld [vmem:[%s5730_s28 + $0x60] sm:$0xff]   ;;  %v5301_v21 = vld [vmem:[%s5730_s28 + $0x68] sm:$0xff]  }
  0x1b   : > { %4752 = vmatprep.subr.bf16.mxu1 %v5286_v6  ;;  %v5294_v14 = vld [vmem:[%s5730_s28 + $0xd8] sm:$0xff]   ;;  %v5298_v18 = vld [vmem:[%s5730_s28 + $0xe0] sm:$0xff]   ;;  %v5302_v22 = vld [vmem:[%s5730_s28 + $0xe8] sm:$0xff]   ;;  %v5768_v42 = vsub.s32 %v943_v40, %v945_v34 }
  0x1c   : > { %v5295_v15 = vld [vmem:[%s5730_s28 + $0x18] sm:$0xff]   ;;  %v5299_v19 = vld [vmem:[%s5730_s28 + $0x20] sm:$0xff]   ;;  %v5303_v23 = vld [vmem:[%s5730_s28 + $0x28] sm:$0xff]  }
  0x1d   : > { %4731 = vmatpush3.bf16.msra.mxu0 %v5287_v7  ;;  %v5296_v16 = vld [vmem:[%s5730_s28 + $0x98] sm:$0xff]   ;;  %v5300_v20 = vld [vmem:[%s5730_s28 + $0xa0] sm:$0xff]   ;;  %v5304_v24 = vld [vmem:[%s5730_s28 + $0xa8] sm:$0xff]  }
  0x1e   : > { %4753 = vmatpush3.bf16.msra.mxu1 %v5288_v8  ;;  %4732 = vmatprep.subr.bf16.mxu0 %v5289_v9  ;;  %v5305_v25 = vld [vmem:[%s5730_s28 + $0x70] sm:$0xff]   ;;  %v5309_v29 = vld [vmem:[%s5730_s28 + $0x78] sm:$0xff]   ;;  %v5314_v35 = vld [vmem:[%s5730_s28 + $0x140] sm:$0xff]  }
  0x1f   : > { %4754 = vmatprep.subr.bf16.mxu1 %v5290_v10  ;;  %v5306_v26 = vld [vmem:[%s5730_s28 + $0xf0] sm:$0xff]   ;;  %v5310_v31 = vld [vmem:[%s5730_s28 + $0xf8] sm:$0xff]   ;;  %v240_v38 = vld [vmem:[%s5725_s24] sm:$0xff] }
  0x20   : > { %v5307_v27 = vld [vmem:[%s5730_s28 + $0x30] sm:$0xff]   ;;  %v5311_v32 = vld [vmem:[%s5730_s28 + $0x38] sm:$0xff]   ;;  %v940_v39 = vcombine.high %v240_v38, %v240_v38  ;;  %v5316_v41 = vld [vmem:[%s5730_s28 + $0x1c0] sm:$0xff]   ;;  %v947_v43 = vrot.slane %v240_v38, %v5768_v42 }
  0x21   : > { %4733 = vmatpush3.bf16.msra.mxu0 %v5291_v11  ;;  %v5308_v28 = vld [vmem:[%s5730_s28 + $0xb0] sm:$0xff]   ;;  %v5312_v33 = vld [vmem:[%s5730_s28 + $0xb8] sm:$0xff]   ;;  %v5315_v48 = vld [vmem:[%s5730_s28 + $0x100] sm:$0xff]  }
  0x22   : > { %4755 = vmatpush3.bf16.msra.mxu1 %v5292_v12  ;;  %4734 = vmatprep.subr.bf16.mxu0 %v5293_v13  ;;  %v5772_v44 = vrot.slane %v940_v39, %v5768_v42  ;;  %v955_v45 = vcombine.high %v947_v43, %v947_v43  ;;  %v963_v46 = vrot.slane %v947_v43, %v5768_v42  ;;  %v5317_v50 = vld [vmem:[%s5730_s28 + $0x180] sm:$0xff]   ;;  %v5318_v53 = vld [vmem:[%s5730_s28 + $0x148] sm:$0xff]   ;;  %v5322_v59 = vld [vmem:[%s5730_s28 + $0x150] sm:$0xff]  }
  0x23   : > { %4756 = vmatprep.subr.bf16.mxu1 %v5294_v14  ;;  %v5319_v55 = vld [vmem:[%s5730_s28 + $0x108] sm:$0xff]   ;;  %v5323_v60 = vld [vmem:[%s5730_s28 + $0x110] sm:$0xff]   ;;  %v5326_v63 = vld [vmem:[%s5730_s28 + $0x158] sm:$0xff]  }
  0x24   : > { %v956_v47 = vcombine.high %v5772_v44, %v5772_v44  ;;  %v977_v49 = vrot.slane %v955_v45, %v5768_v42  ;;  %v985_v52 = vcombine.high %v963_v46, %v963_v46  ;;  %v5320_v56 = vld [vmem:[%s5730_s28 + $0x1c8] sm:$0xff]   ;;  %v5324_v61 = vld [vmem:[%s5730_s28 + $0x1d0] sm:$0xff]   ;;  %v5327_v0 = vld [vmem:[%s5730_s28 + $0x118] sm:$0xff]  }
  0x25   : > { %4735 = vmatpush3.bf16.msra.mxu0 %v5295_v15  ;;  %v5321_v58 = vld [vmem:[%s5730_s28 + $0x188] sm:$0xff]   ;;  %v5325_v62 = vld [vmem:[%s5730_s28 + $0x190] sm:$0xff]   ;;  %v5328_v1 = vld [vmem:[%s5730_s28 + $0x1d8] sm:$0xff]  }
  0x26   : > { %4757 = vmatpush3.bf16.msra.mxu1 %v5296_v16  ;;  %4736 = vmatprep.subr.bf16.mxu0 %v5297_v17  ;;  %v984_v51 = vrot.slane %v956_v47, %v5768_v42  ;;  %v987_v54 = vcombine.high %v977_v49, %v977_v49  ;;  %v5329_v2 = vld [vmem:[%s5730_s28 + $0x198] sm:$0xff]   ;;  %v5330_v3 = vld [vmem:[%s5730_s28 + $0x160] sm:$0xff]   ;;  %v5334_v7 = vld [vmem:[%s5730_s28 + $0x168] sm:$0xff]  }
  0x27   : > { %4758 = vmatprep.subr.bf16.mxu1 %v5298_v18  ;;  %3347 = vmatprep.mubr.bf16.mxu0 %v977_v49  ;;  %v5331_v4 = vld [vmem:[%s5730_s28 + $0x120] sm:$0xff]   ;;  %v5335_v8 = vld [vmem:[%s5730_s28 + $0x128] sm:$0xff]   ;;  %v5338_v11 = vld [vmem:[%s5730_s28 + $0x170] sm:$0xff]  }
  0x28   : > { %v988_v57 = vcombine.high %v984_v51, %v984_v51  ;;  %3387 = vmatprep.mubr.bf16.mxu1 %v987_v54  ;;  %v5332_v5 = vld [vmem:[%s5730_s28 + $0x1e0] sm:$0xff]   ;;  %v5336_v9 = vld [vmem:[%s5730_s28 + $0x1e8] sm:$0xff]   ;;  %v5339_v12 = vld [vmem:[%s5730_s28 + $0x130] sm:$0xff]  }
  0x29   : > { %4737 = vmatpush3.bf16.msra.mxu0 %v5299_v19  ;;  %v5333_v6 = vld [vmem:[%s5730_s28 + $0x1a0] sm:$0xff]   ;;  %v5337_v10 = vld [vmem:[%s5730_s28 + $0x1a8] sm:$0xff]   ;;  %v5340_v13 = vld [vmem:[%s5730_s28 + $0x1f0] sm:$0xff]   ;;  %v970_v19 = vrot.slane %v5772_v44, %v5768_v42 }
  0x2a   : > { %4759 = vmatpush3.bf16.msra.mxu1 %v5300_v20  ;;  %4738 = vmatprep.subr.bf16.mxu0 %v5301_v21  ;;  %v5341_v14 = vld [vmem:[%s5730_s28 + $0x1b0] sm:$0xff]   ;;  %v5342_v15 = vld [vmem:[%s5730_s28 + $0x178] sm:$0xff]   ;;  %v5346_v20 = vld [vmem:[%s5730_s28 + $0x240] sm:$0xff]  }
  0x2b   : > { %4760 = vmatprep.subr.bf16.mxu1 %v5302_v22  ;;  %v5343_v16 = vld [vmem:[%s5730_s28 + $0x138] sm:$0xff]   ;;  %v5347_v21 = vld [vmem:[%s5730_s28 + $0x200] sm:$0xff]   ;;  %v5355_v30 = vld [vmem:[%s5730_s28 + $0x210] sm:$0xff]  }
  0x2c   : > { %v5344_v17 = vld [vmem:[%s5730_s28 + $0x1f8] sm:$0xff]   ;;  %v5348_v22 = vld [vmem:[%s5730_s28 + $0x2c0] sm:$0xff]   ;;  %v5367_v43 = vld [vmem:[%s5730_s28 + $0x228] sm:$0xff]  }
  0x2d   : > { %4739 = vmatpush3.bf16.msra.mxu0 %v5303_v23  ;;  %v5345_v18 = vld [vmem:[%s5730_s28 + $0x1b8] sm:$0xff]   ;;  %v5349_v23 = vld [vmem:[%s5730_s28 + $0x280] sm:$0xff]   ;;  %v5368_v44 = vld [vmem:[%s5730_s28 + $0x2e8] sm:$0xff]  }
  0x2e   : > { %4761 = vmatpush3.bf16.msra.mxu1 %v5304_v24  ;;  %4740 = vmatprep.subr.bf16.mxu0 %v5305_v25  ;;  %v986_v24 = vcombine.high %v970_v19, %v970_v19  ;;  %v5350_v25 = vld [vmem:[%s5730_s28 + $0x248] sm:$0xff]   ;;  %v5359_v34 = vld [vmem:[%s5730_s28 + $0x218] sm:$0xff]   ;;  %v5362_v37 = vld [vmem:[%s5730_s28 + $0x260] sm:$0xff]  }
  0x2f   : > { %4762 = vmatprep.subr.bf16.mxu1 %v5306_v26  ;;  %v5351_v26 = vld [vmem:[%s5730_s28 + $0x208] sm:$0xff]   ;;  %v5361_v36 = vld [vmem:[%s5730_s28 + $0x298] sm:$0xff]   ;;  %v5363_v38 = vld [vmem:[%s5730_s28 + $0x220] sm:$0xff]  }
  0x30   : > { %v5364_v39 = vld [vmem:[%s5730_s28 + $0x2e0] sm:$0xff]   ;;  %v5369_v45 = vld [vmem:[%s5730_s28 + $0x2a8] sm:$0xff]   ;;  %v5370_v47 = vld [vmem:[%s5730_s28 + $0x270] sm:$0xff]  }
  0x31   : > { %4741 = vmatpush3.bf16.msra.mxu0 %v5307_v27  ;;  %v5352_v27 = vld [vmem:[%s5730_s28 + $0x2c8] sm:$0xff]   ;;  %v5365_v40 = vld [vmem:[%s5730_s28 + $0x2a0] sm:$0xff]   ;;  %v5373_v54 = vld [vmem:[%s5730_s28 + $0x2b0] sm:$0xff]  }
  0x32   : > { %4763 = vmatpush3.bf16.msra.mxu1 %v5308_v28  ;;  %4742 = vmatprep.subr.bf16.mxu0 %v5309_v29  ;;  %v5353_v28 = vld [vmem:[%s5730_s28 + $0x288] sm:$0xff]   ;;  %v5354_v29 = vld [vmem:[%s5730_s28 + $0x250] sm:$0xff]  }
  0x33   : > { %4764 = vmatprep.subr.bf16.mxu1 %v5310_v31  ;;  %v5356_v31 = vld [vmem:[%s5730_s28 + $0x2d0] sm:$0xff]  }
  0x35   : > { %4743 = vmatpush3.bf16.msra.mxu0 %v5311_v32  ;;  %v5357_v32 = vld [vmem:[%s5730_s28 + $0x290] sm:$0xff]  }
  0x36   : > { %4765 = vmatpush3.bf16.msra.mxu1 %v5312_v33  ;;  %4772 = vmatprep.subr.bf16.mxu0 %v5314_v35  ;;  %v5358_v33 = vld [vmem:[%s5730_s28 + $0x258] sm:$0xff]  }
  0x37   : > { %4794 = vmatprep.subr.bf16.mxu1 %v5316_v41  ;;  %v5360_v35 = vld [vmem:[%s5730_s28 + $0x2d8] sm:$0xff]   ;;  %v5366_v41 = vld [vmem:[%s5730_s28 + $0x268] sm:$0xff]  }
  0x38   : > { %3348 = vmatmul.mubr.bf16.vlgmr.msra.gmra.mrb[0].mxu0 %v963_v46  ;;  %v241_v46 = vld [vmem:[%s5725_s24 + $0x8] sm:$0xff] }
  0x39   : > { %4773 = vmatpush3.bf16.msra.mxu0 %v5315_v48  ;;  %3388 = vmatmul.mubr.bf16.vlgmr.msra.gmra.mrb[0].mxu1 %v985_v52  ;;  %v996_v48 = vrot.slane %v241_v46, %v5768_v42  ;;  %v989_v49 = vcombine.high %v241_v46, %v241_v46  ;;  %v5420_v46 = vld [vmem:[%s5730_s28 + $0x410] sm:$0xff]  }
  0x3a   : > { %4774 = vmatprep.subr.bf16.mxu0 %v5318_v53  ;;  %4795 = vmatpush3.bf16.msra.mxu1 %v5317_v50  ;;  %v5371_v50 = vld [vmem:[%s5730_s28 + $0x230] sm:$0xff]  }
  0x3b   : > { %3427 = vmatprep.mubr.bf16.mxu0 %v984_v51  ;;  %4796 = vmatprep.subr.bf16.mxu1 %v5320_v56  ;;  %v5372_v51 = vld [vmem:[%s5730_s28 + $0x2f0] sm:$0xff]   ;;  %v1004_v52 = vcombine.high %v996_v48, %v996_v48  ;;  %v5841_v53 = vrot.slane %v989_v49, %v5768_v42  ;;  %v5423_v49 = vld [vmem:[%s5730_s28 + $0x458] sm:$0xff]  }
  0x3c   : > { %3467 = vmatprep.mubr.bf16.mxu1 %v988_v57  ;;  %v5375_v57 = vld [vmem:[%s5730_s28 + $0x238] sm:$0xff]  }
  0x3d   : > { %4775 = vmatpush3.bf16.msra.mxu0 %v5319_v55  ;;  %v5374_v55 = vld [vmem:[%s5730_s28 + $0x278] sm:$0xff]   ;;  %v1026_v56 = vrot.slane %v1004_v52, %v5768_v42 }
  0x3e   : > { %4776 = vmatprep.subr.bf16.mxu0 %v5322_v59  ;;  %4797 = vmatpush3.bf16.msra.mxu1 %v5321_v58  ;;  %v1005_v58 = vcombine.high %v5841_v53, %v5841_v53  ;;  %v5376_v59 = vld [vmem:[%s5730_s28 + $0x2f8] sm:$0xff]  }
  0x3f   : > { %4798 = vmatprep.subr.bf16.mxu1 %v5324_v61  ;;  %v5377_v61 = vld [vmem:[%s5730_s28 + $0x2b8] sm:$0xff]  }
  0x40   : > { %v5426_v52 = vld [vmem:[%s5730_s28 + $0x498] sm:$0xff]  }
  0x41   : > { %4777 = vmatpush3.bf16.msra.mxu0 %v5323_v60  ;;  %v1036_v60 = vcombine.high %v1026_v56, %v1026_v56 }
  0x42   : > { %4778 = vmatprep.subr.bf16.mxu0 %v5326_v63  ;;  %4799 = vmatpush3.bf16.msra.mxu1 %v5325_v62  ;;  %v1012_v62 = vrot.slane %v996_v48, %v5768_v42  ;;  %v5378_v63 = vld [vmem:[%s5730_s28 + $0x340] sm:$0xff]   ;;  %v5422_v48 = vld [vmem:[%s5730_s28 + $0x490] sm:$0xff]  }
  0x43   : > { %4800 = vmatprep.subr.bf16.mxu1 %v5328_v1  ;;  %v1033_v1 = vrot.slane %v1005_v58, %v5768_v42  ;;  %v5432_v58 = vld [vmem:[%s5730_s28 + $0x428] sm:$0xff]  }
  0x45   : > { %4779 = vmatpush3.bf16.msra.mxu0 %v5327_v0  ;;  %v5379_v0 = vld [vmem:[%s5730_s28 + $0x300] sm:$0xff]  }
  0x46   : > { %4780 = vmatprep.subr.bf16.mxu0 %v5330_v3  ;;  %4801 = vmatpush3.bf16.msra.mxu1 %v5329_v2  ;;  %v5380_v2 = vld [vmem:[%s5730_s28 + $0x3c0] sm:$0xff]  }
  0x47   : > { %4802 = vmatprep.subr.bf16.mxu1 %v5332_v5  ;;  %v5381_v3 = vld [vmem:[%s5730_s28 + $0x380] sm:$0xff]   ;;  %v5382_v5 = vld [vmem:[%s5730_s28 + $0x348] sm:$0xff]  }
  0x49   : > { %4781 = vmatpush3.bf16.msra.mxu0 %v5331_v4  ;;  %v1034_v4 = vcombine.high %v1012_v62, %v1012_v62 }
  0x4a   : > { %4782 = vmatprep.subr.bf16.mxu0 %v5334_v7  ;;  %4803 = vmatpush3.bf16.msra.mxu1 %v5333_v6  ;;  %v5383_v6 = vld [vmem:[%s5730_s28 + $0x308] sm:$0xff]   ;;  %v1037_v7 = vcombine.high %v1033_v1, %v1033_v1 }
  0x4b   : > { %4804 = vmatprep.subr.bf16.mxu1 %v5336_v9  ;;  %v5385_v9 = vld [vmem:[%s5730_s28 + $0x388] sm:$0xff]  }
  0x4d   : > { %4783 = vmatpush3.bf16.msra.mxu0 %v5335_v8  ;;  %v5384_v8 = vld [vmem:[%s5730_s28 + $0x3c8] sm:$0xff]  }
  0x4e   : > { %4784 = vmatprep.subr.bf16.mxu0 %v5338_v11  ;;  %4805 = vmatpush3.bf16.msra.mxu1 %v5337_v10  ;;  %v5386_v10 = vld [vmem:[%s5730_s28 + $0x350] sm:$0xff]  }
  0x4f   : > { %4806 = vmatprep.subr.bf16.mxu1 %v5340_v13  ;;  %v5387_v11 = vld [vmem:[%s5730_s28 + $0x310] sm:$0xff]  }
  0x50   : > { %v5389_v13 = vld [vmem:[%s5730_s28 + $0x390] sm:$0xff]  }
  0x51   : > { %4785 = vmatpush3.bf16.msra.mxu0 %v5339_v12  ;;  %v5388_v12 = vld [vmem:[%s5730_s28 + $0x3d0] sm:$0xff]  }
  0x52   : > { %4786 = vmatprep.subr.bf16.mxu0 %v5342_v15  ;;  %4807 = vmatpush3.bf16.msra.mxu1 %v5341_v14  ;;  %v5390_v14 = vld [vmem:[%s5730_s28 + $0x358] sm:$0xff]  }
  0x53   : > { %4808 = vmatprep.subr.bf16.mxu1 %v5344_v17  ;;  %v5391_v15 = vld [vmem:[%s5730_s28 + $0x318] sm:$0xff]  }
  0x54   : > { %v5393_v17 = vld [vmem:[%s5730_s28 + $0x398] sm:$0xff]  }
  0x55   : > { %4787 = vmatpush3.bf16.msra.mxu0 %v5343_v16  ;;  %v5392_v16 = vld [vmem:[%s5730_s28 + $0x3d8] sm:$0xff]  }
  0x56   : > { %4816 = vmatprep.subr.bf16.mxu0 %v5346_v20  ;;  %4809 = vmatpush3.bf16.msra.mxu1 %v5345_v18  ;;  %v5394_v18 = vld [vmem:[%s5730_s28 + $0x360] sm:$0xff]  }
  0x57   : > { %4838 = vmatprep.subr.bf16.mxu1 %v5348_v22  ;;  %v5396_v20 = vld [vmem:[%s5730_s28 + $0x3e0] sm:$0xff]   ;;  %v5398_v22 = vld [vmem:[%s5730_s28 + $0x368] sm:$0xff]  }
  0x58   : > { %3428 = vmatmul.mubr.bf16.vlgmr.msra.gmra.mrb[4].mxu0 %v970_v19  ;;  %v5395_v19 = vld [vmem:[%s5730_s28 + $0x320] sm:$0xff]  }
  0x59   : > { %4817 = vmatpush3.bf16.msra.mxu0 %v5347_v21  ;;  %3468 = vmatmul.mubr.bf16.vlgmr.msra.gmra.mrb[4].mxu1 %v986_v24  ;;  %v5397_v21 = vld [vmem:[%s5730_s28 + $0x3a0] sm:$0xff]   ;;  %v5400_v24 = vld [vmem:[%s5730_s28 + $0x3e8] sm:$0xff]  }
  0x5a   : > { %4818 = vmatprep.subr.bf16.mxu0 %v5350_v25  ;;  %4839 = vmatpush3.bf16.msra.mxu1 %v5349_v23  ;;  %v5399_v23 = vld [vmem:[%s5730_s28 + $0x328] sm:$0xff]  }
  0x5b   : > { %4840 = vmatprep.subr.bf16.mxu1 %v5352_v27  ;;  %3507 = vmatprep.mubr.bf16.mxu0 %v1026_v56  ;;  %v5401_v25 = vld [vmem:[%s5730_s28 + $0x3a8] sm:$0xff]   ;;  %v5403_v27 = vld [vmem:[%s5730_s28 + $0x330] sm:$0xff]   ;;  %v5430_v56 = vld [vmem:[%s5730_s28 + $0x4a0] sm:$0xff]  }
  0x5c   : > { %3547 = vmatprep.mubr.bf16.mxu1 %v1036_v60  ;;  %v5434_v60 = vld [vmem:[%s5730_s28 + $0x4a8] sm:$0xff]  }
  0x5d   : > { %4819 = vmatpush3.bf16.msra.mxu0 %v5351_v26  ;;  %v5402_v26 = vld [vmem:[%s5730_s28 + $0x370] sm:$0xff]  }
  0x5e   : > { %4820 = vmatprep.subr.bf16.mxu0 %v5354_v29  ;;  %4841 = vmatpush3.bf16.msra.mxu1 %v5353_v28  ;;  %v5404_v28 = vld [vmem:[%s5730_s28 + $0x3f0] sm:$0xff]  }
  0x5f   : > { %4842 = vmatprep.subr.bf16.mxu1 %v5356_v31  ;;  %v5405_v29 = vld [vmem:[%s5730_s28 + $0x3b0] sm:$0xff]   ;;  %v5407_v31 = vld [vmem:[%s5730_s28 + $0x338] sm:$0xff]  }
  0x61   : > { %4821 = vmatpush3.bf16.msra.mxu0 %v5355_v30  ;;  %v5406_v30 = vld [vmem:[%s5730_s28 + $0x378] sm:$0xff]  }
  0x62   : > { %4822 = vmatprep.subr.bf16.mxu0 %v5358_v33  ;;  %4843 = vmatpush3.bf16.msra.mxu1 %v5357_v32  ;;  %v5408_v32 = vld [vmem:[%s5730_s28 + $0x3f8] sm:$0xff]  }
  0x63   : > { %4844 = vmatprep.subr.bf16.mxu1 %v5360_v35  ;;  %v5410_v33 = vld [vmem:[%s5730_s28 + $0x3b8] sm:$0xff]   ;;  %v5411_v35 = vld [vmem:[%s5730_s28 + $0x440] sm:$0xff]  }
  0x65   : > { %4823 = vmatpush3.bf16.msra.mxu0 %v5359_v34  ;;  %v1019_v34 = vrot.slane %v5841_v53, %v5768_v42  ;;  %v5427_v53 = vld [vmem:[%s5730_s28 + $0x460] sm:$0xff]  }
  0x66   : > { %4824 = vmatprep.subr.bf16.mxu0 %v5362_v37  ;;  %4845 = vmatpush3.bf16.msra.mxu1 %v5361_v36  ;;  %v5412_v36 = vld [vmem:[%s5730_s28 + $0x400] sm:$0xff]  }
  0x67   : > { %4846 = vmatprep.subr.bf16.mxu1 %v5364_v39  ;;  %v5413_v37 = vld [vmem:[%s5730_s28 + $0x4c0] sm:$0xff]   ;;  %v1035_v39 = vcombine.high %v1019_v34, %v1019_v34 }
  0x69   : > { %4825 = vmatpush3.bf16.msra.mxu0 %v5363_v38  ;;  %v5414_v38 = vld [vmem:[%s5730_s28 + $0x480] sm:$0xff]  }
  0x6a   : > { %4826 = vmatprep.subr.bf16.mxu0 %v5366_v41  ;;  %4847 = vmatpush3.bf16.msra.mxu1 %v5365_v40  ;;  %v5415_v40 = vld [vmem:[%s5730_s28 + $0x448] sm:$0xff]  }
  0x6b   : > { %4848 = vmatprep.subr.bf16.mxu1 %v5368_v44  ;;  %v5416_v41 = vld [vmem:[%s5730_s28 + $0x408] sm:$0xff]  }
  0x6c   : > { %v5418_v44 = vld [vmem:[%s5730_s28 + $0x488] sm:$0xff]  }
  0x6d   : > { %4827 = vmatpush3.bf16.msra.mxu0 %v5367_v43  ;;  %v5417_v43 = vld [vmem:[%s5730_s28 + $0x4c8] sm:$0xff]  }
  0x6e   : > { %4828 = vmatprep.subr.bf16.mxu0 %v5370_v47  ;;  %4849 = vmatpush3.bf16.msra.mxu1 %v5369_v45  ;;  %v5419_v45 = vld [vmem:[%s5730_s28 + $0x450] sm:$0xff]  }
  0x6f   : > { %4850 = vmatprep.subr.bf16.mxu1 %v5372_v51  ;;  %v5421_v47 = vld [vmem:[%s5730_s28 + $0x4d0] sm:$0xff]   ;;  %v5425_v51 = vld [vmem:[%s5730_s28 + $0x4d8] sm:$0xff]  }
  0x71   : > { %4829 = vmatpush3.bf16.msra.mxu0 %v5371_v50  ;;  %v5424_v50 = vld [vmem:[%s5730_s28 + $0x418] sm:$0xff]  }
  0x72   : > { %4830 = vmatprep.subr.bf16.mxu0 %v5374_v55  ;;  %4851 = vmatpush3.bf16.msra.mxu1 %v5373_v54  ;;  %v5428_v54 = vld [vmem:[%s5730_s28 + $0x420] sm:$0xff]  }
  0x73   : > { %4852 = vmatprep.subr.bf16.mxu1 %v5376_v59  ;;  %v5429_v55 = vld [vmem:[%s5730_s28 + $0x4e0] sm:$0xff]   ;;  %v5433_v59 = vld [vmem:[%s5730_s28 + $0x4e8] sm:$0xff]  }
  0x75   : > { %4831 = vmatpush3.bf16.msra.mxu0 %v5375_v57  ;;  %v5431_v57 = vld [vmem:[%s5730_s28 + $0x468] sm:$0xff]  }
  0x76   : > { %4860 = vmatprep.subr.bf16.mxu0 %v5378_v63  ;;  %4853 = vmatpush3.bf16.msra.mxu1 %v5377_v61  ;;  %v242_v61 = vld [vmem:[%s5725_s24 + $0x10] sm:$0xff] }
  0x77   : > { %4882 = vmatprep.subr.bf16.mxu1 %v5380_v2  ;;  %v1045_v63 = vrot.slane %v242_v61, %v5768_v42  ;;  %v5437_v2 = vld [vmem:[%s5730_s28 + $0x4f0] sm:$0xff]  }
  0x78   : > { %3508 = vmatmul.mubr.bf16.vlgmr.msra.gmra.mrb[8].mxu0 %v1012_v62  ;;  %v5435_v62 = vld [vmem:[%s5730_s28 + $0x470] sm:$0xff]  }
  0x79   : > { %4861 = vmatpush3.bf16.msra.mxu0 %v5379_v0  ;;  %3587 = vmatprep.mubr.bf16.mxu0 %v1033_v1  ;;  %v1038_v0 = vcombine.high %v242_v61, %v242_v61  ;;  %v5436_v1 = vld [vmem:[%s5730_s28 + $0x430] sm:$0xff]  }
  0x7a   : > { %3548 = vmatmul.mubr.bf16.vlgmr.msra.gmra.mrb[8].mxu1 %v1034_v4  ;;  %4862 = vmatprep.subr.bf16.mxu0 %v5382_v5  ;;  %v5438_v5 = vld [vmem:[%s5730_s28 + $0x4b0] sm:$0xff]  }
  0x7b   : > { %4883 = vmatpush3.bf16.msra.mxu1 %v5381_v3  ;;  %3627 = vmatprep.mubr.bf16.mxu1 %v1037_v7  ;;  %v1053_v3 = vcombine.high %v1045_v63, %v1045_v63  ;;  %v5917_v4 = vrot.slane %v1038_v0, %v5768_v42  ;;  %v5485_v61 = vld [vmem:[%s5730_s28 + $0x610] sm:$0xff]   ;;  %v5488_v0 = vld [vmem:[%s5730_s28 + $0x658] sm:$0xff]  }
  0x7c   : > { %4884 = vmatprep.subr.bf16.mxu1 %v5384_v8  ;;  %v5440_v8 = vld [vmem:[%s5730_s28 + $0x438] sm:$0xff]  }
  0x7d   : > { %4863 = vmatpush3.bf16.msra.mxu0 %v5383_v6  ;;  %v5439_v6 = vld [vmem:[%s5730_s28 + $0x478] sm:$0xff]   ;;  %v1075_v7 = vrot.slane %v1053_v3, %v5768_v42 }
  0x7e   : > { %4864 = vmatprep.subr.bf16.mxu0 %v5386_v10  ;;  %v5441_v10 = vld [vmem:[%s5730_s28 + $0x4f8] sm:$0xff]  }
  0x7f   : > { %4885 = vmatpush3.bf16.msra.mxu1 %v5385_v9  ;;  %v1054_v9 = vcombine.high %v5917_v4, %v5917_v4  ;;  %v5491_v3 = vld [vmem:[%s5730_s28 + $0x698] sm:$0xff]  }
  0x80   : > { %4886 = vmatprep.subr.bf16.mxu1 %v5388_v12  ;;  %v5442_v12 = vld [vmem:[%s5730_s28 + $0x4b8] sm:$0xff]  }
  0x81   : > { %4865 = vmatpush3.bf16.msra.mxu0 %v5387_v11  ;;  %v1085_v11 = vcombine.high %v1075_v7, %v1075_v7 }
  0x82   : > { %4866 = vmatprep.subr.bf16.mxu0 %v5390_v14  ;;  %v5443_v14 = vld [vmem:[%s5730_s28 + $0x540] sm:$0xff]  }
  0x83   : > { %4887 = vmatpush3.bf16.msra.mxu1 %v5389_v13  ;;  %v1061_v13 = vrot.slane %v1045_v63, %v5768_v42  ;;  %v5487_v63 = vld [vmem:[%s5730_s28 + $0x690] sm:$0xff]  }
  0x84   : > { %4888 = vmatprep.subr.bf16.mxu1 %v5392_v16  ;;  %v1082_v16 = vrot.slane %v1054_v9, %v5768_v42  ;;  %v5497_v9 = vld [vmem:[%s5730_s28 + $0x628] sm:$0xff]  }
  0x85   : > { %4867 = vmatpush3.bf16.msra.mxu0 %v5391_v15  ;;  %v5444_v15 = vld [vmem:[%s5730_s28 + $0x500] sm:$0xff]  }
  0x86   : > { %4868 = vmatprep.subr.bf16.mxu0 %v5394_v18  ;;  %v5446_v18 = vld [vmem:[%s5730_s28 + $0x580] sm:$0xff]  }
  0x87   : > { %4889 = vmatpush3.bf16.msra.mxu1 %v5393_v17  ;;  %v5445_v17 = vld [vmem:[%s5730_s28 + $0x5c0] sm:$0xff]  }
  0x88   : > { %4890 = vmatprep.subr.bf16.mxu1 %v5396_v20  ;;  %v5447_v20 = vld [vmem:[%s5730_s28 + $0x548] sm:$0xff]  }
  0x89   : > { %4869 = vmatpush3.bf16.msra.mxu0 %v5395_v19  ;;  %v1083_v19 = vcombine.high %v1061_v13, %v1061_v13 }
  0x8a   : > { %4870 = vmatprep.subr.bf16.mxu0 %v5398_v22  ;;  %v1086_v22 = vcombine.high %v1082_v16, %v1082_v16 }
  0x8b   : > { %4891 = vmatpush3.bf16.msra.mxu1 %v5397_v21  ;;  %v5448_v21 = vld [vmem:[%s5730_s28 + $0x508] sm:$0xff]  }
  0x8c   : > { %4892 = vmatprep.subr.bf16.mxu1 %v5400_v24  ;;  %v5450_v24 = vld [vmem:[%s5730_s28 + $0x588] sm:$0xff]  }
  0x8d   : > { %4871 = vmatpush3.bf16.msra.mxu0 %v5399_v23  ;;  %v5449_v23 = vld [vmem:[%s5730_s28 + $0x5c8] sm:$0xff]  }
  0x8e   : > { %4872 = vmatprep.subr.bf16.mxu0 %v5402_v26  ;;  %v5452_v26 = vld [vmem:[%s5730_s28 + $0x510] sm:$0xff]  }
  0x8f   : > { %4893 = vmatpush3.bf16.msra.mxu1 %v5401_v25  ;;  %v5451_v25 = vld [vmem:[%s5730_s28 + $0x550] sm:$0xff]  }
  0x90   : > { %4894 = vmatprep.subr.bf16.mxu1 %v5404_v28  ;;  %v5454_v28 = vld [vmem:[%s5730_s28 + $0x590] sm:$0xff]  }
  0x91   : > { %4873 = vmatpush3.bf16.msra.mxu0 %v5403_v27  ;;  %v5453_v27 = vld [vmem:[%s5730_s28 + $0x5d0] sm:$0xff]  }
  0x92   : > { %4874 = vmatprep.subr.bf16.mxu0 %v5406_v30  ;;  %v5456_v30 = vld [vmem:[%s5730_s28 + $0x518] sm:$0xff]  }
  0x93   : > { %4895 = vmatpush3.bf16.msra.mxu1 %v5405_v29  ;;  %v5455_v29 = vld [vmem:[%s5730_s28 + $0x558] sm:$0xff]  }
  0x94   : > { %4896 = vmatprep.subr.bf16.mxu1 %v5408_v32  ;;  %v5458_v32 = vld [vmem:[%s5730_s28 + $0x598] sm:$0xff]  }
  0x95   : > { %4875 = vmatpush3.bf16.msra.mxu0 %v5407_v31  ;;  %v5457_v31 = vld [vmem:[%s5730_s28 + $0x5d8] sm:$0xff]  }
  0x96   : > { %4904 = vmatprep.subr.bf16.mxu0 %v5411_v35  ;;  %v5461_v35 = vld [vmem:[%s5730_s28 + $0x5e0] sm:$0xff]  }
  0x97   : > { %4897 = vmatpush3.bf16.msra.mxu1 %v5410_v33  ;;  %v5459_v33 = vld [vmem:[%s5730_s28 + $0x560] sm:$0xff]  }
  0x98   : > { %3588 = vmatmul.mubr.bf16.vlgmr.msra.gmra.mrb[12].mxu0 %v1019_v34  ;;  %4926 = vmatprep.subr.bf16.mxu1 %v5413_v37  ;;  %v5460_v34 = vld [vmem:[%s5730_s28 + $0x520] sm:$0xff]   ;;  %v5463_v37 = vld [vmem:[%s5730_s28 + $0x568] sm:$0xff]  }
  0x99   : > { %4905 = vmatpush3.bf16.msra.mxu0 %v5412_v36  ;;  %3667 = vmatprep.mubr.bf16.mxu0 %v1075_v7  ;;  %v5462_v36 = vld [vmem:[%s5730_s28 + $0x5a0] sm:$0xff]  }
  0x9a   : > { %3628 = vmatmul.mubr.bf16.vlgmr.msra.gmra.mrb[12].mxu1 %v1035_v39  ;;  %4906 = vmatprep.subr.bf16.mxu0 %v5415_v40  ;;  %v5465_v39 = vld [vmem:[%s5730_s28 + $0x5e8] sm:$0xff]   ;;  %v5495_v7 = vld [vmem:[%s5730_s28 + $0x6a0] sm:$0xff]  }
  0x9b   : > { %4927 = vmatpush3.bf16.msra.mxu1 %v5414_v38  ;;  %3707 = vmatprep.mubr.bf16.mxu1 %v1085_v11  ;;  %v5464_v38 = vld [vmem:[%s5730_s28 + $0x528] sm:$0xff]  }
  0x9c   : > { %4928 = vmatprep.subr.bf16.mxu1 %v5417_v43  ;;  %v5466_v40 = vld [vmem:[%s5730_s28 + $0x5a8] sm:$0xff]   ;;  %v5468_v43 = vld [vmem:[%s5730_s28 + $0x530] sm:$0xff]  }
  0x9d   : > { %4907 = vmatpush3.bf16.msra.mxu0 %v5416_v41  ;;  %v5467_v41 = vld [vmem:[%s5730_s28 + $0x570] sm:$0xff]   ;;  %v5499_v11 = vld [vmem:[%s5730_s28 + $0x6a8] sm:$0xff]  }
  0x9e   : > { %4908 = vmatprep.subr.bf16.mxu0 %v5419_v45  ;;  %v5470_v45 = vld [vmem:[%s5730_s28 + $0x5b0] sm:$0xff]  }
  0x9f   : > { %4929 = vmatpush3.bf16.msra.mxu1 %v5418_v44  ;;  %v5469_v44 = vld [vmem:[%s5730_s28 + $0x5f0] sm:$0xff]  }
  0xa0   : > { %4930 = vmatprep.subr.bf16.mxu1 %v5421_v47  ;;  %v5472_v47 = vld [vmem:[%s5730_s28 + $0x538] sm:$0xff]  }
  0xa1   : > { %4909 = vmatpush3.bf16.msra.mxu0 %v5420_v46  ;;  %v5471_v46 = vld [vmem:[%s5730_s28 + $0x578] sm:$0xff]  }
  0xa2   : > { %4910 = vmatprep.subr.bf16.mxu0 %v5423_v49  ;;  %v5475_v49 = vld [vmem:[%s5730_s28 + $0x5b8] sm:$0xff]  }
  0xa3   : > { %4931 = vmatpush3.bf16.msra.mxu1 %v5422_v48  ;;  %v5473_v48 = vld [vmem:[%s5730_s28 + $0x5f8] sm:$0xff]  }
  0xa4   : > { %4932 = vmatprep.subr.bf16.mxu1 %v5425_v51  ;;  %v5476_v51 = vld [vmem:[%s5730_s28 + $0x640] sm:$0xff]  }
  0xa5   : > { %4911 = vmatpush3.bf16.msra.mxu0 %v5424_v50  ;;  %v1068_v50 = vrot.slane %v5917_v4, %v5768_v42  ;;  %v5492_v4 = vld [vmem:[%s5730_s28 + $0x660] sm:$0xff]  }
  0xa6   : > { %4912 = vmatprep.subr.bf16.mxu0 %v5427_v53  ;;  %v5478_v53 = vld [vmem:[%s5730_s28 + $0x6c0] sm:$0xff]  }
  0xa7   : > { %4933 = vmatpush3.bf16.msra.mxu1 %v5426_v52  ;;  %v5477_v52 = vld [vmem:[%s5730_s28 + $0x600] sm:$0xff]  }
  0xa8   : > { %4934 = vmatprep.subr.bf16.mxu1 %v5429_v55  ;;  %v1084_v55 = vcombine.high %v1068_v50, %v1068_v50 }
  0xa9   : > { %4913 = vmatpush3.bf16.msra.mxu0 %v5428_v54  ;;  %v5479_v54 = vld [vmem:[%s5730_s28 + $0x680] sm:$0xff]  }
  0xaa   : > { %4914 = vmatprep.subr.bf16.mxu0 %v5431_v57  ;;  %v5481_v57 = vld [vmem:[%s5730_s28 + $0x608] sm:$0xff]  }
  0xab   : > { %4935 = vmatpush3.bf16.msra.mxu1 %v5430_v56  ;;  %v5480_v56 = vld [vmem:[%s5730_s28 + $0x648] sm:$0xff]  }
  0xac   : > { %4936 = vmatprep.subr.bf16.mxu1 %v5433_v59  ;;  %v5483_v59 = vld [vmem:[%s5730_s28 + $0x688] sm:$0xff]  }
  0xad   : > { %4915 = vmatpush3.bf16.msra.mxu0 %v5432_v58  ;;  %v5482_v58 = vld [vmem:[%s5730_s28 + $0x6c8] sm:$0xff]  }
  0xae   : > { %4916 = vmatprep.subr.bf16.mxu0 %v5435_v62  ;;  %v5486_v62 = vld [vmem:[%s5730_s28 + $0x6d0] sm:$0xff]  }
  0xaf   : > { %4937 = vmatpush3.bf16.msra.mxu1 %v5434_v60  ;;  %v5484_v60 = vld [vmem:[%s5730_s28 + $0x650] sm:$0xff]  }
  0xb0   : > { %4938 = vmatprep.subr.bf16.mxu1 %v5437_v2  ;;  %v5490_v2 = vld [vmem:[%s5730_s28 + $0x6d8] sm:$0xff]  }
  0xb1   : > { %4917 = vmatpush3.bf16.msra.mxu0 %v5436_v1  ;;  %v5489_v1 = vld [vmem:[%s5730_s28 + $0x618] sm:$0xff]  }
  0xb2   : > { %4918 = vmatprep.subr.bf16.mxu0 %v5439_v6  ;;  %v5494_v6 = vld [vmem:[%s5730_s28 + $0x6e0] sm:$0xff]  }
  0xb3   : > { %4939 = vmatpush3.bf16.msra.mxu1 %v5438_v5  ;;  %v5493_v5 = vld [vmem:[%s5730_s28 + $0x620] sm:$0xff]  }
  0xb4   : > { %4940 = vmatprep.subr.bf16.mxu1 %v5441_v10  ;;  %v5498_v10 = vld [vmem:[%s5730_s28 + $0x6e8] sm:$0xff]  }
  0xb5   : > { %4919 = vmatpush3.bf16.msra.mxu0 %v5440_v8  ;;  %v5496_v8 = vld [vmem:[%s5730_s28 + $0x668] sm:$0xff]  }
  0xb6   : > { %4948 = vmatprep.subr.bf16.mxu0 %v5443_v14  ;;  %v5501_v14 = vld [vmem:[%s5730_s28 + $0x630] sm:$0xff]  }
  0xb7   : > { %4941 = vmatpush3.bf16.msra.mxu1 %v5442_v12  ;;  %v5500_v12 = vld [vmem:[%s5730_s28 + $0x670] sm:$0xff]  }
  0xb8   : > { %3668 = vmatmul.mubr.bf16.vlgmr.msra.gmra.mrb[16].mxu0 %v1061_v13  ;;  %4970 = vmatprep.subr.bf16.mxu1 %v5445_v17  ;;  %v243_v13 = vld [vmem:[%s5725_s24 + $0x18] sm:$0xff]  ;;  %v5502_v17 = vld [vmem:[%s5730_s28 + $0x6f0] sm:$0xff]  }
  0xb9   : > { %4949 = vmatpush3.bf16.msra.mxu0 %v5444_v15  ;;  %3747 = vmatprep.mubr.bf16.mxu0 %v1082_v16  ;;  %v1094_v15 = vrot.slane %v243_v13, %v5768_v42  ;;  %v1087_v16 = vcombine.high %v243_v13, %v243_v13  ;;  %v5541_v13 = vld [vmem:[%s5730_s28 + $0x840] sm:$0xff]  }
  0xba   : > { %3708 = vmatmul.mubr.bf16.vlgmr.msra.gmra.mrb[16].mxu1 %v1083_v19  ;;  %4950 = vmatprep.subr.bf16.mxu0 %v5447_v20 }
  0xbb   : > { %4971 = vmatpush3.bf16.msra.mxu1 %v5446_v18  ;;  %3787 = vmatprep.mubr.bf16.mxu1 %v1086_v22  ;;  %v5503_v18 = vld [vmem:[%s5730_s28 + $0x6b0] sm:$0xff]   ;;  %v1102_v19 = vcombine.high %v1094_v15, %v1094_v15  ;;  %v5994_v20 = vrot.slane %v1087_v16, %v5768_v42  ;;  %v5505_v22 = vld [vmem:[%s5730_s28 + $0x638] sm:$0xff]   ;;  %v5544_v16 = vld [vmem:[%s5730_s28 + $0x880] sm:$0xff]  }
  0xbc   : > { %4972 = vmatprep.subr.bf16.mxu1 %v5449_v23 }
  0xbd   : > { %4951 = vmatpush3.bf16.msra.mxu0 %v5448_v21  ;;  %v5504_v21 = vld [vmem:[%s5730_s28 + $0x678] sm:$0xff]   ;;  %v1124_v23 = vrot.slane %v1102_v19, %v5768_v42  ;;  %v5546_v19 = vld [vmem:[%s5730_s28 + $0x808] sm:$0xff]  }
  0xbe   : > { %4952 = vmatprep.subr.bf16.mxu0 %v5451_v25  ;;  %v5506_v25 = vld [vmem:[%s5730_s28 + $0x6f8] sm:$0xff]  }
  0xbf   : > { %4973 = vmatpush3.bf16.msra.mxu1 %v5450_v24  ;;  %v1103_v24 = vcombine.high %v5994_v20, %v5994_v20 }
  0xc0   : > { %4974 = vmatprep.subr.bf16.mxu1 %v5453_v27  ;;  %v1134_v27 = vcombine.high %v1124_v23, %v1124_v23 }
  0xc1   : > { %4953 = vmatpush3.bf16.msra.mxu0 %v5452_v26  ;;  %v5507_v26 = vld [vmem:[%s5730_s28 + $0x6b8] sm:$0xff]  }
  0xc2   : > { %4954 = vmatprep.subr.bf16.mxu0 %v5455_v29  ;;  %v5508_v29 = vld [vmem:[%s5730_s28 + $0x740] sm:$0xff]  }
  0xc3   : > { %4975 = vmatpush3.bf16.msra.mxu1 %v5454_v28  ;;  %v1110_v28 = vrot.slane %v1094_v15, %v5768_v42  ;;  %v5543_v15 = vld [vmem:[%s5730_s28 + $0x8c0] sm:$0xff]  }
  0xc4   : > { %4976 = vmatprep.subr.bf16.mxu1 %v5457_v31  ;;  %v1131_v31 = vrot.slane %v1103_v24, %v5768_v42  ;;  %v5551_v24 = vld [vmem:[%s5730_s28 + $0x8d0] sm:$0xff]  }
  0xc5   : > { %4955 = vmatpush3.bf16.msra.mxu0 %v5456_v30  ;;  %v5509_v30 = vld [vmem:[%s5730_s28 + $0x700] sm:$0xff]  }
  0xc6   : > { %4956 = vmatprep.subr.bf16.mxu0 %v5459_v33  ;;  %v5511_v33 = vld [vmem:[%s5730_s28 + $0x780] sm:$0xff]  }
  0xc7   : > { %4977 = vmatpush3.bf16.msra.mxu1 %v5458_v32  ;;  %v5510_v32 = vld [vmem:[%s5730_s28 + $0x7c0] sm:$0xff]  }
  0xc8   : > { %4978 = vmatprep.subr.bf16.mxu1 %v5461_v35  ;;  %v5512_v35 = vld [vmem:[%s5730_s28 + $0x748] sm:$0xff]  }
  0xc9   : > { %4957 = vmatpush3.bf16.msra.mxu0 %v5460_v34  ;;  %v1132_v34 = vcombine.high %v1110_v28, %v1110_v28 }
  0xca   : > { %4958 = vmatprep.subr.bf16.mxu0 %v5463_v37  ;;  %v1135_v37 = vcombine.high %v1131_v31, %v1131_v31 }
  0xcb   : > { %4979 = vmatpush3.bf16.msra.mxu1 %v5462_v36  ;;  %v5513_v36 = vld [vmem:[%s5730_s28 + $0x708] sm:$0xff]  }
  0xcc   : > { %4980 = vmatprep.subr.bf16.mxu1 %v5465_v39  ;;  %v5515_v39 = vld [vmem:[%s5730_s28 + $0x788] sm:$0xff]  }
  0xcd   : > { %4959 = vmatpush3.bf16.msra.mxu0 %v5464_v38  ;;  %v5514_v38 = vld [vmem:[%s5730_s28 + $0x7c8] sm:$0xff]  }
  0xce   : > { %4960 = vmatprep.subr.bf16.mxu0 %v5467_v41  ;;  %v5517_v41 = vld [vmem:[%s5730_s28 + $0x710] sm:$0xff]  }
  0xcf   : > { %4981 = vmatpush3.bf16.msra.mxu1 %v5466_v40  ;;  %v5516_v40 = vld [vmem:[%s5730_s28 + $0x750] sm:$0xff]  }
  0xd0   : > { %4982 = vmatprep.subr.bf16.mxu1 %v5469_v44  ;;  %v5519_v44 = vld [vmem:[%s5730_s28 + $0x790] sm:$0xff]  }
  0xd1   : > { %4961 = vmatpush3.bf16.msra.mxu0 %v5468_v43  ;;  %v5518_v43 = vld [vmem:[%s5730_s28 + $0x7d0] sm:$0xff]  }
  0xd2   : > { %4962 = vmatprep.subr.bf16.mxu0 %v5471_v46  ;;  %v5521_v46 = vld [vmem:[%s5730_s28 + $0x718] sm:$0xff]  }
  0xd3   : > { %4983 = vmatpush3.bf16.msra.mxu1 %v5470_v45  ;;  %v5520_v45 = vld [vmem:[%s5730_s28 + $0x758] sm:$0xff]  }
  0xd4   : > { %4984 = vmatprep.subr.bf16.mxu1 %v5473_v48  ;;  %v5523_v48 = vld [vmem:[%s5730_s28 + $0x798] sm:$0xff]  }
  0xd5   : > { %4963 = vmatpush3.bf16.msra.mxu0 %v5472_v47  ;;  %v5522_v47 = vld [vmem:[%s5730_s28 + $0x7d8] sm:$0xff]  }
  0xd6   : > { %4992 = vmatprep.subr.bf16.mxu0 %v5476_v51  ;;  %v5526_v51 = vld [vmem:[%s5730_s28 + $0x7e0] sm:$0xff]  }
  0xd7   : > { %4985 = vmatpush3.bf16.msra.mxu1 %v5475_v49  ;;  %v5524_v49 = vld [vmem:[%s5730_s28 + $0x760] sm:$0xff]  }
  0xd8   : > { %3748 = vmatmul.mubr.bf16.vlgmr.msra.gmra.mrb[20].mxu0 %v1068_v50  ;;  %5014 = vmatprep.subr.bf16.mxu1 %v5478_v53  ;;  %v5525_v50 = vld [vmem:[%s5730_s28 + $0x720] sm:$0xff]   ;;  %v5528_v53 = vld [vmem:[%s5730_s28 + $0x768] sm:$0xff]  }
  0xd9   : > { %4993 = vmatpush3.bf16.msra.mxu0 %v5477_v52  ;;  %3827 = vmatprep.mubr.bf16.mxu0 %v1124_v23  ;;  %v5527_v52 = vld [vmem:[%s5730_s28 + $0x7a0] sm:$0xff]   ;;  %v5550_v23 = vld [vmem:[%s5730_s28 + $0x810] sm:$0xff]  }
  0xda   : > { %3788 = vmatmul.mubr.bf16.vlgmr.msra.gmra.mrb[20].mxu1 %v1084_v55  ;;  %4994 = vmatprep.subr.bf16.mxu0 %v5480_v56  ;;  %v5530_v55 = vld [vmem:[%s5730_s28 + $0x7e8] sm:$0xff]  }
  0xdb   : > { %5015 = vmatpush3.bf16.msra.mxu1 %v5479_v54  ;;  %3867 = vmatprep.mubr.bf16.mxu1 %v1134_v27  ;;  %v5529_v54 = vld [vmem:[%s5730_s28 + $0x728] sm:$0xff]   ;;  %v5554_v27 = vld [vmem:[%s5730_s28 + $0x818] sm:$0xff]  }
  0xdc   : > { %5016 = vmatprep.subr.bf16.mxu1 %v5482_v58  ;;  %v5531_v56 = vld [vmem:[%s5730_s28 + $0x7a8] sm:$0xff]  }
  0xdd   : > { %4995 = vmatpush3.bf16.msra.mxu0 %v5481_v57  ;;  %v5532_v57 = vld [vmem:[%s5730_s28 + $0x770] sm:$0xff]  }
  0xde   : > { %4996 = vmatprep.subr.bf16.mxu0 %v5484_v60 }
  0xdf   : > { %5017 = vmatpush3.bf16.msra.mxu1 %v5483_v59  ;;  %v5533_v59 = vld [vmem:[%s5730_s28 + $0x730] sm:$0xff]  }
  0xe0   : > { %5018 = vmatprep.subr.bf16.mxu1 %v5486_v62 }
  0xe1   : > { %4997 = vmatpush3.bf16.msra.mxu0 %v5485_v61  ;;  %v5534_v61 = vld [vmem:[%s5730_s28 + $0x7f0] sm:$0xff]  }
  0xe2   : > { %4998 = vmatprep.subr.bf16.mxu0 %v5488_v0 }
  0xe3   : > { %5019 = vmatpush3.bf16.msra.mxu1 %v5487_v63 }
  0xe4   : > { %5020 = vmatprep.subr.bf16.mxu1 %v5490_v2  ;;  %v5536_v2 = vld [vmem:[%s5730_s28 + $0x778] sm:$0xff]  }
  0xe5   : > { %4999 = vmatpush3.bf16.msra.mxu0 %v5489_v1  ;;  %v5535_v1 = vld [vmem:[%s5730_s28 + $0x7b0] sm:$0xff]  }
  0xe6   : > { %5000 = vmatprep.subr.bf16.mxu0 %v5492_v4 }
  0xe7   : > { %5021 = vmatpush3.bf16.msra.mxu1 %v5491_v3 }
  0xe8   : > { %5022 = vmatprep.subr.bf16.mxu1 %v5494_v6 }
  0xe9   : > { %5001 = vmatpush3.bf16.msra.mxu0 %v5493_v5 }
  0xea   : > { %5002 = vmatprep.subr.bf16.mxu0 %v5496_v8 }
  0xeb   : > { %5023 = vmatpush3.bf16.msra.mxu1 %v5495_v7  ;;  %v5537_v7 = vld [vmem:[%s5730_s28 + $0x738] sm:$0xff]  }
  0xec   : > { %5024 = vmatprep.subr.bf16.mxu1 %v5498_v10 }
  0xed   : > { %5003 = vmatpush3.bf16.msra.mxu0 %v5497_v9  ;;  %v5538_v9 = vld [vmem:[%s5730_s28 + $0x7f8] sm:$0xff]  }
  0xee   : > { %5004 = vmatprep.subr.bf16.mxu0 %v5500_v12  ;;  %v1117_v12 = vrot.slane %v5994_v20, %v5768_v42  ;;  %v5547_v20 = vld [vmem:[%s5730_s28 + $0x8c8] sm:$0xff]  }
  0xef   : > { %5025 = vmatpush3.bf16.msra.mxu1 %v5499_v11  ;;  %v5540_v11 = vld [vmem:[%s5730_s28 + $0x7b8] sm:$0xff]  }
  0xf0   : > { %5026 = vmatprep.subr.bf16.mxu1 %v5502_v17  ;;  %v1133_v17 = vcombine.high %v1117_v12, %v1117_v12 }
  0xf1   : > { %5005 = vmatpush3.bf16.msra.mxu0 %v5501_v14  ;;  %v5542_v14 = vld [vmem:[%s5730_s28 + $0x800] sm:$0xff]  }
  0xf2   : > { %5006 = vmatprep.subr.bf16.mxu0 %v5504_v21  ;;  %v5548_v21 = vld [vmem:[%s5730_s28 + $0x888] sm:$0xff]  }
  0xf3   : > { %5027 = vmatpush3.bf16.msra.mxu1 %v5503_v18  ;;  %v5545_v18 = vld [vmem:[%s5730_s28 + $0x848] sm:$0xff]  }
  0xf4   : > { %5028 = vmatprep.subr.bf16.mxu1 %v5506_v25  ;;  %v5552_v25 = vld [vmem:[%s5730_s28 + $0x890] sm:$0xff]  }
  0xf5   : > { %5007 = vmatpush3.bf16.msra.mxu0 %v5505_v22  ;;  %v5549_v22 = vld [vmem:[%s5730_s28 + $0x850] sm:$0xff]  }
  0xf6   : > { %5036 = vmatprep.subr.bf16.mxu0 %v5508_v29  ;;  %v5556_v29 = vld [vmem:[%s5730_s28 + $0x898] sm:$0xff]  }
  0xf7   : > { %5029 = vmatpush3.bf16.msra.mxu1 %v5507_v26  ;;  %v5553_v26 = vld [vmem:[%s5730_s28 + $0x858] sm:$0xff]  }
  0xf8   : > { %3828 = vmatmul.mubr.bf16.vlgmr.msra.gmra.mrb[24].mxu0 %v1110_v28  ;;  %5058 = vmatprep.subr.bf16.mxu1 %v5510_v32  ;;  %v5555_v28 = vld [vmem:[%s5730_s28 + $0x8d8] sm:$0xff]   ;;  %v5559_v32 = vld [vmem:[%s5730_s28 + $0x8e0] sm:$0xff]  }
  0xf9   : > { %5037 = vmatpush3.bf16.msra.mxu0 %v5509_v30  ;;  %3907 = vmatprep.mubr.bf16.mxu0 %v1131_v31  ;;  %v5557_v30 = vld [vmem:[%s5730_s28 + $0x860] sm:$0xff]  }
  0xfa   : > { %3868 = vmatmul.mubr.bf16.vlgmr.msra.gmra.mrb[24].mxu1 %v1132_v34  ;;  %5038 = vmatprep.subr.bf16.mxu0 %v5512_v35  ;;  %v5558_v31 = vld [vmem:[%s5730_s28 + $0x820] sm:$0xff]   ;;  %v5561_v34 = vld [vmem:[%s5730_s28 + $0x868] sm:$0xff]  }
  0xfb   : > { %5059 = vmatpush3.bf16.msra.mxu1 %v5511_v33  ;;  %3947 = vmatprep.mubr.bf16.mxu1 %v1135_v37  ;;  %v5560_v33 = vld [vmem:[%s5730_s28 + $0x8a0] sm:$0xff]   ;;  %v5562_v35 = vld [vmem:[%s5730_s28 + $0x828] sm:$0xff]  }
  0xfc   : > { %5060 = vmatprep.subr.bf16.mxu1 %v5514_v38  ;;  %v5564_v37 = vld [vmem:[%s5730_s28 + $0x8a8] sm:$0xff]   ;;  %v5565_v38 = vld [vmem:[%s5730_s28 + $0x870] sm:$0xff]  }
  0xfd   : > { %5039 = vmatpush3.bf16.msra.mxu0 %v5513_v36  ;;  %v5563_v36 = vld [vmem:[%s5730_s28 + $0x8e8] sm:$0xff]  }
  0xfe   : > { %5040 = vmatprep.subr.bf16.mxu0 %v5516_v40 }
  0xff   : > { %5061 = vmatpush3.bf16.msra.mxu1 %v5515_v39  ;;  %v244_v39 = vld [vmem:[%s5725_s24 + $0x20] sm:$0xff] }
 0x100   : > { %5062 = vmatprep.subr.bf16.mxu1 %v5518_v43  ;;  %v1143_v43 = vrot.slane %v244_v39, %v5768_v42 }
 0x101   : > { %5041 = vmatpush3.bf16.msra.mxu0 %v5517_v41  ;;  %v5566_v41 = vld [vmem:[%s5730_s28 + $0x830] sm:$0xff]  }
 0x102   : > { %5042 = vmatprep.subr.bf16.mxu0 %v5520_v45 }
 0x103   : > { %5063 = vmatpush3.bf16.msra.mxu1 %v5519_v44  ;;  %v1136_v44 = vcombine.high %v244_v39, %v244_v39  ;;  %v5601_v39 = vld [vmem:[%s5730_s28 + $0x978] sm:$0xff]  }
 0x104   : > { %5064 = vmatprep.subr.bf16.mxu1 %v5522_v47 }
 0x105   : > { %5043 = vmatpush3.bf16.msra.mxu0 %v5521_v46  ;;  %v5567_v46 = vld [vmem:[%s5730_s28 + $0x8f0] sm:$0xff]  }
 0x106   : > { %5044 = vmatprep.subr.bf16.mxu0 %v5524_v49 }
 0x107   : > { %5065 = vmatpush3.bf16.msra.mxu1 %v5523_v48 }
 0x108   : > { %5066 = vmatprep.subr.bf16.mxu1 %v5526_v51  ;;  %v6071_v51 = vrot.slane %v1136_v44, %v5768_v42 }
 0x109   : > { %5045 = vmatpush3.bf16.msra.mxu0 %v5525_v50  ;;  %v1151_v50 = vcombine.high %v1143_v43, %v1143_v43 }
 0x10a   : > { %5046 = vmatprep.subr.bf16.mxu0 %v5528_v53 }
 0x10b   : > { %v4744_v58 = vpop.f32.mrb[0].mxu0  ;;  %5067 = vmatpush3.bf16.msra.mxu1 %v5527_v52 }
 0x10c   : > { %v4745_v60 = vpop.f32.mrb[1].mxu0  ;;  %5068 = vmatprep.subr.bf16.mxu1 %v5530_v55  ;;  %v4766_v62 = vpop.f32.mrb[0].mxu1  ;;  %v5569_v55 = vld [vmem:[%s5730_s28 + $0x878] sm:$0xff]  }
 0x10d   : > { %v4746_v63 = vadd.f32 %v4745_v60, %v4744_v58  ;;  %v4747_v0 = vpop.f32.mrb[2].mxu0  ;;  %5047 = vmatpush3.bf16.msra.mxu0 %v5529_v54  ;;  %v4767_v3 = vpop.f32.mrb[1].mxu1  ;;  %v5568_v54 = vld [vmem:[%s5730_s28 + $0x8b0] sm:$0xff]   ;;  %v1173_v60 = vrot.slane %v1151_v50, %v5768_v42  ;;  %v5602_v50 = vld [vmem:[%s5730_s28 + $0x938] sm:$0xff]  }
 0x10e   : > { %v4748_v4 = vpop.f32.mrb[3].mxu0  ;;  %5048 = vmatprep.subr.bf16.mxu0 %v5532_v57  ;;  %v4768_v5 = vadd.f32 %v4767_v3, %v4766_v62  ;;  %v4769_v6 = vpop.f32.mrb[2].mxu1  ;;  %v5571_v62 = vld [vmem:[%s5730_s28 + $0x8f8] sm:$0xff]   ;;  %v5573_v3 = vld [vmem:[%s5730_s28 + $0x940] sm:$0xff]  }
 0x10f   : > { %5069 = vmatpush3.bf16.msra.mxu1 %v5531_v56  ;;  %v4770_v8 = vpop.f32.mrb[3].mxu1  ;;  %v5572_v4 = vld [vmem:[%s5730_s28 + $0x8b8] sm:$0xff]   ;;  %v5575_v6 = vld [vmem:[%s5730_s28 + $0x9c0] sm:$0xff]  }
 0x110   : > { %5070 = vmatprep.subr.bf16.mxu1 %v5534_v61  ;;  %v6036_v10 = vadd.f32 %v4768_v5, %v4746_v63  ;;  %v1152_v63 = vcombine.high %v6071_v51, %v6071_v51 }
 0x111   : > { %5049 = vmatpush3.bf16.msra.mxu0 %v5533_v59  ;;  %v5570_v59 = vld [vmem:[%s5730_s28 + $0x838] sm:$0xff]  }
 0x112   : > { %5050 = vmatprep.subr.bf16.mxu0 %v5536_v2  ;;  %v1159_v2 = vrot.slane %v1143_v43, %v5768_v42  ;;  %v1180_v5 = vrot.slane %v1152_v63, %v5768_v42  ;;  %v5615_v63 = vld [vmem:[%s5730_s28 + $0xa58] sm:$0xff]  }
 0x113   : > { %5071 = vmatpush3.bf16.msra.mxu1 %v5535_v1  ;;  %v1183_v1 = vcombine.high %v1173_v60, %v1173_v60 }
 0x114   : > { %5072 = vmatprep.subr.bf16.mxu1 %v5538_v9  ;;  %v1181_v8 = vcombine.high %v1159_v2, %v1159_v2  ;;  %v5577_v9 = vld [vmem:[%s5730_s28 + $0x948] sm:$0xff]  }
 0x115   : > { %5051 = vmatpush3.bf16.msra.mxu0 %v5537_v7  ;;  %v5574_v7 = vld [vmem:[%s5730_s28 + $0x900] sm:$0xff]  }
 0x116   : > { %5080 = vmatprep.subr.bf16.mxu0 %v5541_v13  ;;  %v5578_v13 = vld [vmem:[%s5730_s28 + $0x908] sm:$0xff]  }
 0x117   : > { %5073 = vmatpush3.bf16.msra.mxu1 %v5540_v11  ;;  %v1184_v11 = vcombine.high %v1180_v5, %v1180_v5 }
 0x118   : > { %3908 = vmatmul.mubr.bf16.vlgmr.msra.gmra.mrb[28].mxu0 %v1117_v12  ;;  %5102 = vmatprep.subr.bf16.mxu1 %v5543_v15  ;;  %v5579_v12 = vld [vmem:[%s5730_s28 + $0x9c8] sm:$0xff]  }
 0x119   : > { %5081 = vmatpush3.bf16.msra.mxu0 %v5542_v14  ;;  %3987 = vmatprep.mubr.bf16.mxu0 %v1173_v60  ;;  %v5581_v14 = vld [vmem:[%s5730_s28 + $0x950] sm:$0xff]   ;;  %v5580_v15 = vld [vmem:[%s5730_s28 + $0x988] sm:$0xff]  }
 0x11a   : > { %3948 = vmatmul.mubr.bf16.vlgmr.msra.gmra.mrb[28].mxu1 %v1133_v17  ;;  %5082 = vmatprep.subr.bf16.mxu0 %v5545_v18  ;;  %v5582_v17 = vld [vmem:[%s5730_s28 + $0x910] sm:$0xff]   ;;  %v5585_v18 = vld [vmem:[%s5730_s28 + $0x958] sm:$0xff]  }
 0x11b   : > { %5103 = vmatpush3.bf16.msra.mxu1 %v5544_v16  ;;  %4027 = vmatprep.mubr.bf16.mxu1 %v1183_v1  ;;  %v5583_v16 = vld [vmem:[%s5730_s28 + $0x9d0] sm:$0xff]   ;;  %v5616_v1 = vld [vmem:[%s5730_s28 + $0xa18] sm:$0xff]  }
 0x11c   : > { %5104 = vmatprep.subr.bf16.mxu1 %v5547_v20  ;;  %v5587_v20 = vld [vmem:[%s5730_s28 + $0x9d8] sm:$0xff]   ;;  %v5612_v60 = vld [vmem:[%s5730_s28 + $0xa50] sm:$0xff]  }
 0x11d   : > { %5083 = vmatpush3.bf16.msra.mxu0 %v5546_v19  ;;  %v5584_v19 = vld [vmem:[%s5730_s28 + $0x990] sm:$0xff]  }
 0x11e   : > { %5084 = vmatprep.subr.bf16.mxu0 %v5549_v22  ;;  %v5589_v22 = vld [vmem:[%s5730_s28 + $0x960] sm:$0xff]  }
 0x11f   : > { %5105 = vmatpush3.bf16.msra.mxu1 %v5548_v21  ;;  %v5586_v21 = vld [vmem:[%s5730_s28 + $0x918] sm:$0xff]  }
 0x120   : > { %5106 = vmatprep.subr.bf16.mxu1 %v5551_v24  ;;  %v5591_v24 = vld [vmem:[%s5730_s28 + $0x9e0] sm:$0xff]  }
 0x121   : > { %5085 = vmatpush3.bf16.msra.mxu0 %v5550_v23  ;;  %v5588_v23 = vld [vmem:[%s5730_s28 + $0x998] sm:$0xff]  }
 0x122   : > { %5086 = vmatprep.subr.bf16.mxu0 %v5553_v26  ;;  %v5593_v26 = vld [vmem:[%s5730_s28 + $0x968] sm:$0xff]  }
 0x123   : > { %5107 = vmatpush3.bf16.msra.mxu1 %v5552_v25  ;;  %v5590_v25 = vld [vmem:[%s5730_s28 + $0x920] sm:$0xff]  }
 0x124   : > { %5108 = vmatprep.subr.bf16.mxu1 %v5555_v28  ;;  %v5595_v28 = vld [vmem:[%s5730_s28 + $0x9e8] sm:$0xff]  }
 0x125   : > { %5087 = vmatpush3.bf16.msra.mxu0 %v5554_v27  ;;  %v5592_v27 = vld [vmem:[%s5730_s28 + $0x9a0] sm:$0xff]  }
 0x126   : > { %5088 = vmatprep.subr.bf16.mxu0 %v5557_v30  ;;  %v5597_v30 = vld [vmem:[%s5730_s28 + $0x970] sm:$0xff]  }
 0x127   : > { %5109 = vmatpush3.bf16.msra.mxu1 %v5556_v29  ;;  %v5594_v29 = vld [vmem:[%s5730_s28 + $0x928] sm:$0xff]  }
 0x128   : > { %5110 = vmatprep.subr.bf16.mxu1 %v5559_v32  ;;  %v5596_v32 = vld [vmem:[%s5730_s28 + $0x9a8] sm:$0xff]  }
 0x129   : > { %5089 = vmatpush3.bf16.msra.mxu0 %v5558_v31 }
 0x12a   : > { %5090 = vmatprep.subr.bf16.mxu0 %v5561_v34  ;;  %v5599_v34 = vld [vmem:[%s5730_s28 + $0x9f0] sm:$0xff]  }
 0x12b   : > { %v4788_v40 = vpop.f32.mrb[4].mxu0  ;;  %5111 = vmatpush3.bf16.msra.mxu1 %v5560_v33 }
 0x12c   : > { %v4789_v45 = vpop.f32.mrb[5].mxu0  ;;  %5112 = vmatprep.subr.bf16.mxu1 %v5563_v36  ;;  %v4810_v49 = vpop.f32.mrb[4].mxu1 }
 0x12d   : > { %v4790_v47 = vadd.f32 %v4789_v45, %v4788_v40  ;;  %v4791_v48 = vpop.f32.mrb[6].mxu0  ;;  %5091 = vmatpush3.bf16.msra.mxu0 %v5562_v35  ;;  %v4811_v53 = vpop.f32.mrb[5].mxu1 }
 0x12e   : > { %v4792_v52 = vpop.f32.mrb[7].mxu0  ;;  %5092 = vmatprep.subr.bf16.mxu0 %v5565_v38  ;;  %v4812_v57 = vadd.f32 %v4811_v53, %v4810_v49  ;;  %v4813_v58 = vpop.f32.mrb[6].mxu1  ;;  %v5598_v38 = vld [vmem:[%s5730_s28 + $0x930] sm:$0xff]   ;;  %v5603_v48 = vld [vmem:[%s5730_s28 + $0x9f8] sm:$0xff]   ;;  %v5606_v53 = vld [vmem:[%s5730_s28 + $0xa40] sm:$0xff]  }
 0x12f   : > { %v3430_v56 = vadd.f32 %v4790_v47, %v6036_v10  ;;  %5113 = vmatpush3.bf16.msra.mxu1 %v5564_v37  ;;  %v4814_v61 = vpop.f32.mrb[7].mxu1  ;;  %v5576_v10 = vld [vmem:[%s5730_s28 + $0x980] sm:$0xff]   ;;  %v1166_v52 = vrot.slane %v6071_v51, %v5768_v42  ;;  %v5610_v51 = vld [vmem:[%s5730_s28 + $0xa08] sm:$0xff]  }
 0x130   : > { %5114 = vmatprep.subr.bf16.mxu1 %v5567_v46  ;;  %v5600_v46 = vld [vmem:[%s5730_s28 + $0x9b0] sm:$0xff]   ;;  %v5608_v58 = vld [vmem:[%s5730_s28 + $0xa80] sm:$0xff]   ;;  %v5611_v61 = vld [vmem:[%s5730_s28 + $0xa88] sm:$0xff]  }
 0x131   : > { %v6081_v0 = vadd.f32 %v4812_v57, %v3430_v56  ;;  %5093 = vmatpush3.bf16.msra.mxu0 %v5566_v41  ;;  %v1182_v56 = vcombine.high %v1166_v52, %v1166_v52  ;;  %v5609_v57 = vld [vmem:[%s5730_s28 + $0xa48] sm:$0xff]  }
 0x132   : > { %5094 = vmatprep.subr.bf16.mxu0 %v5569_v55  ;;  %v5607_v55 = vld [vmem:[%s5730_s28 + $0xa00] sm:$0xff]  }
 0x133   : > { %5115 = vmatpush3.bf16.msra.mxu1 %v5568_v54  ;;  %v5605_v54 = vld [vmem:[%s5730_s28 + $0x9b8] sm:$0xff]  }
 0x134   : > { %5116 = vmatprep.subr.bf16.mxu1 %v5571_v62  ;;  %v5613_v62 = vld [vmem:[%s5730_s28 + $0xa10] sm:$0xff]  }
 0x135   : > { %5095 = vmatpush3.bf16.msra.mxu0 %v5570_v59  ;;  %v5674_v59 = vmov 0.0  }
 0x136   : > { %5124 = vmatprep.subr.bf16.mxu0 %v5573_v3  ;;  %v5617_v3 = vld [vmem:[%s5730_s28 + $0xa98] sm:$0xff]  }
 0x137   : > { %5117 = vmatpush3.bf16.msra.mxu1 %v5572_v4  ;;  %v4375_v4 = vld.sshfl [vmem:[%s5725_s24 + $0x28] sm:$0x13 pattern:$0x75316420] }
 0x138   : > { %3988 = vmatmul.mubr.bf16.vlgmr.msra.gmra.mrb[32].mxu0 %v1159_v2  ;;  %5146 = vmatprep.subr.bf16.mxu1 %v5575_v6  ;;  %v5618_v2 = vld [vmem:[%s5730_s28 + $0xa60] sm:$0xff]   ;;  %v1192_v6 = vcombine.high %v4375_v4, %v4375_v4 }
 0x139   : > { %5125 = vmatpush3.bf16.msra.mxu0 %v5574_v7  ;;  %4067 = vmatprep.mubr.bf16.mxu0 %v1180_v5  ;;  %v5619_v5 = vld [vmem:[%s5730_s28 + $0xa20] sm:$0xff]   ;;  %v5621_v7 = vld [vmem:[%s5730_s28 + $0xa68] sm:$0xff]  }
 0x13a   : > { %4028 = vmatmul.mubr.bf16.vlgmr.msra.gmra.mrb[32].mxu1 %v1181_v8  ;;  %5126 = vmatprep.subr.bf16.mxu0 %v5577_v9  ;;  %v5620_v8 = vld [vmem:[%s5730_s28 + $0xaa0] sm:$0xff]   ;;  %v1206_v9 = vrot.slane %v1192_v6, %v5768_v42 }
 0x13b   : > { %5147 = vmatpush3.bf16.msra.mxu1 %v5576_v10  ;;  %4107 = vmatprep.mubr.bf16.mxu1 %v1184_v11  ;;  %v5622_v10 = vld [vmem:[%s5730_s28 + $0xa28] sm:$0xff]   ;;  %v5624_v11 = vld [vmem:[%s5730_s28 + $0xa70] sm:$0xff]  }
 0x13c   : > { %5148 = vmatprep.subr.bf16.mxu1 %v5579_v12 }
 0x13d   : > { %5127 = vmatpush3.bf16.msra.mxu0 %v5578_v13  ;;  %v5623_v13 = vld [vmem:[%s5730_s28 + $0xaa8] sm:$0xff]  }
 0x13e   : > { %5128 = vmatprep.subr.bf16.mxu0 %v5581_v14 }
 0x13f   : > { %5149 = vmatpush3.bf16.msra.mxu1 %v5580_v15 }
 0x140   : > { %5150 = vmatprep.subr.bf16.mxu1 %v5583_v16 }
 0x141   : > { %5129 = vmatpush3.bf16.msra.mxu0 %v5582_v17 }
 0x142   : > { %5130 = vmatprep.subr.bf16.mxu0 %v5585_v18  ;;  %v5625_v18 = vld [vmem:[%s5730_s28 + $0xa30] sm:$0xff]  }
 0x143   : > { %5151 = vmatpush3.bf16.msra.mxu1 %v5584_v19 }
 0x144   : > { %5152 = vmatprep.subr.bf16.mxu1 %v5587_v20 }
 0x145   : > { %5131 = vmatpush3.bf16.msra.mxu0 %v5586_v21  ;;  %v5627_v21 = vld [vmem:[%s5730_s28 + $0xa78] sm:$0xff]  }
 0x146   : > { %5132 = vmatprep.subr.bf16.mxu0 %v5589_v22 }
 0x147   : > { %5153 = vmatpush3.bf16.msra.mxu1 %v5588_v23 }
 0x148   : > { %5154 = vmatprep.subr.bf16.mxu1 %v5591_v24 }
 0x149   : > { %5133 = vmatpush3.bf16.msra.mxu0 %v5590_v25  ;;  %v5626_v25 = vld [vmem:[%s5730_s28 + $0xab0] sm:$0xff]  }
 0x14a   : > { %5134 = vmatprep.subr.bf16.mxu0 %v5593_v26 }
 0x14b   : > { %v4832_v31 = vpop.f32.mrb[8].mxu0  ;;  %5155 = vmatpush3.bf16.msra.mxu1 %v5592_v27 }
 0x14c   : > { %v4833_v33 = vpop.f32.mrb[9].mxu0  ;;  %5156 = vmatprep.subr.bf16.mxu1 %v5595_v28  ;;  %v5628_v28 = vld [vmem:[%s5730_s28 + $0xa38] sm:$0xff]  }
 0x14d   : > { %v4834_v35 = vadd.f32 %v4833_v33, %v4832_v31  ;;  %v4835_v36 = vpop.f32.mrb[10].mxu0  ;;  %v4854_v37 = vpop.f32.mrb[8].mxu1  ;;  %5135 = vmatpush3.bf16.msra.mxu0 %v5594_v29  ;;  %v1199_v29 = vrot.slane %v4375_v4, %v5768_v42 }
 0x14e   : > { %v4836_v40 = vpop.f32.mrb[11].mxu0  ;;  %v4855_v41 = vpop.f32.mrb[9].mxu1  ;;  %5136 = vmatprep.subr.bf16.mxu0 %v5597_v30  ;;  %v5629_v30 = vld [vmem:[%s5730_s28 + $0xab8] sm:$0xff]  }
 0x14f   : > { %v3510_v43 = vadd.f32 %v4834_v35, %v6081_v0  ;;  %v4856_v44 = vadd.f32 %v4855_v41, %v4854_v37  ;;  %5157 = vmatpush3.bf16.msra.mxu1 %v5596_v32  ;;  %v4857_v45 = vpop.f32.mrb[10].mxu1  ;;  %v5614_v0 = vld [vmem:[%s5730_s28 + $0xa90] sm:$0xff]   ;;  %v1207_v31 = vcombine.high %v1199_v29, %v1199_v29 }
 0x150   : > { %v4858_v47 = vpop.f32.mrb[11].mxu1  ;;  %5158 = vmatprep.subr.bf16.mxu1 %v5599_v34 }
 0x151   : > { %v6117_v49 = vadd.f32 %v4856_v44, %v3510_v43  ;;  %5137 = vmatpush3.bf16.msra.mxu0 %v5598_v38 }
 0x152   : > { %5138 = vmatprep.subr.bf16.mxu0 %v5601_v39 }
 0x153   : > { %5159 = vmatpush3.bf16.msra.mxu1 %v5600_v46 }
 0x154   : > { %5160 = vmatprep.subr.bf16.mxu1 %v5603_v48 }
 0x155   : > { %5139 = vmatpush3.bf16.msra.mxu0 %v5602_v50 }
 0x156   : > { %5168 = vmatprep.subr.bf16.mxu0 %v5606_v53 }
 0x157   : > { %5161 = vmatpush3.bf16.msra.mxu1 %v5605_v54 }
 0x158   : > { %4068 = vmatmul.mubr.bf16.vlgmr.msra.gmra.mrb[36].mxu0 %v1166_v52  ;;  %5208 = vmatprep.subr.bf16.mxu1 %v5674_v59 }
 0x159   : > { %5169 = vmatpush3.bf16.msra.mxu0 %v5607_v55  ;;  %4147 = vmatprep.mubr.bf16.mxu0 %v1206_v9 }
 0x15a   : > { %4108 = vmatmul.mubr.bf16.vlgmr.msra.gmra.mrb[36].mxu1 %v1182_v56  ;;  %5170 = vmatprep.subr.bf16.mxu0 %v5609_v57 }
 0x15b   : > { %5209 = vmatpush3.bf16.msra.mxu1 %v5608_v58  ;;  %5224 = vmatprep.mubr.msk.bf16.mxu1 %vm5675_vm1, %v5674_v59 }
 0x15c   : > { %5210 = vmatprep.subr.bf16.mxu1 %v5674_v59 }
 0x15d   : > { %5171 = vmatpush3.bf16.msra.mxu0 %v5610_v51 }
 0x15e   : > { %5172 = vmatprep.subr.bf16.mxu0 %v5612_v60 }
 0x15f   : > { %5211 = vmatpush3.bf16.msra.mxu1 %v5611_v61 }
 0x160   : > { %5212 = vmatprep.subr.bf16.mxu1 %v5674_v59 }
 0x161   : > { %5173 = vmatpush3.bf16.msra.mxu0 %v5613_v62 }
 0x162   : > { %5174 = vmatprep.subr.bf16.mxu0 %v5615_v63 }
 0x163   : > { %5213 = vmatpush3.bf16.msra.mxu1 %v5614_v0 }
 0x164   : > { %5214 = vmatprep.subr.bf16.mxu1 %v5674_v59 }
 0x165   : > { %5175 = vmatpush3.bf16.msra.mxu0 %v5616_v1 }
 0x166   : > { %5176 = vmatprep.subr.bf16.mxu0 %v5618_v2 }
 0x167   : > { %5215 = vmatpush3.bf16.msra.mxu1 %v5617_v3 }
 0x168   : > { %5216 = vmatprep.subr.bf16.mxu1 %v5674_v59 }
 0x169   : > { %5177 = vmatpush3.bf16.msra.mxu0 %v5619_v5 }
 0x16a   : > { %5178 = vmatprep.subr.bf16.mxu0 %v5621_v7 }
 0x16b   : > { %v4876_v12 = vpop.f32.mrb[12].mxu0  ;;  %5217 = vmatpush3.bf16.msra.mxu1 %v5620_v8 }
 0x16c   : > { %v4877_v14 = vpop.f32.mrb[13].mxu0  ;;  %5218 = vmatprep.subr.bf16.mxu1 %v5674_v59 }
 0x16d   : > { %v4878_v15 = vadd.f32 %v4877_v14, %v4876_v12  ;;  %v4879_v16 = vpop.f32.mrb[14].mxu0  ;;  %v4898_v17 = vpop.f32.mrb[12].mxu1  ;;  %5179 = vmatpush3.bf16.msra.mxu0 %v5622_v10 }
 0x16e   : > { %v4880_v19 = vpop.f32.mrb[15].mxu0  ;;  %v4899_v20 = vpop.f32.mrb[13].mxu1  ;;  %5180 = vmatprep.subr.bf16.mxu0 %v5624_v11 }
 0x16f   : > { %v3590_v22 = vadd.f32 %v4878_v15, %v6117_v49  ;;  %v4900_v23 = vadd.f32 %v4899_v20, %v4898_v17  ;;  %5219 = vmatpush3.bf16.msra.mxu1 %v5623_v13  ;;  %v4901_v24 = vpop.f32.mrb[14].mxu1 }
 0x170   : > { %v4902_v26 = vpop.f32.mrb[15].mxu1  ;;  %5220 = vmatprep.subr.bf16.mxu1 %v5674_v59 }
 0x171   : > { %v3630_v27 = vadd.f32 %v4900_v23, %v3590_v22  ;;  %5181 = vmatpush3.bf16.msra.mxu0 %v5625_v18 }
 0x172   : > { %5182 = vmatprep.subr.bf16.mxu0 %v5627_v21 }
 0x173   : > { %5221 = vmatpush3.bf16.msra.mxu1 %v5626_v25 }
 0x174   : > { %5222 = vmatprep.subr.bf16.mxu1 %v5674_v59 }
 0x175   : > { %5183 = vmatpush3.bf16.msra.mxu0 %v5628_v28 }
 0x177   : > { %5223 = vmatpush3.bf16.msra.mxu1 %v5629_v30 }
 0x178   : > { %4148 = vmatmul.mubr.bf16.vlgmr.msra.gmra.mrb[40].mxu0 %v1199_v29 }
 0x17a   : > { %5225 = vmatmul.mubr.bf16.vlgmr.msra.gmra.mrb[40].mxu1 %v1207_v31 }
 0x18b   : > { %v4920_v32 = vpop.f32.mrb[16].mxu0 }
 0x18c   : > { %v4921_v33 = vpop.f32.mrb[17].mxu0 }
 0x18d   : > { %v4922_v34 = vadd.f32 %v4921_v33, %v4920_v32  ;;  %v4923_v35 = vpop.f32.mrb[18].mxu0  ;;  %v4942_v36 = vpop.f32.mrb[16].mxu1 }
 0x18e   : > { %v4924_v37 = vpop.f32.mrb[19].mxu0  ;;  %v4943_v38 = vpop.f32.mrb[17].mxu1 }
 0x18f   : > { %v3670_v39 = vadd.f32 %v4922_v34, %v3630_v27  ;;  %v4944_v40 = vadd.f32 %v4943_v38, %v4942_v36  ;;  %v4945_v41 = vpop.f32.mrb[18].mxu1 }
 0x190   : > { %v4946_v42 = vpop.f32.mrb[19].mxu1 }
 0x191   : > { %v3710_v43 = vadd.f32 %v4944_v40, %v3670_v39 }
 0x1ab   : > { %v4964_v44 = vpop.f32.mrb[20].mxu0 }
 0x1ac   : > { %v4965_v45 = vpop.f32.mrb[21].mxu0 }
 0x1ad   : > { %v4966_v46 = vadd.f32 %v4965_v45, %v4964_v44  ;;  %v4967_v47 = vpop.f32.mrb[22].mxu0  ;;  %v4986_v48 = vpop.f32.mrb[20].mxu1 }
 0x1ae   : > { %v4968_v49 = vpop.f32.mrb[23].mxu0  ;;  %v4987_v50 = vpop.f32.mrb[21].mxu1 }
 0x1af   : > { %v3750_v52 = vadd.f32 %v4966_v46, %v3710_v43  ;;  %v4988_v53 = vadd.f32 %v4987_v50, %v4986_v48  ;;  %v4989_v54 = vpop.f32.mrb[22].mxu1  ;;  %v239_v49 = vld [vmem:[#allocation2] sm:$0x3] }
 0x1b0   : > { %v4990_v55 = vpop.f32.mrb[23].mxu1  ;;  %v4212_v54 = vld [vmem:[%s6223_s3] sm:$0xff] (!%p4720_p6) }
 0x1b1   : > { %v3790_v56 = vadd.f32 %v4988_v53, %v3750_v52  ;;  %v4213_v55 = vld [vmem:[%s6223_s3 + $0x8] sm:$0xff] (!%p4720_p6) }
 0x1cb   : > { %v5008_v57 = vpop.f32.mrb[24].mxu0 }
 0x1cc   : > { %v5009_v58 = vpop.f32.mrb[25].mxu0 }
 0x1cd   : > { %v5010_v59 = vadd.f32 %v5009_v58, %v5008_v57  ;;  %v5011_v51 = vpop.f32.mrb[26].mxu0  ;;  %v5030_v60 = vpop.f32.mrb[24].mxu1  ;;  %v5676_v57 = vmov (!%p4720_p6), 0.0|0.0   ;;  %v5248_v58 = vpack.c.bf16 (!%p4720_p6), %v4213_v55, %v4212_v54 }
 0x1ce   : > { %v5012_v61 = vpop.f32.mrb[27].mxu0  ;;  %v5031_v62 = vpop.f32.mrb[25].mxu1  ;;  %5247 = vmatprep.subr.bf16.mxu0 (!%p4720_p6), %v5676_v57  ;;  %v5678_v51 = vmov (!%p4720_p6), 0.0  }
 0x1cf   : > { %v3830_v63 = vadd.f32 %v5010_v59, %v3790_v56  ;;  %v5032_v0 = vadd.f32 %v5031_v62, %v5030_v60  ;;  %v5033_v1 = vpop.f32.mrb[26].mxu1  ;;  %v4214_v56 = vld [vmem:[%s6223_s3 + $0x10] sm:$0xff] (!%p4720_p6)  ;;  %v4215_v59 = vld [vmem:[%s6223_s3 + $0x18] sm:$0xff] (!%p4720_p6)  ;;  %5244 = vmatprep.mubr.msk.f32.mxu0 (!%p4720_p6), %vm5677_vm3, %v5678_v51  ;;  %5249 = vmatpush3.bf16.msra.mxu0 (!%p4720_p6), %v5248_v58  ;;  %v4216_v61 = vld [vmem:[%s6223_s3 + $0x20] sm:$0xff] (!%p4720_p6) }
 0x1d0   : > { %v5034_v2 = vpop.f32.mrb[27].mxu1  ;;  %v5251_v60 = vpack.c.bf16 (!%p4720_p6), %v4215_v59, %v4214_v56  ;;  %5250 = vmatprep.subr.bf16.mxu0 (!%p4720_p6), %v5676_v57  ;;  %v4217_v62 = vld [vmem:[%s6223_s3 + $0x28] sm:$0xff] (!%p4720_p6)  ;;  %v4721_v1 = vld [vmem:[%s6222_s2] ss:$0 sm:$0xff] (!%p4720_p6) }
 0x1d1   : > { %v3870_v3 = vadd.f32 %v5032_v0, %v3830_v63  ;;  %v5254_v63 = vpack.c.bf16 (!%p4720_p6), %v4217_v62, %v4216_v61  ;;  %v4218_v2 = vld [vmem:[%s6223_s3 + $0x30] sm:$0xff] (!%p4720_p6) }
 0x1d3   : > { %5252 = vmatpush3.bf16.msra.mxu0 (!%p4720_p6), %v5251_v60 }
 0x1d4   : > { %5253 = vmatprep.subr.bf16.mxu0 (!%p4720_p6), %v5676_v57 }
 0x1d7   : > { %5255 = vmatpush3.bf16.msra.mxu0 (!%p4720_p6), %v5254_v63 }
 0x1d8   : > { %5256 = vmatprep.subr.bf16.mxu0 (!%p4720_p6), %v5676_v57 }
 0x1eb   : > { %v5052_v4 = vpop.f32.mrb[28].mxu0 }
 0x1ec   : > { %v5053_v5 = vpop.f32.mrb[29].mxu0 }
 0x1ed   : > { %v5054_v6 = vadd.f32 %v5053_v5, %v5052_v4  ;;  %v5055_v7 = vpop.f32.mrb[30].mxu0  ;;  %v5074_v8 = vpop.f32.mrb[28].mxu1 }
 0x1ee   : > { %v5056_v9 = vpop.f32.mrb[31].mxu0  ;;  %v5075_v10 = vpop.f32.mrb[29].mxu1  ;;  %v4722_v7 = vld [vmem:[%s6224_s4] ss:$0 sm:$0xff] (!%p4720_p6) }
 0x1ef   : > { %v3910_v11 = vadd.f32 %v5054_v6, %v3870_v3  ;;  %v5076_v12 = vadd.f32 %v5075_v10, %v5074_v8  ;;  %v5077_v13 = vpop.f32.mrb[30].mxu1  ;;  %v4219_v3 = vld [vmem:[%s6223_s3 + $0x38] sm:$0xff] (!%p4720_p6) }
 0x1f0   : > { %v5078_v14 = vpop.f32.mrb[31].mxu1  ;;  %v5257_v5 = vpack.c.bf16 (!%p4720_p6), %v4219_v3, %v4218_v2 }
 0x1f1   : > { %v3950_v15 = vadd.f32 %v5076_v12, %v3910_v11 }
 0x1f2   : > { %5258 = vmatpush3.bf16.msra.mxu0 (!%p4720_p6), %v5257_v5 }
 0x20b   : > { %v5096_v16 = vpop.f32.mrb[32].mxu0 }
 0x20c   : > { %v5097_v17 = vpop.f32.mrb[33].mxu0 }
 0x20d   : > { %v5098_v18 = vadd.f32 %v5097_v17, %v5096_v16  ;;  %v5099_v19 = vpop.f32.mrb[34].mxu0  ;;  %v5118_v20 = vpop.f32.mrb[32].mxu1 }
 0x20e   : > { %v5100_v21 = vpop.f32.mrb[35].mxu0  ;;  %v5119_v22 = vpop.f32.mrb[33].mxu1 }
 0x20f   : > { %v3990_v23 = vadd.f32 %v5098_v18, %v3950_v15  ;;  %v5120_v24 = vadd.f32 %v5119_v22, %v5118_v20  ;;  %v5121_v25 = vpop.f32.mrb[34].mxu1 }
 0x210   : > { %v5122_v26 = vpop.f32.mrb[35].mxu1 }
 0x211   : > { %v4030_v27 = vadd.f32 %v5120_v24, %v3990_v23 }
 0x22b   : > { %v5140_v28 = vpop.f32.mrb[36].mxu0 }
 0x22c   : > { %v5141_v29 = vpop.f32.mrb[37].mxu0 }
 0x22d   : > { %v5142_v30 = vadd.f32 %v5141_v29, %v5140_v28  ;;  %v5143_v31 = vpop.f32.mrb[38].mxu0  ;;  %v5162_v32 = vpop.f32.mrb[36].mxu1 }
 0x22e   : > { %v5144_v33 = vpop.f32.mrb[39].mxu0  ;;  %v5163_v34 = vpop.f32.mrb[37].mxu1 }
 0x22f   : > { %v4070_v35 = vadd.f32 %v5142_v30, %v4030_v27  ;;  %v5164_v36 = vadd.f32 %v5163_v34, %v5162_v32  ;;  %v5165_v37 = vpop.f32.mrb[38].mxu1 }
 0x230   : > { %v5166_v38 = vpop.f32.mrb[39].mxu1 }
 0x231   : > { %v4110_v39 = vadd.f32 %v5164_v36, %v4070_v35 }
 0x24b   : > { %v5184_v40 = vpop.f32.mrb[40].mxu0 }
 0x24c   : > { %v5185_v41 = vpop.f32.mrb[41].mxu0 }
 0x24d   : > { %v5186_v42 = vadd.f32 %v5185_v41, %v5184_v40  ;;  %v5187_v43 = vpop.f32.mrb[42].mxu0  ;;  %v4189_v44 = vpop.f32.mrb[40].mxu1 }
 0x24e   : > { %v5188_v45 = vpop.f32.mrb[43].mxu0  ;;  %v5226_v46 = vpop.f32.mrb[41].mxu1 }
 0x24f   : > { %v4150_v47 = vadd.f32 %v5186_v42, %v4110_v39  ;;  %v4192_v48 = vpop.f32.mrb[42].mxu1  ;;  %4201 = sbr.rel (%p4720_p6) target bundleno = 1138 (0x472), region = 48 }
 0x250   : > { %v5227_v50 = vpop.f32.mrb[43].mxu1 }
 0x251   : > { %v4190_v52 = vadd.f32 %v4189_v44, %v4150_v47 }
 0x253   : > { %v4195_v53 = vadd.f32 %v4190_v52, %v239_v49 }
 0x255   : > { %4197 = vst.msk [vmem:[#allocation2] sm:$0x3] %vm4196_vm2, %v4195_v53 }
 0x25c   : > { %v4202_v0 = vld [vmem:[#allocation2] sm:$0x3] }
 0x25d   : > { %v4210_v4 = vadd.f32 %v4721_v1, %v4202_v0 }
 0x25f   : > { %v4211_v6 = vmax.f32 %v4210_v4, 0.0 }
 0x261   : > { %5245 = vmatmul.mubr.msk.f32.vlgmr.msra.gmra.mrb[0].mxu0 %vm4227_vm4, %v4211_v6 }
 0x334   : > { %v4297_v8 = vpop.f32.mrb[0].mxu0 }
 0x335   : > { %v4298_v9 = vadd.f32 %v4722_v7, %v4297_v8  ;;  %v5246_v10 = vpop.f32.mrb[1].mxu0 }
 0x337   : > { %v4302_v11 = vsel %vm4301_vm5, %v4298_v9, -inf }
 0x338   : > { %4303 = vmax.xlane.f32.xlu0 %v4302_v11 }
 0x3c5   : > { %v4304_v12 = vpop.xlane.xlu0 %4303 }
 0x3c6   : > { %v4305_v13 = vsub.f32 %v4298_v9, %v4304_v12 }
 0x3c8   : > { %v4306_v14 = vmul.f32 1.442695, %v4305_v13 }
 0x3ca   : > { %5630 = vpow2.f32 %v4306_v14 }
 0x3d4   : > { %v5631_v15 = vpop.eup %5630 }
 0x3d5   : > { %v4308_v16 = vsel %vm4301_vm5, %v5631_v15, 0.0 }
 0x3d6   : > { %4309 = vadd.xlane.f32.xlu0 %v4308_v16 }
 0x463   : > { %v4310_v17 = vpop.xlane.xlu0 %4309 }
 0x464   : > { %5632 = vrcp.f32 %v4310_v17 }
 0x46e   : > { %v5633_v18 = vpop.eup %5632 }
 0x46f   : > { %v4312_v19 = vmul.f32 %v5633_v18, %v5631_v15 }
 0x471   : > { %4313 = vst.msk [vmem:[#allocation3] sm:$0x3] %vm4301_vm5, %v4312_v19 }
 0x472 PF: > { %p5263_p7 = scmp.eq.s32.totalorder %s5716_s19, 7  ;;  %s5679_s26 = smov [#allocation3]  }
 0x473   : > { %s4321_s27 = sshll.u32 %s5679_s26, 4  ;;  %s4322_s27 = int_to_ptr.vmem [resolvable:$true] %s4321_s27 }
 0x474   : > { %s5634_s28 = scalar_lea.vmem %s4322_s27, 32  ;;  %p5641_p11 = scmp.lt.s32.totalorder %s4322_s27, %s4322_s27 }
 0x475   : > { %p5635_p8 = scmp.ne.s32.totalorder %s4322_s27, %s5634_s28  ;;  %p5642_p12 = scmp.lt.s32.totalorder %s5634_s28, %s5634_s28 }
 0x477   : > { %p5636_p9 = pnand %p5635_p8, %p5263_p7  ;;  %p5643_p13 = por %p5642_p12, %p5641_p11 }
 0x479   : > { %p5637_p10 = pneg %p5636_p9 }
 0x47b   : > { %p5644_p0 = pnand %p5643_p13, %p5637_p10 }
 0x47d   : > { %5647 = shalt.err (!%p5644_p0)
}
 0x47e   : > { %s5648_s6 = scalar_lea.hbm %s6225_s5, 32 }
 0x47f   : > { %p5649_p1 = scmp.ne.s32.totalorder %s6225_s5, %s5648_s6  ;;  %p5654_p4 = scmp.lt.u32.totalorder %s5648_s6, %s6225_s5 }
 0x481   : > { %p5650_p2 = pnand %p5649_p1, %p5263_p7 }
 0x483   : > { %p5651_p3 = pneg %p5650_p2 }
 0x485   : > { %p5656_p5 = pnand %p5654_p4, %p5651_p3 }
 0x487   : > { %5659 = shalt.err (!%p5656_p5)
}
 0x488   : > { %5260 = dma.vmem_to_hbm [thread:$0]  (%p5263_p7), %s4322_s27, 32, %s6225_s5, [#allocation4]  }
 0x489   : > { %5665 = dma.done.wait (%p5263_p7), [#allocation4], 32  }
 0x48a   : > { %5667 = vsyncadd (%p5263_p7), [#allocation4], 4294967264 }
 0x48b PF: > { %s16_s18 = sadd.s32 1, %s5670_s18  }
 0x48c   : > { %p13_p6 = scmp.ge.s32.totalorder %s16_s18, 10  }
 0x48e   :  { %15 = sbr.rel (!%p13_p6) target bundleno = 1 (0x1), region = 78 }
 0x495   :  { %4334 = vsyncpa [#allocation4], 1 }
 0x496   :  { %4336 = vsyncpa [#allocation4 + $0x1], 1 }

</bundles_post_ra>
